<compile_context>
chip_gen: v6e
topology: v6e:2x2x1
jax: 0.10.0
libtpu: 0.0.40
codegen_flags: <defaults>
</compile_context>

<pallas_src>
import math

import jax
import jax.numpy as jnp
from jax import lax
from jax.experimental import pallas as pl
from jax.experimental.pallas import tpu as pltpu

# ---------------- synthetic encoder config (small but lane-dense) ------------
VOCAB = 100        # vocab size
TYPE_VOCAB = 2     # token-type vocab
MAX_POS = 64       # max position embeddings
PAD_ID = 1         # RoBERTa padding_idx
B = 2              # batch  (raise B/S to fill the MXU: weights stay resident)
S = 8              # sequence length
H = 128            # hidden size (multiple of 128 -> lane-dense)
NH = 4             # attention heads
HD = H // NH       # head dim
FF = 256           # FFN intermediate size (multiple of 128)
NL = 2             # number of encoder layers
BS = B * S         # total rows processed per matmul
LN_EPS = 1e-5
NEG_INF = -1e9     # effectively -inf for f32 softmax (exp underflows to 0)


# ---------------- in-kernel helpers ------------------------------------------
def _layernorm(x, g, b):
    mu = jnp.mean(x, axis=-1, keepdims=True)
    var = jnp.mean((x - mu) ** 2, axis=-1, keepdims=True)
    return (x - mu) * lax.rsqrt(var + LN_EPS) * g + b


# ---------------- single fused kernel: gathers + embeddings + NL layers + CLS -
def roberta_kernel(ids_ref, tt_ref, mask_ref,
                   we_ref, pe_ref, te_ref,
                   emb_g_ref, emb_b_ref,
                   wqkv_ref, bqkv_ref, wo_ref, bo_ref,
                   ln1g_ref, ln1b_ref,
                   wi_ref, bi_ref, wf_ref, bf_ref,
                   ln2g_ref, ln2b_ref,
                   out_ref):
    # ---- Embedding gathers in-kernel: ids read as scalars from SMEM, tables
    # resident in VMEM, rows assembled in registers (no scratch, no wrapper ops).
    rows = []
    for b in range(B):
        cum = jnp.int32(0)
        for si in range(S):                                   # static unroll
            tok_raw = ids_ref[b, si]                          # SMEM scalar read
            tok = jnp.minimum(jnp.maximum(tok_raw, 0), VOCAB - 1)
            tt = jnp.minimum(jnp.maximum(tt_ref[b, si], 0), TYPE_VOCAB - 1)
            # RoBERTa position ids: advance only on non-pad tokens.
            is_real = (tok_raw != PAD_ID).astype(jnp.int32)
            cum = cum + is_real
            pos = jnp.minimum(cum * is_real + PAD_ID, MAX_POS - 1)
            rows.append(we_ref[pl.ds(tok, 1), :]
                        + pe_ref[pl.ds(pos, 1), :]
                        + te_ref[pl.ds(tt, 1), :])            # (1, H) f32
    emb = jnp.concatenate(rows, axis=0)                       # (BS, H) f32
    x = _layernorm(emb, emb_g_ref[...], emb_b_ref[...])       # f32 hidden state

    # HF-style additive attention mask: keep -> 0, masked -> -inf (effectively).
    add_mask = (1.0 - mask_ref[...].astype(jnp.float32)) * NEG_INF   # (B, S)

    scale = 1.0 / math.sqrt(HD)
    for l in range(NL):                                       # static unroll
        # Fused QKV projection: one bf16 MXU matmul for all of q, k, v.
        xb = x.astype(jnp.bfloat16)
        qkv = jnp.dot(xb, wqkv_ref[l],
                      preferred_element_type=jnp.float32) + bqkv_ref[l]   # (BS, 3H) f32
        q = qkv[:, 0 * H:1 * H]
        k = qkv[:, 1 * H:2 * H]
        v = qkv[:, 2 * H:3 * H]

        # Multi-head self-attention. Head contexts stay in registers and are
        # concatenated once along the lane axis (no VMEM scratch round-trip).
        batch_ctx = []
        for b in range(B):                                    # static, B=2
            amb = add_mask[b:b + 1, :]                        # (1, S)
            qb = q[b * S:(b + 1) * S, :]
            kb = k[b * S:(b + 1) * S, :]
            vb = v[b * S:(b + 1) * S, :]
            head_ctx = []
            for h in range(NH):                               # static, NH=4
                qh = qb[:, h * HD:(h + 1) * HD]
                kh = kb[:, h * HD:(h + 1) * HD]
                vh = vb[:, h * HD:(h + 1) * HD]
                # q @ k^T via dot_general contracting last dims (no explicit .T).
                sc = lax.dot_general(qh, kh, (((1,), (1,)), ((), ())),
                                     preferred_element_type=jnp.float32) * scale
                sc = sc + amb
                sc = sc - jnp.max(sc, axis=-1, keepdims=True)
                p = jnp.exp(sc)
                # approx reciprocal: EUP slot, ~free; exact-enough for serving.
                p = p * pl.reciprocal(jnp.sum(p, axis=-1, keepdims=True),
                                      approx=True)
                head_ctx.append(jnp.dot(p, vh,
                                        preferred_element_type=jnp.float32))
            batch_ctx.append(jnp.concatenate(head_ctx, axis=1))   # (S, H)
        ctx = jnp.concatenate(batch_ctx, axis=0)                  # (BS, H) f32

        attn = jnp.dot(ctx.astype(jnp.bfloat16), wo_ref[l],
                       preferred_element_type=jnp.float32) + bo_ref[l]
        x = _layernorm(x + attn, ln1g_ref[l], ln1b_ref[l])

        hmid = jnp.dot(x.astype(jnp.bfloat16), wi_ref[l],
                       preferred_element_type=jnp.float32) + bi_ref[l]
        # TODO(synk): tanh-approx GELU; HF RoBERTa uses erf-exact GELU (~1e-3 delta).
        hmid = jax.nn.gelu(hmid, approximate=True)
        ffo = jnp.dot(hmid.astype(jnp.bfloat16), wf_ref[l],
                      preferred_element_type=jnp.float32) + bf_ref[l]
        x = _layernorm(x + ffo, ln2g_ref[l], ln2b_ref[l])

    # encoder(...)[0][:, 0, :] -> CLS (position 0) vector, one lane-dense store.
    out_ref[...] = x.reshape(B, S, H)[:, 0, :]


# ---------------- parameter construction (deterministic, synthetic) ----------
def init_params(key):
    def dense(k, shape, dtype=jnp.float32):
        return (0.02 * jax.random.normal(k, shape)).astype(dtype)

    k_word, k_pos, k_type, k_layers = jax.random.split(key, 4)
    lk = jax.random.split(k_layers, 4 * NL)
    bf16 = jnp.bfloat16
    return {
        # Embedding tables + LN params stay f32.
        "word_emb": dense(k_word, (VOCAB, H)),
        "pos_emb": dense(k_pos, (MAX_POS, H)),
        "type_emb": dense(k_type, (TYPE_VOCAB, H)),
        "emb_ln_g": jnp.ones((1, H), jnp.float32),
        "emb_ln_b": jnp.zeros((1, H), jnp.float32),
        # Per-layer matmul weights stacked along NL, stored in bf16 (MXU path).
        "wqkv": jnp.stack([dense(lk[4 * l + 0], (H, 3 * H), bf16) for l in range(NL)]),
        "bqkv": jnp.zeros((NL, 1, 3 * H), jnp.float32),
        "wo": jnp.stack([dense(lk[4 * l + 1], (H, H), bf16) for l in range(NL)]),
        "bo": jnp.zeros((NL, 1, H), jnp.float32),
        "ln1g": jnp.ones((NL, 1, H), jnp.float32),
        "ln1b": jnp.zeros((NL, 1, H), jnp.float32),
        "wi": jnp.stack([dense(lk[4 * l + 2], (H, FF), bf16) for l in range(NL)]),
        "bi": jnp.zeros((NL, 1, FF), jnp.float32),
        "wf": jnp.stack([dense(lk[4 * l + 3], (FF, H), bf16) for l in range(NL)]),
        "bf": jnp.zeros((NL, 1, H), jnp.float32),
        "ln2g": jnp.ones((NL, 1, H), jnp.float32),
        "ln2b": jnp.zeros((NL, 1, H), jnp.float32),
    }


# ---------------- full forward: RobertaForSearch ------------------------------
@jax.jit
def roberta_for_search(params, input_ids, attention_mask, token_type_ids):
    # One fused pallas_call for the entire forward: no surrounding XLA ops.
    # ids / token-type ids -> SMEM (scalar reads drive in-kernel gathers);
    # everything else (tables, bf16 weights, mask) -> whole-array VMEM.
    smem = pl.BlockSpec(memory_space=pltpu.MemorySpace.SMEM)
    vmem = pl.BlockSpec(memory_space=pltpu.MemorySpace.VMEM)

    weight_elems = NL * (H * 3 * H + H * H + 2 * H * FF)
    flops = 2 * BS * weight_elems + NL * B * NH * 4 * S * S * HD
    transcendentals = NL * BS * FF + NL * B * NH * S * S
    bytes_accessed = (2 * weight_elems                                   # bf16 weights
                      + 4 * (VOCAB + MAX_POS + TYPE_VOCAB) * H           # f32 tables
                      + 4 * (NL * (3 * H + 6 * H + FF) + 2 * H)          # biases + LN
                      + 4 * 3 * B * S + 4 * B * H)                       # ids/mask/out

    return pl.pallas_call(
        roberta_kernel,
        out_shape=jax.ShapeDtypeStruct((B, H), jnp.float32),
        in_specs=[smem, smem] + [vmem] * 18,
        out_specs=vmem,
        cost_estimate=pl.CostEstimate(flops=int(flops),
                                      transcendentals=int(transcendentals),
                                      bytes_accessed=int(bytes_accessed)),
    )(input_ids.astype(jnp.int32), token_type_ids.astype(jnp.int32),
      attention_mask.astype(jnp.int32),
      params["word_emb"], params["pos_emb"], params["type_emb"],
      params["emb_ln_g"], params["emb_ln_b"],
      params["wqkv"], params["bqkv"], params["wo"], params["bo"],
      params["ln1g"], params["ln1b"],
      params["wi"], params["bi"], params["wf"], params["bf"],
      params["ln2g"], params["ln2b"])


if __name__ == "__main__":
    key = jax.random.PRNGKey(0)
    pkey, ikey = jax.random.split(key)

    params = init_params(pkey)
    input_ids = jax.random.randint(ikey, (B, S), 2, VOCAB, dtype=jnp.int32)
    attention_mask = jnp.ones((B, S), jnp.int32).at[1, S - 2:].set(0)  # padding in row 1
    input_ids = jnp.where(attention_mask == 1, input_ids, PAD_ID)      # pads where masked
    token_type_ids = jnp.zeros((B, S), jnp.int32)

    out = roberta_for_search(params, input_ids, attention_mask, token_type_ids)
    out = jax.block_until_ready(out)
    assert out.shape == (B, H) and out.dtype == jnp.float32
    assert bool(jnp.all(jnp.isfinite(out)))
    print("KERNEL_OK")
</pallas_src>

<mosaic_0001>
module attributes {stable_mosaic.version = 11 : i64} {
  func.func @roberta_kernel(%arg0: memref<2x8xi32, #tpu.memory_space<smem>>, %arg1: memref<2x8xi32, #tpu.memory_space<smem>>, %arg2: memref<2x8xi32, #tpu.memory_space<vmem>>, %arg3: memref<100x128xf32, #tpu.memory_space<vmem>>, %arg4: memref<64x128xf32, #tpu.memory_space<vmem>>, %arg5: memref<2x128xf32, #tpu.memory_space<vmem>>, %arg6: memref<1x128xf32, #tpu.memory_space<vmem>>, %arg7: memref<1x128xf32, #tpu.memory_space<vmem>>, %arg8: memref<2x128x384xbf16, #tpu.memory_space<vmem>>, %arg9: memref<2x1x384xf32, #tpu.memory_space<vmem>>, %arg10: memref<2x128x128xbf16, #tpu.memory_space<vmem>>, %arg11: memref<2x1x128xf32, #tpu.memory_space<vmem>>, %arg12: memref<2x1x128xf32, #tpu.memory_space<vmem>>, %arg13: memref<2x1x128xf32, #tpu.memory_space<vmem>>, %arg14: memref<2x128x256xbf16, #tpu.memory_space<vmem>>, %arg15: memref<2x1x256xf32, #tpu.memory_space<vmem>>, %arg16: memref<2x256x128xbf16, #tpu.memory_space<vmem>>, %arg17: memref<2x1x128xf32, #tpu.memory_space<vmem>>, %arg18: memref<2x1x128xf32, #tpu.memory_space<vmem>>, %arg19: memref<2x1x128xf32, #tpu.memory_space<vmem>>, %arg20: memref<2x128xf32, #tpu.memory_space<vmem>>) attributes {dimension_semantics = [], scalar_prefetch = 0 : i64, scratch_operands = 0 : i64, tpu.core_type = #tpu.core_type<tc>} {
    %c0 = arith.constant 0 : index
    %c0_0 = arith.constant 0 : index
    %0 = memref.load %arg0[%c0, %c0_0] : memref<2x8xi32, #tpu.memory_space<smem>>
    %c0_i32 = arith.constant 0 : i32
    %1 = arith.maxsi %0, %c0_i32 : i32
    %c99_i32 = arith.constant 99 : i32
    %2 = arith.minsi %1, %c99_i32 : i32
    %c0_1 = arith.constant 0 : index
    %c0_2 = arith.constant 0 : index
    %3 = memref.load %arg1[%c0_1, %c0_2] : memref<2x8xi32, #tpu.memory_space<smem>>
    %c0_i32_3 = arith.constant 0 : i32
    %4 = arith.maxsi %3, %c0_i32_3 : i32
    %c1_i32 = arith.constant 1 : i32
    %5 = arith.minsi %4, %c1_i32 : i32
    %c1_i32_4 = arith.constant 1 : i32
    %6 = arith.cmpi ne, %0, %c1_i32_4 : i32
    %7 = arith.extui %6 : i1 to i32
    %c0_i32_5 = arith.constant 0 : i32
    %8 = arith.addi %c0_i32_5, %7 : i32
    %9 = arith.muli %8, %7 : i32
    %c1_i32_6 = arith.constant 1 : i32
    %10 = arith.addi %9, %c1_i32_6 : i32
    %c63_i32 = arith.constant 63 : i32
    %11 = arith.minsi %10, %c63_i32 : i32
    %12 = arith.index_cast %2 : i32 to index
    %c0_7 = arith.constant 0 : index
    %13 = vector.load %arg3[%12, %c0_7] : memref<100x128xf32, #tpu.memory_space<vmem>>, vector<1x128xf32>
    %14 = arith.index_cast %11 : i32 to index
    %c0_8 = arith.constant 0 : index
    %15 = vector.load %arg4[%14, %c0_8] : memref<64x128xf32, #tpu.memory_space<vmem>>, vector<1x128xf32>
    %16 = arith.addf %13, %15 : vector<1x128xf32>
    %17 = arith.index_cast %5 : i32 to index
    %c0_9 = arith.constant 0 : index
    %18 = vector.load %arg5[%17, %c0_9] : memref<2x128xf32, #tpu.memory_space<vmem>>, vector<1x128xf32>
    %19 = arith.addf %16, %18 : vector<1x128xf32>
    %c0_10 = arith.constant 0 : index
    %c1 = arith.constant 1 : index
    %20 = memref.load %arg0[%c0_10, %c1] : memref<2x8xi32, #tpu.memory_space<smem>>
    %c0_i32_11 = arith.constant 0 : i32
    %21 = arith.maxsi %20, %c0_i32_11 : i32
    %c99_i32_12 = arith.constant 99 : i32
    %22 = arith.minsi %21, %c99_i32_12 : i32
    %c0_13 = arith.constant 0 : index
    %c1_14 = arith.constant 1 : index
    %23 = memref.load %arg1[%c0_13, %c1_14] : memref<2x8xi32, #tpu.memory_space<smem>>
    %c0_i32_15 = arith.constant 0 : i32
    %24 = arith.maxsi %23, %c0_i32_15 : i32
    %c1_i32_16 = arith.constant 1 : i32
    %25 = arith.minsi %24, %c1_i32_16 : i32
    %c1_i32_17 = arith.constant 1 : i32
    %26 = arith.cmpi ne, %20, %c1_i32_17 : i32
    %27 = arith.extui %26 : i1 to i32
    %28 = arith.addi %8, %27 : i32
    %29 = arith.muli %28, %27 : i32
    %c1_i32_18 = arith.constant 1 : i32
    %30 = arith.addi %29, %c1_i32_18 : i32
    %c63_i32_19 = arith.constant 63 : i32
    %31 = arith.minsi %30, %c63_i32_19 : i32
    %32 = arith.index_cast %22 : i32 to index
    %c0_20 = arith.constant 0 : index
    %33 = vector.load %arg3[%32, %c0_20] : memref<100x128xf32, #tpu.memory_space<vmem>>, vector<1x128xf32>
    %34 = arith.index_cast %31 : i32 to index
    %c0_21 = arith.constant 0 : index
    %35 = vector.load %arg4[%34, %c0_21] : memref<64x128xf32, #tpu.memory_space<vmem>>, vector<1x128xf32>
    %36 = arith.addf %33, %35 : vector<1x128xf32>
    %37 = arith.index_cast %25 : i32 to index
    %c0_22 = arith.constant 0 : index
    %38 = vector.load %arg5[%37, %c0_22] : memref<2x128xf32, #tpu.memory_space<vmem>>, vector<1x128xf32>
    %39 = arith.addf %36, %38 : vector<1x128xf32>
    %c0_23 = arith.constant 0 : index
    %c2 = arith.constant 2 : index
    %40 = memref.load %arg0[%c0_23, %c2] : memref<2x8xi32, #tpu.memory_space<smem>>
    %c0_i32_24 = arith.constant 0 : i32
    %41 = arith.maxsi %40, %c0_i32_24 : i32
    %c99_i32_25 = arith.constant 99 : i32
    %42 = arith.minsi %41, %c99_i32_25 : i32
    %c0_26 = arith.constant 0 : index
    %c2_27 = arith.constant 2 : index
    %43 = memref.load %arg1[%c0_26, %c2_27] : memref<2x8xi32, #tpu.memory_space<smem>>
    %c0_i32_28 = arith.constant 0 : i32
    %44 = arith.maxsi %43, %c0_i32_28 : i32
    %c1_i32_29 = arith.constant 1 : i32
    %45 = arith.minsi %44, %c1_i32_29 : i32
    %c1_i32_30 = arith.constant 1 : i32
    %46 = arith.cmpi ne, %40, %c1_i32_30 : i32
    %47 = arith.extui %46 : i1 to i32
    %48 = arith.addi %28, %47 : i32
    %49 = arith.muli %48, %47 : i32
    %c1_i32_31 = arith.constant 1 : i32
    %50 = arith.addi %49, %c1_i32_31 : i32
    %c63_i32_32 = arith.constant 63 : i32
    %51 = arith.minsi %50, %c63_i32_32 : i32
    %52 = arith.index_cast %42 : i32 to index
    %c0_33 = arith.constant 0 : index
    %53 = vector.load %arg3[%52, %c0_33] : memref<100x128xf32, #tpu.memory_space<vmem>>, vector<1x128xf32>
    %54 = arith.index_cast %51 : i32 to index
    %c0_34 = arith.constant 0 : index
    %55 = vector.load %arg4[%54, %c0_34] : memref<64x128xf32, #tpu.memory_space<vmem>>, vector<1x128xf32>
    %56 = arith.addf %53, %55 : vector<1x128xf32>
    %57 = arith.index_cast %45 : i32 to index
    %c0_35 = arith.constant 0 : index
    %58 = vector.load %arg5[%57, %c0_35] : memref<2x128xf32, #tpu.memory_space<vmem>>, vector<1x128xf32>
    %59 = arith.addf %56, %58 : vector<1x128xf32>
    %c0_36 = arith.constant 0 : index
    %c3 = arith.constant 3 : index
    %60 = memref.load %arg0[%c0_36, %c3] : memref<2x8xi32, #tpu.memory_space<smem>>
    %c0_i32_37 = arith.constant 0 : i32
    %61 = arith.maxsi %60, %c0_i32_37 : i32
    %c99_i32_38 = arith.constant 99 : i32
    %62 = arith.minsi %61, %c99_i32_38 : i32
    %c0_39 = arith.constant 0 : index
    %c3_40 = arith.constant 3 : index
    %63 = memref.load %arg1[%c0_39, %c3_40] : memref<2x8xi32, #tpu.memory_space<smem>>
    %c0_i32_41 = arith.constant 0 : i32
    %64 = arith.maxsi %63, %c0_i32_41 : i32
    %c1_i32_42 = arith.constant 1 : i32
    %65 = arith.minsi %64, %c1_i32_42 : i32
    %c1_i32_43 = arith.constant 1 : i32
    %66 = arith.cmpi ne, %60, %c1_i32_43 : i32
    %67 = arith.extui %66 : i1 to i32
    %68 = arith.addi %48, %67 : i32
    %69 = arith.muli %68, %67 : i32
    %c1_i32_44 = arith.constant 1 : i32
    %70 = arith.addi %69, %c1_i32_44 : i32
    %c63_i32_45 = arith.constant 63 : i32
    %71 = arith.minsi %70, %c63_i32_45 : i32
    %72 = arith.index_cast %62 : i32 to index
    %c0_46 = arith.constant 0 : index
    %73 = vector.load %arg3[%72, %c0_46] : memref<100x128xf32, #tpu.memory_space<vmem>>, vector<1x128xf32>
    %74 = arith.index_cast %71 : i32 to index
    %c0_47 = arith.constant 0 : index
    %75 = vector.load %arg4[%74, %c0_47] : memref<64x128xf32, #tpu.memory_space<vmem>>, vector<1x128xf32>
    %76 = arith.addf %73, %75 : vector<1x128xf32>
    %77 = arith.index_cast %65 : i32 to index
    %c0_48 = arith.constant 0 : index
    %78 = vector.load %arg5[%77, %c0_48] : memref<2x128xf32, #tpu.memory_space<vmem>>, vector<1x128xf32>
    %79 = arith.addf %76, %78 : vector<1x128xf32>
    %c0_49 = arith.constant 0 : index
    %c4 = arith.constant 4 : index
    %80 = memref.load %arg0[%c0_49, %c4] : memref<2x8xi32, #tpu.memory_space<smem>>
    %c0_i32_50 = arith.constant 0 : i32
    %81 = arith.maxsi %80, %c0_i32_50 : i32
    %c99_i32_51 = arith.constant 99 : i32
    %82 = arith.minsi %81, %c99_i32_51 : i32
    %c0_52 = arith.constant 0 : index
    %c4_53 = arith.constant 4 : index
    %83 = memref.load %arg1[%c0_52, %c4_53] : memref<2x8xi32, #tpu.memory_space<smem>>
    %c0_i32_54 = arith.constant 0 : i32
    %84 = arith.maxsi %83, %c0_i32_54 : i32
    %c1_i32_55 = arith.constant 1 : i32
    %85 = arith.minsi %84, %c1_i32_55 : i32
    %c1_i32_56 = arith.constant 1 : i32
    %86 = arith.cmpi ne, %80, %c1_i32_56 : i32
    %87 = arith.extui %86 : i1 to i32
    %88 = arith.addi %68, %87 : i32
    %89 = arith.muli %88, %87 : i32
    %c1_i32_57 = arith.constant 1 : i32
    %90 = arith.addi %89, %c1_i32_57 : i32
    %c63_i32_58 = arith.constant 63 : i32
    %91 = arith.minsi %90, %c63_i32_58 : i32
    %92 = arith.index_cast %82 : i32 to index
    %c0_59 = arith.constant 0 : index
    %93 = vector.load %arg3[%92, %c0_59] : memref<100x128xf32, #tpu.memory_space<vmem>>, vector<1x128xf32>
    %94 = arith.index_cast %91 : i32 to index
    %c0_60 = arith.constant 0 : index
    %95 = vector.load %arg4[%94, %c0_60] : memref<64x128xf32, #tpu.memory_space<vmem>>, vector<1x128xf32>
    %96 = arith.addf %93, %95 : vector<1x128xf32>
    %97 = arith.index_cast %85 : i32 to index
    %c0_61 = arith.constant 0 : index
    %98 = vector.load %arg5[%97, %c0_61] : memref<2x128xf32, #tpu.memory_space<vmem>>, vector<1x128xf32>
    %99 = arith.addf %96, %98 : vector<1x128xf32>
    %c0_62 = arith.constant 0 : index
    %c5 = arith.constant 5 : index
    %100 = memref.load %arg0[%c0_62, %c5] : memref<2x8xi32, #tpu.memory_space<smem>>
    %c0_i32_63 = arith.constant 0 : i32
    %101 = arith.maxsi %100, %c0_i32_63 : i32
    %c99_i32_64 = arith.constant 99 : i32
    %102 = arith.minsi %101, %c99_i32_64 : i32
    %c0_65 = arith.constant 0 : index
    %c5_66 = arith.constant 5 : index
    %103 = memref.load %arg1[%c0_65, %c5_66] : memref<2x8xi32, #tpu.memory_space<smem>>
    %c0_i32_67 = arith.constant 0 : i32
    %104 = arith.maxsi %103, %c0_i32_67 : i32
    %c1_i32_68 = arith.constant 1 : i32
    %105 = arith.minsi %104, %c1_i32_68 : i32
    %c1_i32_69 = arith.constant 1 : i32
    %106 = arith.cmpi ne, %100, %c1_i32_69 : i32
    %107 = arith.extui %106 : i1 to i32
    %108 = arith.addi %88, %107 : i32
    %109 = arith.muli %108, %107 : i32
    %c1_i32_70 = arith.constant 1 : i32
    %110 = arith.addi %109, %c1_i32_70 : i32
    %c63_i32_71 = arith.constant 63 : i32
    %111 = arith.minsi %110, %c63_i32_71 : i32
    %112 = arith.index_cast %102 : i32 to index
    %c0_72 = arith.constant 0 : index
    %113 = vector.load %arg3[%112, %c0_72] : memref<100x128xf32, #tpu.memory_space<vmem>>, vector<1x128xf32>
    %114 = arith.index_cast %111 : i32 to index
    %c0_73 = arith.constant 0 : index
    %115 = vector.load %arg4[%114, %c0_73] : memref<64x128xf32, #tpu.memory_space<vmem>>, vector<1x128xf32>
    %116 = arith.addf %113, %115 : vector<1x128xf32>
    %117 = arith.index_cast %105 : i32 to index
    %c0_74 = arith.constant 0 : index
    %118 = vector.load %arg5[%117, %c0_74] : memref<2x128xf32, #tpu.memory_space<vmem>>, vector<1x128xf32>
    %119 = arith.addf %116, %118 : vector<1x128xf32>
    %c0_75 = arith.constant 0 : index
    %c6 = arith.constant 6 : index
    %120 = memref.load %arg0[%c0_75, %c6] : memref<2x8xi32, #tpu.memory_space<smem>>
    %c0_i32_76 = arith.constant 0 : i32
    %121 = arith.maxsi %120, %c0_i32_76 : i32
    %c99_i32_77 = arith.constant 99 : i32
    %122 = arith.minsi %121, %c99_i32_77 : i32
    %c0_78 = arith.constant 0 : index
    %c6_79 = arith.constant 6 : index
    %123 = memref.load %arg1[%c0_78, %c6_79] : memref<2x8xi32, #tpu.memory_space<smem>>
    %c0_i32_80 = arith.constant 0 : i32
    %124 = arith.maxsi %123, %c0_i32_80 : i32
    %c1_i32_81 = arith.constant 1 : i32
    %125 = arith.minsi %124, %c1_i32_81 : i32
    %c1_i32_82 = arith.constant 1 : i32
    %126 = arith.cmpi ne, %120, %c1_i32_82 : i32
    %127 = arith.extui %126 : i1 to i32
    %128 = arith.addi %108, %127 : i32
    %129 = arith.muli %128, %127 : i32
    %c1_i32_83 = arith.constant 1 : i32
    %130 = arith.addi %129, %c1_i32_83 : i32
    %c63_i32_84 = arith.constant 63 : i32
    %131 = arith.minsi %130, %c63_i32_84 : i32
    %132 = arith.index_cast %122 : i32 to index
    %c0_85 = arith.constant 0 : index
    %133 = vector.load %arg3[%132, %c0_85] : memref<100x128xf32, #tpu.memory_space<vmem>>, vector<1x128xf32>
    %134 = arith.index_cast %131 : i32 to index
    %c0_86 = arith.constant 0 : index
    %135 = vector.load %arg4[%134, %c0_86] : memref<64x128xf32, #tpu.memory_space<vmem>>, vector<1x128xf32>
    %136 = arith.addf %133, %135 : vector<1x128xf32>
    %137 = arith.index_cast %125 : i32 to index
    %c0_87 = arith.constant 0 : index
    %138 = vector.load %arg5[%137, %c0_87] : memref<2x128xf32, #tpu.memory_space<vmem>>, vector<1x128xf32>
    %139 = arith.addf %136, %138 : vector<1x128xf32>
    %c0_88 = arith.constant 0 : index
    %c7 = arith.constant 7 : index
    %140 = memref.load %arg0[%c0_88, %c7] : memref<2x8xi32, #tpu.memory_space<smem>>
    %c0_i32_89 = arith.constant 0 : i32
    %141 = arith.maxsi %140, %c0_i32_89 : i32
    %c99_i32_90 = arith.constant 99 : i32
    %142 = arith.minsi %141, %c99_i32_90 : i32
    %c0_91 = arith.constant 0 : index
    %c7_92 = arith.constant 7 : index
    %143 = memref.load %arg1[%c0_91, %c7_92] : memref<2x8xi32, #tpu.memory_space<smem>>
    %c0_i32_93 = arith.constant 0 : i32
    %144 = arith.maxsi %143, %c0_i32_93 : i32
    %c1_i32_94 = arith.constant 1 : i32
    %145 = arith.minsi %144, %c1_i32_94 : i32
    %c1_i32_95 = arith.constant 1 : i32
    %146 = arith.cmpi ne, %140, %c1_i32_95 : i32
    %147 = arith.extui %146 : i1 to i32
    %148 = arith.addi %128, %147 : i32
    %149 = arith.muli %148, %147 : i32
    %c1_i32_96 = arith.constant 1 : i32
    %150 = arith.addi %149, %c1_i32_96 : i32
    %c63_i32_97 = arith.constant 63 : i32
    %151 = arith.minsi %150, %c63_i32_97 : i32
    %152 = arith.index_cast %142 : i32 to index
    %c0_98 = arith.constant 0 : index
    %153 = vector.load %arg3[%152, %c0_98] : memref<100x128xf32, #tpu.memory_space<vmem>>, vector<1x128xf32>
    %154 = arith.index_cast %151 : i32 to index
    %c0_99 = arith.constant 0 : index
    %155 = vector.load %arg4[%154, %c0_99] : memref<64x128xf32, #tpu.memory_space<vmem>>, vector<1x128xf32>
    %156 = arith.addf %153, %155 : vector<1x128xf32>
    %157 = arith.index_cast %145 : i32 to index
    %c0_100 = arith.constant 0 : index
    %158 = vector.load %arg5[%157, %c0_100] : memref<2x128xf32, #tpu.memory_space<vmem>>, vector<1x128xf32>
    %159 = arith.addf %156, %158 : vector<1x128xf32>
    %c1_101 = arith.constant 1 : index
    %c0_102 = arith.constant 0 : index
    %160 = memref.load %arg0[%c1_101, %c0_102] : memref<2x8xi32, #tpu.memory_space<smem>>
    %c0_i32_103 = arith.constant 0 : i32
    %161 = arith.maxsi %160, %c0_i32_103 : i32
    %c99_i32_104 = arith.constant 99 : i32
    %162 = arith.minsi %161, %c99_i32_104 : i32
    %c1_105 = arith.constant 1 : index
    %c0_106 = arith.constant 0 : index
    %163 = memref.load %arg1[%c1_105, %c0_106] : memref<2x8xi32, #tpu.memory_space<smem>>
    %c0_i32_107 = arith.constant 0 : i32
    %164 = arith.maxsi %163, %c0_i32_107 : i32
    %c1_i32_108 = arith.constant 1 : i32
    %165 = arith.minsi %164, %c1_i32_108 : i32
    %c1_i32_109 = arith.constant 1 : i32
    %166 = arith.cmpi ne, %160, %c1_i32_109 : i32
    %167 = arith.extui %166 : i1 to i32
    %c0_i32_110 = arith.constant 0 : i32
    %168 = arith.addi %c0_i32_110, %167 : i32
    %169 = arith.muli %168, %167 : i32
    %c1_i32_111 = arith.constant 1 : i32
    %170 = arith.addi %169, %c1_i32_111 : i32
    %c63_i32_112 = arith.constant 63 : i32
    %171 = arith.minsi %170, %c63_i32_112 : i32
    %172 = arith.index_cast %162 : i32 to index
    %c0_113 = arith.constant 0 : index
    %173 = vector.load %arg3[%172, %c0_113] : memref<100x128xf32, #tpu.memory_space<vmem>>, vector<1x128xf32>
    %174 = arith.index_cast %171 : i32 to index
    %c0_114 = arith.constant 0 : index
    %175 = vector.load %arg4[%174, %c0_114] : memref<64x128xf32, #tpu.memory_space<vmem>>, vector<1x128xf32>
    %176 = arith.addf %173, %175 : vector<1x128xf32>
    %177 = arith.index_cast %165 : i32 to index
    %c0_115 = arith.constant 0 : index
    %178 = vector.load %arg5[%177, %c0_115] : memref<2x128xf32, #tpu.memory_space<vmem>>, vector<1x128xf32>
    %179 = arith.addf %176, %178 : vector<1x128xf32>
    %c1_116 = arith.constant 1 : index
    %c1_117 = arith.constant 1 : index
    %180 = memref.load %arg0[%c1_116, %c1_117] : memref<2x8xi32, #tpu.memory_space<smem>>
    %c0_i32_118 = arith.constant 0 : i32
    %181 = arith.maxsi %180, %c0_i32_118 : i32
    %c99_i32_119 = arith.constant 99 : i32
    %182 = arith.minsi %181, %c99_i32_119 : i32
    %c1_120 = arith.constant 1 : index
    %c1_121 = arith.constant 1 : index
    %183 = memref.load %arg1[%c1_120, %c1_121] : memref<2x8xi32, #tpu.memory_space<smem>>
    %c0_i32_122 = arith.constant 0 : i32
    %184 = arith.maxsi %183, %c0_i32_122 : i32
    %c1_i32_123 = arith.constant 1 : i32
    %185 = arith.minsi %184, %c1_i32_123 : i32
    %c1_i32_124 = arith.constant 1 : i32
    %186 = arith.cmpi ne, %180, %c1_i32_124 : i32
    %187 = arith.extui %186 : i1 to i32
    %188 = arith.addi %168, %187 : i32
    %189 = arith.muli %188, %187 : i32
    %c1_i32_125 = arith.constant 1 : i32
    %190 = arith.addi %189, %c1_i32_125 : i32
    %c63_i32_126 = arith.constant 63 : i32
    %191 = arith.minsi %190, %c63_i32_126 : i32
    %192 = arith.index_cast %182 : i32 to index
    %c0_127 = arith.constant 0 : index
    %193 = vector.load %arg3[%192, %c0_127] : memref<100x128xf32, #tpu.memory_space<vmem>>, vector<1x128xf32>
    %194 = arith.index_cast %191 : i32 to index
    %c0_128 = arith.constant 0 : index
    %195 = vector.load %arg4[%194, %c0_128] : memref<64x128xf32, #tpu.memory_space<vmem>>, vector<1x128xf32>
    %196 = arith.addf %193, %195 : vector<1x128xf32>
    %197 = arith.index_cast %185 : i32 to index
    %c0_129 = arith.constant 0 : index
    %198 = vector.load %arg5[%197, %c0_129] : memref<2x128xf32, #tpu.memory_space<vmem>>, vector<1x128xf32>
    %199 = arith.addf %196, %198 : vector<1x128xf32>
    %c1_130 = arith.constant 1 : index
    %c2_131 = arith.constant 2 : index
    %200 = memref.load %arg0[%c1_130, %c2_131] : memref<2x8xi32, #tpu.memory_space<smem>>
    %c0_i32_132 = arith.constant 0 : i32
    %201 = arith.maxsi %200, %c0_i32_132 : i32
    %c99_i32_133 = arith.constant 99 : i32
    %202 = arith.minsi %201, %c99_i32_133 : i32
    %c1_134 = arith.constant 1 : index
    %c2_135 = arith.constant 2 : index
    %203 = memref.load %arg1[%c1_134, %c2_135] : memref<2x8xi32, #tpu.memory_space<smem>>
    %c0_i32_136 = arith.constant 0 : i32
    %204 = arith.maxsi %203, %c0_i32_136 : i32
    %c1_i32_137 = arith.constant 1 : i32
    %205 = arith.minsi %204, %c1_i32_137 : i32
    %c1_i32_138 = arith.constant 1 : i32
    %206 = arith.cmpi ne, %200, %c1_i32_138 : i32
    %207 = arith.extui %206 : i1 to i32
    %208 = arith.addi %188, %207 : i32
    %209 = arith.muli %208, %207 : i32
    %c1_i32_139 = arith.constant 1 : i32
    %210 = arith.addi %209, %c1_i32_139 : i32
    %c63_i32_140 = arith.constant 63 : i32
    %211 = arith.minsi %210, %c63_i32_140 : i32
    %212 = arith.index_cast %202 : i32 to index
    %c0_141 = arith.constant 0 : index
    %213 = vector.load %arg3[%212, %c0_141] : memref<100x128xf32, #tpu.memory_space<vmem>>, vector<1x128xf32>
    %214 = arith.index_cast %211 : i32 to index
    %c0_142 = arith.constant 0 : index
    %215 = vector.load %arg4[%214, %c0_142] : memref<64x128xf32, #tpu.memory_space<vmem>>, vector<1x128xf32>
    %216 = arith.addf %213, %215 : vector<1x128xf32>
    %217 = arith.index_cast %205 : i32 to index
    %c0_143 = arith.constant 0 : index
    %218 = vector.load %arg5[%217, %c0_143] : memref<2x128xf32, #tpu.memory_space<vmem>>, vector<1x128xf32>
    %219 = arith.addf %216, %218 : vector<1x128xf32>
    %c1_144 = arith.constant 1 : index
    %c3_145 = arith.constant 3 : index
    %220 = memref.load %arg0[%c1_144, %c3_145] : memref<2x8xi32, #tpu.memory_space<smem>>
    %c0_i32_146 = arith.constant 0 : i32
    %221 = arith.maxsi %220, %c0_i32_146 : i32
    %c99_i32_147 = arith.constant 99 : i32
    %222 = arith.minsi %221, %c99_i32_147 : i32
    %c1_148 = arith.constant 1 : index
    %c3_149 = arith.constant 3 : index
    %223 = memref.load %arg1[%c1_148, %c3_149] : memref<2x8xi32, #tpu.memory_space<smem>>
    %c0_i32_150 = arith.constant 0 : i32
    %224 = arith.maxsi %223, %c0_i32_150 : i32
    %c1_i32_151 = arith.constant 1 : i32
    %225 = arith.minsi %224, %c1_i32_151 : i32
    %c1_i32_152 = arith.constant 1 : i32
    %226 = arith.cmpi ne, %220, %c1_i32_152 : i32
    %227 = arith.extui %226 : i1 to i32
    %228 = arith.addi %208, %227 : i32
    %229 = arith.muli %228, %227 : i32
    %c1_i32_153 = arith.constant 1 : i32
    %230 = arith.addi %229, %c1_i32_153 : i32
    %c63_i32_154 = arith.constant 63 : i32
    %231 = arith.minsi %230, %c63_i32_154 : i32
    %232 = arith.index_cast %222 : i32 to index
    %c0_155 = arith.constant 0 : index
    %233 = vector.load %arg3[%232, %c0_155] : memref<100x128xf32, #tpu.memory_space<vmem>>, vector<1x128xf32>
    %234 = arith.index_cast %231 : i32 to index
    %c0_156 = arith.constant 0 : index
    %235 = vector.load %arg4[%234, %c0_156] : memref<64x128xf32, #tpu.memory_space<vmem>>, vector<1x128xf32>
    %236 = arith.addf %233, %235 : vector<1x128xf32>
    %237 = arith.index_cast %225 : i32 to index
    %c0_157 = arith.constant 0 : index
    %238 = vector.load %arg5[%237, %c0_157] : memref<2x128xf32, #tpu.memory_space<vmem>>, vector<1x128xf32>
    %239 = arith.addf %236, %238 : vector<1x128xf32>
    %c1_158 = arith.constant 1 : index
    %c4_159 = arith.constant 4 : index
    %240 = memref.load %arg0[%c1_158, %c4_159] : memref<2x8xi32, #tpu.memory_space<smem>>
    %c0_i32_160 = arith.constant 0 : i32
    %241 = arith.maxsi %240, %c0_i32_160 : i32
    %c99_i32_161 = arith.constant 99 : i32
    %242 = arith.minsi %241, %c99_i32_161 : i32
    %c1_162 = arith.constant 1 : index
    %c4_163 = arith.constant 4 : index
    %243 = memref.load %arg1[%c1_162, %c4_163] : memref<2x8xi32, #tpu.memory_space<smem>>
    %c0_i32_164 = arith.constant 0 : i32
    %244 = arith.maxsi %243, %c0_i32_164 : i32
    %c1_i32_165 = arith.constant 1 : i32
    %245 = arith.minsi %244, %c1_i32_165 : i32
    %c1_i32_166 = arith.constant 1 : i32
    %246 = arith.cmpi ne, %240, %c1_i32_166 : i32
    %247 = arith.extui %246 : i1 to i32
    %248 = arith.addi %228, %247 : i32
    %249 = arith.muli %248, %247 : i32
    %c1_i32_167 = arith.constant 1 : i32
    %250 = arith.addi %249, %c1_i32_167 : i32
    %c63_i32_168 = arith.constant 63 : i32
    %251 = arith.minsi %250, %c63_i32_168 : i32
    %252 = arith.index_cast %242 : i32 to index
    %c0_169 = arith.constant 0 : index
    %253 = vector.load %arg3[%252, %c0_169] : memref<100x128xf32, #tpu.memory_space<vmem>>, vector<1x128xf32>
    %254 = arith.index_cast %251 : i32 to index
    %c0_170 = arith.constant 0 : index
    %255 = vector.load %arg4[%254, %c0_170] : memref<64x128xf32, #tpu.memory_space<vmem>>, vector<1x128xf32>
    %256 = arith.addf %253, %255 : vector<1x128xf32>
    %257 = arith.index_cast %245 : i32 to index
    %c0_171 = arith.constant 0 : index
    %258 = vector.load %arg5[%257, %c0_171] : memref<2x128xf32, #tpu.memory_space<vmem>>, vector<1x128xf32>
    %259 = arith.addf %256, %258 : vector<1x128xf32>
    %c1_172 = arith.constant 1 : index
    %c5_173 = arith.constant 5 : index
    %260 = memref.load %arg0[%c1_172, %c5_173] : memref<2x8xi32, #tpu.memory_space<smem>>
    %c0_i32_174 = arith.constant 0 : i32
    %261 = arith.maxsi %260, %c0_i32_174 : i32
    %c99_i32_175 = arith.constant 99 : i32
    %262 = arith.minsi %261, %c99_i32_175 : i32
    %c1_176 = arith.constant 1 : index
    %c5_177 = arith.constant 5 : index
    %263 = memref.load %arg1[%c1_176, %c5_177] : memref<2x8xi32, #tpu.memory_space<smem>>
    %c0_i32_178 = arith.constant 0 : i32
    %264 = arith.maxsi %263, %c0_i32_178 : i32
    %c1_i32_179 = arith.constant 1 : i32
    %265 = arith.minsi %264, %c1_i32_179 : i32
    %c1_i32_180 = arith.constant 1 : i32
    %266 = arith.cmpi ne, %260, %c1_i32_180 : i32
    %267 = arith.extui %266 : i1 to i32
    %268 = arith.addi %248, %267 : i32
    %269 = arith.muli %268, %267 : i32
    %c1_i32_181 = arith.constant 1 : i32
    %270 = arith.addi %269, %c1_i32_181 : i32
    %c63_i32_182 = arith.constant 63 : i32
    %271 = arith.minsi %270, %c63_i32_182 : i32
    %272 = arith.index_cast %262 : i32 to index
    %c0_183 = arith.constant 0 : index
    %273 = vector.load %arg3[%272, %c0_183] : memref<100x128xf32, #tpu.memory_space<vmem>>, vector<1x128xf32>
    %274 = arith.index_cast %271 : i32 to index
    %c0_184 = arith.constant 0 : index
    %275 = vector.load %arg4[%274, %c0_184] : memref<64x128xf32, #tpu.memory_space<vmem>>, vector<1x128xf32>
    %276 = arith.addf %273, %275 : vector<1x128xf32>
    %277 = arith.index_cast %265 : i32 to index
    %c0_185 = arith.constant 0 : index
    %278 = vector.load %arg5[%277, %c0_185] : memref<2x128xf32, #tpu.memory_space<vmem>>, vector<1x128xf32>
    %279 = arith.addf %276, %278 : vector<1x128xf32>
    %c1_186 = arith.constant 1 : index
    %c6_187 = arith.constant 6 : index
    %280 = memref.load %arg0[%c1_186, %c6_187] : memref<2x8xi32, #tpu.memory_space<smem>>
    %c0_i32_188 = arith.constant 0 : i32
    %281 = arith.maxsi %280, %c0_i32_188 : i32
    %c99_i32_189 = arith.constant 99 : i32
    %282 = arith.minsi %281, %c99_i32_189 : i32
    %c1_190 = arith.constant 1 : index
    %c6_191 = arith.constant 6 : index
    %283 = memref.load %arg1[%c1_190, %c6_191] : memref<2x8xi32, #tpu.memory_space<smem>>
    %c0_i32_192 = arith.constant 0 : i32
    %284 = arith.maxsi %283, %c0_i32_192 : i32
    %c1_i32_193 = arith.constant 1 : i32
    %285 = arith.minsi %284, %c1_i32_193 : i32
    %c1_i32_194 = arith.constant 1 : i32
    %286 = arith.cmpi ne, %280, %c1_i32_194 : i32
    %287 = arith.extui %286 : i1 to i32
    %288 = arith.addi %268, %287 : i32
    %289 = arith.muli %288, %287 : i32
    %c1_i32_195 = arith.constant 1 : i32
    %290 = arith.addi %289, %c1_i32_195 : i32
    %c63_i32_196 = arith.constant 63 : i32
    %291 = arith.minsi %290, %c63_i32_196 : i32
    %292 = arith.index_cast %282 : i32 to index
    %c0_197 = arith.constant 0 : index
    %293 = vector.load %arg3[%292, %c0_197] : memref<100x128xf32, #tpu.memory_space<vmem>>, vector<1x128xf32>
    %294 = arith.index_cast %291 : i32 to index
    %c0_198 = arith.constant 0 : index
    %295 = vector.load %arg4[%294, %c0_198] : memref<64x128xf32, #tpu.memory_space<vmem>>, vector<1x128xf32>
    %296 = arith.addf %293, %295 : vector<1x128xf32>
    %297 = arith.index_cast %285 : i32 to index
    %c0_199 = arith.constant 0 : index
    %298 = vector.load %arg5[%297, %c0_199] : memref<2x128xf32, #tpu.memory_space<vmem>>, vector<1x128xf32>
    %299 = arith.addf %296, %298 : vector<1x128xf32>
    %c1_200 = arith.constant 1 : index
    %c7_201 = arith.constant 7 : index
    %300 = memref.load %arg0[%c1_200, %c7_201] : memref<2x8xi32, #tpu.memory_space<smem>>
    %c0_i32_202 = arith.constant 0 : i32
    %301 = arith.maxsi %300, %c0_i32_202 : i32
    %c99_i32_203 = arith.constant 99 : i32
    %302 = arith.minsi %301, %c99_i32_203 : i32
    %c1_204 = arith.constant 1 : index
    %c7_205 = arith.constant 7 : index
    %303 = memref.load %arg1[%c1_204, %c7_205] : memref<2x8xi32, #tpu.memory_space<smem>>
    %c0_i32_206 = arith.constant 0 : i32
    %304 = arith.maxsi %303, %c0_i32_206 : i32
    %c1_i32_207 = arith.constant 1 : i32
    %305 = arith.minsi %304, %c1_i32_207 : i32
    %c1_i32_208 = arith.constant 1 : i32
    %306 = arith.cmpi ne, %300, %c1_i32_208 : i32
    %307 = arith.extui %306 : i1 to i32
    %308 = arith.addi %288, %307 : i32
    %309 = arith.muli %308, %307 : i32
    %c1_i32_209 = arith.constant 1 : i32
    %310 = arith.addi %309, %c1_i32_209 : i32
    %c63_i32_210 = arith.constant 63 : i32
    %311 = arith.minsi %310, %c63_i32_210 : i32
    %312 = arith.index_cast %302 : i32 to index
    %c0_211 = arith.constant 0 : index
    %313 = vector.load %arg3[%312, %c0_211] : memref<100x128xf32, #tpu.memory_space<vmem>>, vector<1x128xf32>
    %314 = arith.index_cast %311 : i32 to index
    %c0_212 = arith.constant 0 : index
    %315 = vector.load %arg4[%314, %c0_212] : memref<64x128xf32, #tpu.memory_space<vmem>>, vector<1x128xf32>
    %316 = arith.addf %313, %315 : vector<1x128xf32>
    %317 = arith.index_cast %305 : i32 to index
    %c0_213 = arith.constant 0 : index
    %318 = vector.load %arg5[%317, %c0_213] : memref<2x128xf32, #tpu.memory_space<vmem>>, vector<1x128xf32>
    %319 = arith.addf %316, %318 : vector<1x128xf32>
    %320 = tpu.concatenate %19, %39, %59, %79, %99, %119, %139, %159, %179, %199, %219, %239, %259, %279, %299, %319 in 0 : vector<1x128xf32>, vector<1x128xf32>, vector<1x128xf32>, vector<1x128xf32>, vector<1x128xf32>, vector<1x128xf32>, vector<1x128xf32>, vector<1x128xf32>, vector<1x128xf32>, vector<1x128xf32>, vector<1x128xf32>, vector<1x128xf32>, vector<1x128xf32>, vector<1x128xf32>, vector<1x128xf32>, vector<1x128xf32> -> vector<16x128xf32>
    %c0_214 = arith.constant 0 : index
    %c0_215 = arith.constant 0 : index
    %321 = vector.load %arg6[%c0_214, %c0_215] : memref<1x128xf32, #tpu.memory_space<vmem>>, vector<1x128xf32>
    %c0_216 = arith.constant 0 : index
    %c0_217 = arith.constant 0 : index
    %322 = vector.load %arg7[%c0_216, %c0_217] : memref<1x128xf32, #tpu.memory_space<vmem>>, vector<1x128xf32>
    %cst = arith.constant dense<0.000000e+00> : vector<16xf32>
    %323 = vector.multi_reduction <add>, %320, %cst [1] : vector<16x128xf32> to vector<16xf32>
    %324 = vector.shape_cast %323 : vector<16xf32> to vector<16x1xf32>
    %cst_218 = arith.constant 1.280000e+02 : f32
    %325 = vector.broadcast %cst_218 : f32 to vector<16x1xf32>
    %326 = arith.divf %324, %325 : vector<16x1xf32>
    %327 = vector.broadcast %326 : vector<16x1xf32> to vector<16x128xf32>
    %328 = arith.subf %320, %327 : vector<16x128xf32>
    %329 = arith.mulf %328, %328 : vector<16x128xf32>
    %cst_219 = arith.constant dense<0.000000e+00> : vector<16xf32>
    %330 = vector.multi_reduction <add>, %329, %cst_219 [1] : vector<16x128xf32> to vector<16xf32>
    %331 = vector.shape_cast %330 : vector<16xf32> to vector<16x1xf32>
    %cst_220 = arith.constant 1.280000e+02 : f32
    %332 = vector.broadcast %cst_220 : f32 to vector<16x1xf32>
    %333 = arith.divf %331, %332 : vector<16x1xf32>
    %334 = vector.broadcast %326 : vector<16x1xf32> to vector<16x128xf32>
    %335 = arith.subf %320, %334 : vector<16x128xf32>
    %cst_221 = arith.constant 9.99999974E-6 : f32
    %336 = vector.broadcast %cst_221 : f32 to vector<16x1xf32>
    %337 = arith.addf %333, %336 : vector<16x1xf32>
    %338 = math.rsqrt %337 : vector<16x1xf32>
    %339 = vector.broadcast %338 : vector<16x1xf32> to vector<16x128xf32>
    %340 = arith.mulf %335, %339 : vector<16x128xf32>
    %341 = vector.broadcast %321 : vector<1x128xf32> to vector<16x128xf32>
    %342 = arith.mulf %340, %341 : vector<16x128xf32>
    %343 = vector.broadcast %322 : vector<1x128xf32> to vector<16x128xf32>
    %344 = arith.addf %342, %343 : vector<16x128xf32>
    %c0_222 = arith.constant 0 : index
    %c0_223 = arith.constant 0 : index
    %345 = vector.load %arg2[%c0_222, %c0_223] : memref<2x8xi32, #tpu.memory_space<vmem>>, vector<2x8xi32>
    %346 = arith.sitofp %345 : vector<2x8xi32> to vector<2x8xf32>
    %cst_224 = arith.constant 1.000000e+00 : f32
    %347 = vector.broadcast %cst_224 : f32 to vector<2x8xf32>
    %348 = arith.subf %347, %346 : vector<2x8xf32>
    %cst_225 = arith.constant -1.000000e+09 : f32
    %349 = vector.broadcast %cst_225 : f32 to vector<2x8xf32>
    %350 = arith.mulf %348, %349 : vector<2x8xf32>
    %351 = arith.truncf %344 : vector<16x128xf32> to vector<16x128xbf16>
    %c0_226 = arith.constant 0 : index
    %c0_227 = arith.constant 0 : index
    %c0_228 = arith.constant 0 : index
    %352 = vector.load %arg8[%c0_226, %c0_227, %c0_228] : memref<2x128x384xbf16, #tpu.memory_space<vmem>>, vector<1x128x384xbf16>
    %353 = vector.shape_cast %352 : vector<1x128x384xbf16> to vector<128x384xbf16>
    %cst_229 = arith.constant dense<0.000000e+00> : vector<16x384xf32>
    %354 = tpu.matmul %351, %353, %cst_229 {dimension_numbers = #tpu.dot_dimension_numbers<[1], [0], [0], [1], [0, 0, 1, 1], [], []>} : vector<16x128xbf16>, vector<128x384xbf16>, vector<16x384xf32> -> vector<16x384xf32>
    %c0_230 = arith.constant 0 : index
    %c0_231 = arith.constant 0 : index
    %c0_232 = arith.constant 0 : index
    %355 = vector.load %arg9[%c0_230, %c0_231, %c0_232] : memref<2x1x384xf32, #tpu.memory_space<vmem>>, vector<1x1x384xf32>
    %356 = vector.shape_cast %355 : vector<1x1x384xf32> to vector<1x384xf32>
    %357 = vector.broadcast %356 : vector<1x384xf32> to vector<16x384xf32>
    %358 = arith.addf %354, %357 : vector<16x384xf32>
    %359 = vector.extract_strided_slice %358 {offsets = [0, 0], sizes = [16, 128], strides = [1, 1]} : vector<16x384xf32> to vector<16x128xf32>
    %360 = vector.extract_strided_slice %358 {offsets = [0, 128], sizes = [16, 128], strides = [1, 1]} : vector<16x384xf32> to vector<16x128xf32>
    %361 = vector.extract_strided_slice %358 {offsets = [0, 256], sizes = [16, 128], strides = [1, 1]} : vector<16x384xf32> to vector<16x128xf32>
    %362 = vector.extract_strided_slice %350 {offsets = [0, 0], sizes = [1, 8], strides = [1, 1]} : vector<2x8xf32> to vector<1x8xf32>
    %363 = vector.extract_strided_slice %359 {offsets = [0, 0], sizes = [8, 128], strides = [1, 1]} : vector<16x128xf32> to vector<8x128xf32>
    %364 = vector.extract_strided_slice %360 {offsets = [0, 0], sizes = [8, 128], strides = [1, 1]} : vector<16x128xf32> to vector<8x128xf32>
    %365 = vector.extract_strided_slice %361 {offsets = [0, 0], sizes = [8, 128], strides = [1, 1]} : vector<16x128xf32> to vector<8x128xf32>
    %366 = vector.extract_strided_slice %363 {offsets = [0, 0], sizes = [8, 32], strides = [1, 1]} : vector<8x128xf32> to vector<8x32xf32>
    %367 = vector.extract_strided_slice %364 {offsets = [0, 0], sizes = [8, 32], strides = [1, 1]} : vector<8x128xf32> to vector<8x32xf32>
    %368 = vector.extract_strided_slice %365 {offsets = [0, 0], sizes = [8, 32], strides = [1, 1]} : vector<8x128xf32> to vector<8x32xf32>
    %cst_233 = arith.constant dense<0.000000e+00> : vector<8x8xf32>
    %369 = tpu.matmul %366, %367, %cst_233 {dimension_numbers = #tpu.dot_dimension_numbers<[1], [1], [0], [0], [0, 0, 1, 0], [], []>} : vector<8x32xf32>, vector<8x32xf32>, vector<8x8xf32> -> vector<8x8xf32>
    %cst_234 = arith.constant 0.176776692 : f32
    %370 = vector.broadcast %cst_234 : f32 to vector<8x8xf32>
    %371 = arith.mulf %369, %370 : vector<8x8xf32>
    %372 = vector.broadcast %362 : vector<1x8xf32> to vector<8x8xf32>
    %373 = arith.addf %371, %372 : vector<8x8xf32>
    %cst_235 = arith.constant dense<0xFF800000> : vector<8xf32>
    %374 = vector.multi_reduction <maximumf>, %373, %cst_235 [1] : vector<8x8xf32> to vector<8xf32>
    %375 = vector.shape_cast %374 : vector<8xf32> to vector<8x1xf32>
    %376 = vector.broadcast %375 : vector<8x1xf32> to vector<8x8xf32>
    %377 = arith.subf %373, %376 : vector<8x8xf32>
    %378 = math.exp %377 : vector<8x8xf32>
    %cst_236 = arith.constant dense<0.000000e+00> : vector<8xf32>
    %379 = vector.multi_reduction <add>, %378, %cst_236 [1] : vector<8x8xf32> to vector<8xf32>
    %380 = vector.shape_cast %379 : vector<8xf32> to vector<8x1xf32>
    %381 = tpu.reciprocal %380 {approx = true} : vector<8x1xf32> -> vector<8x1xf32>
    %382 = vector.broadcast %381 : vector<8x1xf32> to vector<8x8xf32>
    %383 = arith.mulf %378, %382 : vector<8x8xf32>
    %cst_237 = arith.constant dense<0.000000e+00> : vector<8x32xf32>
    %384 = tpu.matmul %383, %368, %cst_237 {dimension_numbers = #tpu.dot_dimension_numbers<[1], [0], [0], [1], [0, 0, 1, 1], [], []>} : vector<8x8xf32>, vector<8x32xf32>, vector<8x32xf32> -> vector<8x32xf32>
    %385 = vector.extract_strided_slice %363 {offsets = [0, 32], sizes = [8, 32], strides = [1, 1]} : vector<8x128xf32> to vector<8x32xf32>
    %386 = vector.extract_strided_slice %364 {offsets = [0, 32], sizes = [8, 32], strides = [1, 1]} : vector<8x128xf32> to vector<8x32xf32>
    %387 = vector.extract_strided_slice %365 {offsets = [0, 32], sizes = [8, 32], strides = [1, 1]} : vector<8x128xf32> to vector<8x32xf32>
    %cst_238 = arith.constant dense<0.000000e+00> : vector<8x8xf32>
    %388 = tpu.matmul %385, %386, %cst_238 {dimension_numbers = #tpu.dot_dimension_numbers<[1], [1], [0], [0], [0, 0, 1, 0], [], []>} : vector<8x32xf32>, vector<8x32xf32>, vector<8x8xf32> -> vector<8x8xf32>
    %cst_239 = arith.constant 0.176776692 : f32
    %389 = vector.broadcast %cst_239 : f32 to vector<8x8xf32>
    %390 = arith.mulf %388, %389 : vector<8x8xf32>
    %391 = vector.broadcast %362 : vector<1x8xf32> to vector<8x8xf32>
    %392 = arith.addf %390, %391 : vector<8x8xf32>
    %cst_240 = arith.constant dense<0xFF800000> : vector<8xf32>
    %393 = vector.multi_reduction <maximumf>, %392, %cst_240 [1] : vector<8x8xf32> to vector<8xf32>
    %394 = vector.shape_cast %393 : vector<8xf32> to vector<8x1xf32>
    %395 = vector.broadcast %394 : vector<8x1xf32> to vector<8x8xf32>
    %396 = arith.subf %392, %395 : vector<8x8xf32>
    %397 = math.exp %396 : vector<8x8xf32>
    %cst_241 = arith.constant dense<0.000000e+00> : vector<8xf32>
    %398 = vector.multi_reduction <add>, %397, %cst_241 [1] : vector<8x8xf32> to vector<8xf32>
    %399 = vector.shape_cast %398 : vector<8xf32> to vector<8x1xf32>
    %400 = tpu.reciprocal %399 {approx = true} : vector<8x1xf32> -> vector<8x1xf32>
    %401 = vector.broadcast %400 : vector<8x1xf32> to vector<8x8xf32>
    %402 = arith.mulf %397, %401 : vector<8x8xf32>
    %cst_242 = arith.constant dense<0.000000e+00> : vector<8x32xf32>
    %403 = tpu.matmul %402, %387, %cst_242 {dimension_numbers = #tpu.dot_dimension_numbers<[1], [0], [0], [1], [0, 0, 1, 1], [], []>} : vector<8x8xf32>, vector<8x32xf32>, vector<8x32xf32> -> vector<8x32xf32>
    %404 = vector.extract_strided_slice %363 {offsets = [0, 64], sizes = [8, 32], strides = [1, 1]} : vector<8x128xf32> to vector<8x32xf32>
    %405 = vector.extract_strided_slice %364 {offsets = [0, 64], sizes = [8, 32], strides = [1, 1]} : vector<8x128xf32> to vector<8x32xf32>
    %406 = vector.extract_strided_slice %365 {offsets = [0, 64], sizes = [8, 32], strides = [1, 1]} : vector<8x128xf32> to vector<8x32xf32>
    %cst_243 = arith.constant dense<0.000000e+00> : vector<8x8xf32>
    %407 = tpu.matmul %404, %405, %cst_243 {dimension_numbers = #tpu.dot_dimension_numbers<[1], [1], [0], [0], [0, 0, 1, 0], [], []>} : vector<8x32xf32>, vector<8x32xf32>, vector<8x8xf32> -> vector<8x8xf32>
    %cst_244 = arith.constant 0.176776692 : f32
    %408 = vector.broadcast %cst_244 : f32 to vector<8x8xf32>
    %409 = arith.mulf %407, %408 : vector<8x8xf32>
    %410 = vector.broadcast %362 : vector<1x8xf32> to vector<8x8xf32>
    %411 = arith.addf %409, %410 : vector<8x8xf32>
    %cst_245 = arith.constant dense<0xFF800000> : vector<8xf32>
    %412 = vector.multi_reduction <maximumf>, %411, %cst_245 [1] : vector<8x8xf32> to vector<8xf32>
    %413 = vector.shape_cast %412 : vector<8xf32> to vector<8x1xf32>
    %414 = vector.broadcast %413 : vector<8x1xf32> to vector<8x8xf32>
    %415 = arith.subf %411, %414 : vector<8x8xf32>
    %416 = math.exp %415 : vector<8x8xf32>
    %cst_246 = arith.constant dense<0.000000e+00> : vector<8xf32>
    %417 = vector.multi_reduction <add>, %416, %cst_246 [1] : vector<8x8xf32> to vector<8xf32>
    %418 = vector.shape_cast %417 : vector<8xf32> to vector<8x1xf32>
    %419 = tpu.reciprocal %418 {approx = true} : vector<8x1xf32> -> vector<8x1xf32>
    %420 = vector.broadcast %419 : vector<8x1xf32> to vector<8x8xf32>
    %421 = arith.mulf %416, %420 : vector<8x8xf32>
    %cst_247 = arith.constant dense<0.000000e+00> : vector<8x32xf32>
    %422 = tpu.matmul %421, %406, %cst_247 {dimension_numbers = #tpu.dot_dimension_numbers<[1], [0], [0], [1], [0, 0, 1, 1], [], []>} : vector<8x8xf32>, vector<8x32xf32>, vector<8x32xf32> -> vector<8x32xf32>
    %423 = vector.extract_strided_slice %363 {offsets = [0, 96], sizes = [8, 32], strides = [1, 1]} : vector<8x128xf32> to vector<8x32xf32>
    %424 = vector.extract_strided_slice %364 {offsets = [0, 96], sizes = [8, 32], strides = [1, 1]} : vector<8x128xf32> to vector<8x32xf32>
    %425 = vector.extract_strided_slice %365 {offsets = [0, 96], sizes = [8, 32], strides = [1, 1]} : vector<8x128xf32> to vector<8x32xf32>
    %cst_248 = arith.constant dense<0.000000e+00> : vector<8x8xf32>
    %426 = tpu.matmul %423, %424, %cst_248 {dimension_numbers = #tpu.dot_dimension_numbers<[1], [1], [0], [0], [0, 0, 1, 0], [], []>} : vector<8x32xf32>, vector<8x32xf32>, vector<8x8xf32> -> vector<8x8xf32>
    %cst_249 = arith.constant 0.176776692 : f32
    %427 = vector.broadcast %cst_249 : f32 to vector<8x8xf32>
    %428 = arith.mulf %426, %427 : vector<8x8xf32>
    %429 = vector.broadcast %362 : vector<1x8xf32> to vector<8x8xf32>
    %430 = arith.addf %428, %429 : vector<8x8xf32>
    %cst_250 = arith.constant dense<0xFF800000> : vector<8xf32>
    %431 = vector.multi_reduction <maximumf>, %430, %cst_250 [1] : vector<8x8xf32> to vector<8xf32>
    %432 = vector.shape_cast %431 : vector<8xf32> to vector<8x1xf32>
    %433 = vector.broadcast %432 : vector<8x1xf32> to vector<8x8xf32>
    %434 = arith.subf %430, %433 : vector<8x8xf32>
    %435 = math.exp %434 : vector<8x8xf32>
    %cst_251 = arith.constant dense<0.000000e+00> : vector<8xf32>
    %436 = vector.multi_reduction <add>, %435, %cst_251 [1] : vector<8x8xf32> to vector<8xf32>
    %437 = vector.shape_cast %436 : vector<8xf32> to vector<8x1xf32>
    %438 = tpu.reciprocal %437 {approx = true} : vector<8x1xf32> -> vector<8x1xf32>
    %439 = vector.broadcast %438 : vector<8x1xf32> to vector<8x8xf32>
    %440 = arith.mulf %435, %439 : vector<8x8xf32>
    %cst_252 = arith.constant dense<0.000000e+00> : vector<8x32xf32>
    %441 = tpu.matmul %440, %425, %cst_252 {dimension_numbers = #tpu.dot_dimension_numbers<[1], [0], [0], [1], [0, 0, 1, 1], [], []>} : vector<8x8xf32>, vector<8x32xf32>, vector<8x32xf32> -> vector<8x32xf32>
    %442 = tpu.concatenate %384, %403, %422, %441 in 1 : vector<8x32xf32>, vector<8x32xf32>, vector<8x32xf32>, vector<8x32xf32> -> vector<8x128xf32>
    %443 = vector.extract_strided_slice %350 {offsets = [1, 0], sizes = [1, 8], strides = [1, 1]} : vector<2x8xf32> to vector<1x8xf32>
    %444 = vector.extract_strided_slice %359 {offsets = [8, 0], sizes = [8, 128], strides = [1, 1]} : vector<16x128xf32> to vector<8x128xf32>
    %445 = vector.extract_strided_slice %360 {offsets = [8, 0], sizes = [8, 128], strides = [1, 1]} : vector<16x128xf32> to vector<8x128xf32>
    %446 = vector.extract_strided_slice %361 {offsets = [8, 0], sizes = [8, 128], strides = [1, 1]} : vector<16x128xf32> to vector<8x128xf32>
    %447 = vector.extract_strided_slice %444 {offsets = [0, 0], sizes = [8, 32], strides = [1, 1]} : vector<8x128xf32> to vector<8x32xf32>
    %448 = vector.extract_strided_slice %445 {offsets = [0, 0], sizes = [8, 32], strides = [1, 1]} : vector<8x128xf32> to vector<8x32xf32>
    %449 = vector.extract_strided_slice %446 {offsets = [0, 0], sizes = [8, 32], strides = [1, 1]} : vector<8x128xf32> to vector<8x32xf32>
    %cst_253 = arith.constant dense<0.000000e+00> : vector<8x8xf32>
    %450 = tpu.matmul %447, %448, %cst_253 {dimension_numbers = #tpu.dot_dimension_numbers<[1], [1], [0], [0], [0, 0, 1, 0], [], []>} : vector<8x32xf32>, vector<8x32xf32>, vector<8x8xf32> -> vector<8x8xf32>
    %cst_254 = arith.constant 0.176776692 : f32
    %451 = vector.broadcast %cst_254 : f32 to vector<8x8xf32>
    %452 = arith.mulf %450, %451 : vector<8x8xf32>
    %453 = vector.broadcast %443 : vector<1x8xf32> to vector<8x8xf32>
    %454 = arith.addf %452, %453 : vector<8x8xf32>
    %cst_255 = arith.constant dense<0xFF800000> : vector<8xf32>
    %455 = vector.multi_reduction <maximumf>, %454, %cst_255 [1] : vector<8x8xf32> to vector<8xf32>
    %456 = vector.shape_cast %455 : vector<8xf32> to vector<8x1xf32>
    %457 = vector.broadcast %456 : vector<8x1xf32> to vector<8x8xf32>
    %458 = arith.subf %454, %457 : vector<8x8xf32>
    %459 = math.exp %458 : vector<8x8xf32>
    %cst_256 = arith.constant dense<0.000000e+00> : vector<8xf32>
    %460 = vector.multi_reduction <add>, %459, %cst_256 [1] : vector<8x8xf32> to vector<8xf32>
    %461 = vector.shape_cast %460 : vector<8xf32> to vector<8x1xf32>
    %462 = tpu.reciprocal %461 {approx = true} : vector<8x1xf32> -> vector<8x1xf32>
    %463 = vector.broadcast %462 : vector<8x1xf32> to vector<8x8xf32>
    %464 = arith.mulf %459, %463 : vector<8x8xf32>
    %cst_257 = arith.constant dense<0.000000e+00> : vector<8x32xf32>
    %465 = tpu.matmul %464, %449, %cst_257 {dimension_numbers = #tpu.dot_dimension_numbers<[1], [0], [0], [1], [0, 0, 1, 1], [], []>} : vector<8x8xf32>, vector<8x32xf32>, vector<8x32xf32> -> vector<8x32xf32>
    %466 = vector.extract_strided_slice %444 {offsets = [0, 32], sizes = [8, 32], strides = [1, 1]} : vector<8x128xf32> to vector<8x32xf32>
    %467 = vector.extract_strided_slice %445 {offsets = [0, 32], sizes = [8, 32], strides = [1, 1]} : vector<8x128xf32> to vector<8x32xf32>
    %468 = vector.extract_strided_slice %446 {offsets = [0, 32], sizes = [8, 32], strides = [1, 1]} : vector<8x128xf32> to vector<8x32xf32>
    %cst_258 = arith.constant dense<0.000000e+00> : vector<8x8xf32>
    %469 = tpu.matmul %466, %467, %cst_258 {dimension_numbers = #tpu.dot_dimension_numbers<[1], [1], [0], [0], [0, 0, 1, 0], [], []>} : vector<8x32xf32>, vector<8x32xf32>, vector<8x8xf32> -> vector<8x8xf32>
    %cst_259 = arith.constant 0.176776692 : f32
    %470 = vector.broadcast %cst_259 : f32 to vector<8x8xf32>
    %471 = arith.mulf %469, %470 : vector<8x8xf32>
    %472 = vector.broadcast %443 : vector<1x8xf32> to vector<8x8xf32>
    %473 = arith.addf %471, %472 : vector<8x8xf32>
    %cst_260 = arith.constant dense<0xFF800000> : vector<8xf32>
    %474 = vector.multi_reduction <maximumf>, %473, %cst_260 [1] : vector<8x8xf32> to vector<8xf32>
    %475 = vector.shape_cast %474 : vector<8xf32> to vector<8x1xf32>
    %476 = vector.broadcast %475 : vector<8x1xf32> to vector<8x8xf32>
    %477 = arith.subf %473, %476 : vector<8x8xf32>
    %478 = math.exp %477 : vector<8x8xf32>
    %cst_261 = arith.constant dense<0.000000e+00> : vector<8xf32>
    %479 = vector.multi_reduction <add>, %478, %cst_261 [1] : vector<8x8xf32> to vector<8xf32>
    %480 = vector.shape_cast %479 : vector<8xf32> to vector<8x1xf32>
    %481 = tpu.reciprocal %480 {approx = true} : vector<8x1xf32> -> vector<8x1xf32>
    %482 = vector.broadcast %481 : vector<8x1xf32> to vector<8x8xf32>
    %483 = arith.mulf %478, %482 : vector<8x8xf32>
    %cst_262 = arith.constant dense<0.000000e+00> : vector<8x32xf32>
    %484 = tpu.matmul %483, %468, %cst_262 {dimension_numbers = #tpu.dot_dimension_numbers<[1], [0], [0], [1], [0, 0, 1, 1], [], []>} : vector<8x8xf32>, vector<8x32xf32>, vector<8x32xf32> -> vector<8x32xf32>
    %485 = vector.extract_strided_slice %444 {offsets = [0, 64], sizes = [8, 32], strides = [1, 1]} : vector<8x128xf32> to vector<8x32xf32>
    %486 = vector.extract_strided_slice %445 {offsets = [0, 64], sizes = [8, 32], strides = [1, 1]} : vector<8x128xf32> to vector<8x32xf32>
    %487 = vector.extract_strided_slice %446 {offsets = [0, 64], sizes = [8, 32], strides = [1, 1]} : vector<8x128xf32> to vector<8x32xf32>
    %cst_263 = arith.constant dense<0.000000e+00> : vector<8x8xf32>
    %488 = tpu.matmul %485, %486, %cst_263 {dimension_numbers = #tpu.dot_dimension_numbers<[1], [1], [0], [0], [0, 0, 1, 0], [], []>} : vector<8x32xf32>, vector<8x32xf32>, vector<8x8xf32> -> vector<8x8xf32>
    %cst_264 = arith.constant 0.176776692 : f32
    %489 = vector.broadcast %cst_264 : f32 to vector<8x8xf32>
    %490 = arith.mulf %488, %489 : vector<8x8xf32>
    %491 = vector.broadcast %443 : vector<1x8xf32> to vector<8x8xf32>
    %492 = arith.addf %490, %491 : vector<8x8xf32>
    %cst_265 = arith.constant dense<0xFF800000> : vector<8xf32>
    %493 = vector.multi_reduction <maximumf>, %492, %cst_265 [1] : vector<8x8xf32> to vector<8xf32>
    %494 = vector.shape_cast %493 : vector<8xf32> to vector<8x1xf32>
    %495 = vector.broadcast %494 : vector<8x1xf32> to vector<8x8xf32>
    %496 = arith.subf %492, %495 : vector<8x8xf32>
    %497 = math.exp %496 : vector<8x8xf32>
    %cst_266 = arith.constant dense<0.000000e+00> : vector<8xf32>
    %498 = vector.multi_reduction <add>, %497, %cst_266 [1] : vector<8x8xf32> to vector<8xf32>
    %499 = vector.shape_cast %498 : vector<8xf32> to vector<8x1xf32>
    %500 = tpu.reciprocal %499 {approx = true} : vector<8x1xf32> -> vector<8x1xf32>
    %501 = vector.broadcast %500 : vector<8x1xf32> to vector<8x8xf32>
    %502 = arith.mulf %497, %501 : vector<8x8xf32>
    %cst_267 = arith.constant dense<0.000000e+00> : vector<8x32xf32>
    %503 = tpu.matmul %502, %487, %cst_267 {dimension_numbers = #tpu.dot_dimension_numbers<[1], [0], [0], [1], [0, 0, 1, 1], [], []>} : vector<8x8xf32>, vector<8x32xf32>, vector<8x32xf32> -> vector<8x32xf32>
    %504 = vector.extract_strided_slice %444 {offsets = [0, 96], sizes = [8, 32], strides = [1, 1]} : vector<8x128xf32> to vector<8x32xf32>
    %505 = vector.extract_strided_slice %445 {offsets = [0, 96], sizes = [8, 32], strides = [1, 1]} : vector<8x128xf32> to vector<8x32xf32>
    %506 = vector.extract_strided_slice %446 {offsets = [0, 96], sizes = [8, 32], strides = [1, 1]} : vector<8x128xf32> to vector<8x32xf32>
    %cst_268 = arith.constant dense<0.000000e+00> : vector<8x8xf32>
    %507 = tpu.matmul %504, %505, %cst_268 {dimension_numbers = #tpu.dot_dimension_numbers<[1], [1], [0], [0], [0, 0, 1, 0], [], []>} : vector<8x32xf32>, vector<8x32xf32>, vector<8x8xf32> -> vector<8x8xf32>
    %cst_269 = arith.constant 0.176776692 : f32
    %508 = vector.broadcast %cst_269 : f32 to vector<8x8xf32>
    %509 = arith.mulf %507, %508 : vector<8x8xf32>
    %510 = vector.broadcast %443 : vector<1x8xf32> to vector<8x8xf32>
    %511 = arith.addf %509, %510 : vector<8x8xf32>
    %cst_270 = arith.constant dense<0xFF800000> : vector<8xf32>
    %512 = vector.multi_reduction <maximumf>, %511, %cst_270 [1] : vector<8x8xf32> to vector<8xf32>
    %513 = vector.shape_cast %512 : vector<8xf32> to vector<8x1xf32>
    %514 = vector.broadcast %513 : vector<8x1xf32> to vector<8x8xf32>
    %515 = arith.subf %511, %514 : vector<8x8xf32>
    %516 = math.exp %515 : vector<8x8xf32>
    %cst_271 = arith.constant dense<0.000000e+00> : vector<8xf32>
    %517 = vector.multi_reduction <add>, %516, %cst_271 [1] : vector<8x8xf32> to vector<8xf32>
    %518 = vector.shape_cast %517 : vector<8xf32> to vector<8x1xf32>
    %519 = tpu.reciprocal %518 {approx = true} : vector<8x1xf32> -> vector<8x1xf32>
    %520 = vector.broadcast %519 : vector<8x1xf32> to vector<8x8xf32>
    %521 = arith.mulf %516, %520 : vector<8x8xf32>
    %cst_272 = arith.constant dense<0.000000e+00> : vector<8x32xf32>
    %522 = tpu.matmul %521, %506, %cst_272 {dimension_numbers = #tpu.dot_dimension_numbers<[1], [0], [0], [1], [0, 0, 1, 1], [], []>} : vector<8x8xf32>, vector<8x32xf32>, vector<8x32xf32> -> vector<8x32xf32>
    %523 = tpu.concatenate %465, %484, %503, %522 in 1 : vector<8x32xf32>, vector<8x32xf32>, vector<8x32xf32>, vector<8x32xf32> -> vector<8x128xf32>
    %524 = tpu.concatenate %442, %523 in 0 : vector<8x128xf32>, vector<8x128xf32> -> vector<16x128xf32>
    %525 = arith.truncf %524 : vector<16x128xf32> to vector<16x128xbf16>
    %c0_273 = arith.constant 0 : index
    %c0_274 = arith.constant 0 : index
    %c0_275 = arith.constant 0 : index
    %526 = vector.load %arg10[%c0_273, %c0_274, %c0_275] : memref<2x128x128xbf16, #tpu.memory_space<vmem>>, vector<1x128x128xbf16>
    %527 = vector.shape_cast %526 : vector<1x128x128xbf16> to vector<128x128xbf16>
    %cst_276 = arith.constant dense<0.000000e+00> : vector<16x128xf32>
    %528 = tpu.matmul %525, %527, %cst_276 {dimension_numbers = #tpu.dot_dimension_numbers<[1], [0], [0], [1], [0, 0, 1, 1], [], []>} : vector<16x128xbf16>, vector<128x128xbf16>, vector<16x128xf32> -> vector<16x128xf32>
    %c0_277 = arith.constant 0 : index
    %c0_278 = arith.constant 0 : index
    %c0_279 = arith.constant 0 : index
    %529 = vector.load %arg11[%c0_277, %c0_278, %c0_279] : memref<2x1x128xf32, #tpu.memory_space<vmem>>, vector<1x1x128xf32>
    %530 = vector.shape_cast %529 : vector<1x1x128xf32> to vector<1x128xf32>
    %531 = vector.broadcast %530 : vector<1x128xf32> to vector<16x128xf32>
    %532 = arith.addf %528, %531 : vector<16x128xf32>
    %533 = arith.addf %344, %532 : vector<16x128xf32>
    %c0_280 = arith.constant 0 : index
    %c0_281 = arith.constant 0 : index
    %c0_282 = arith.constant 0 : index
    %534 = vector.load %arg12[%c0_280, %c0_281, %c0_282] : memref<2x1x128xf32, #tpu.memory_space<vmem>>, vector<1x1x128xf32>
    %535 = vector.shape_cast %534 : vector<1x1x128xf32> to vector<1x128xf32>
    %c0_283 = arith.constant 0 : index
    %c0_284 = arith.constant 0 : index
    %c0_285 = arith.constant 0 : index
    %536 = vector.load %arg13[%c0_283, %c0_284, %c0_285] : memref<2x1x128xf32, #tpu.memory_space<vmem>>, vector<1x1x128xf32>
    %537 = vector.shape_cast %536 : vector<1x1x128xf32> to vector<1x128xf32>
    %cst_286 = arith.constant dense<0.000000e+00> : vector<16xf32>
    %538 = vector.multi_reduction <add>, %533, %cst_286 [1] : vector<16x128xf32> to vector<16xf32>
    %539 = vector.shape_cast %538 : vector<16xf32> to vector<16x1xf32>
    %cst_287 = arith.constant 1.280000e+02 : f32
    %540 = vector.broadcast %cst_287 : f32 to vector<16x1xf32>
    %541 = arith.divf %539, %540 : vector<16x1xf32>
    %542 = vector.broadcast %541 : vector<16x1xf32> to vector<16x128xf32>
    %543 = arith.subf %533, %542 : vector<16x128xf32>
    %544 = arith.mulf %543, %543 : vector<16x128xf32>
    %cst_288 = arith.constant dense<0.000000e+00> : vector<16xf32>
    %545 = vector.multi_reduction <add>, %544, %cst_288 [1] : vector<16x128xf32> to vector<16xf32>
    %546 = vector.shape_cast %545 : vector<16xf32> to vector<16x1xf32>
    %cst_289 = arith.constant 1.280000e+02 : f32
    %547 = vector.broadcast %cst_289 : f32 to vector<16x1xf32>
    %548 = arith.divf %546, %547 : vector<16x1xf32>
    %549 = vector.broadcast %541 : vector<16x1xf32> to vector<16x128xf32>
    %550 = arith.subf %533, %549 : vector<16x128xf32>
    %cst_290 = arith.constant 9.99999974E-6 : f32
    %551 = vector.broadcast %cst_290 : f32 to vector<16x1xf32>
    %552 = arith.addf %548, %551 : vector<16x1xf32>
    %553 = math.rsqrt %552 : vector<16x1xf32>
    %554 = vector.broadcast %553 : vector<16x1xf32> to vector<16x128xf32>
    %555 = arith.mulf %550, %554 : vector<16x128xf32>
    %556 = vector.broadcast %535 : vector<1x128xf32> to vector<16x128xf32>
    %557 = arith.mulf %555, %556 : vector<16x128xf32>
    %558 = vector.broadcast %537 : vector<1x128xf32> to vector<16x128xf32>
    %559 = arith.addf %557, %558 : vector<16x128xf32>
    %560 = arith.truncf %559 : vector<16x128xf32> to vector<16x128xbf16>
    %c0_291 = arith.constant 0 : index
    %c0_292 = arith.constant 0 : index
    %c0_293 = arith.constant 0 : index
    %561 = vector.load %arg14[%c0_291, %c0_292, %c0_293] : memref<2x128x256xbf16, #tpu.memory_space<vmem>>, vector<1x128x256xbf16>
    %562 = vector.shape_cast %561 : vector<1x128x256xbf16> to vector<128x256xbf16>
    %cst_294 = arith.constant dense<0.000000e+00> : vector<16x256xf32>
    %563 = tpu.matmul %560, %562, %cst_294 {dimension_numbers = #tpu.dot_dimension_numbers<[1], [0], [0], [1], [0, 0, 1, 1], [], []>} : vector<16x128xbf16>, vector<128x256xbf16>, vector<16x256xf32> -> vector<16x256xf32>
    %c0_295 = arith.constant 0 : index
    %c0_296 = arith.constant 0 : index
    %c0_297 = arith.constant 0 : index
    %564 = vector.load %arg15[%c0_295, %c0_296, %c0_297] : memref<2x1x256xf32, #tpu.memory_space<vmem>>, vector<1x1x256xf32>
    %565 = vector.shape_cast %564 : vector<1x1x256xf32> to vector<1x256xf32>
    %566 = vector.broadcast %565 : vector<1x256xf32> to vector<16x256xf32>
    %567 = arith.addf %563, %566 : vector<16x256xf32>
    %568 = arith.mulf %567, %567 : vector<16x256xf32>
    %569 = arith.mulf %567, %568 : vector<16x256xf32>
    %cst_298 = arith.constant 4.471500e-02 : f32
    %570 = vector.broadcast %cst_298 : f32 to vector<16x256xf32>
    %571 = arith.mulf %570, %569 : vector<16x256xf32>
    %572 = arith.addf %567, %571 : vector<16x256xf32>
    %cst_299 = arith.constant 0.797884583 : f32
    %573 = vector.broadcast %cst_299 : f32 to vector<16x256xf32>
    %574 = arith.mulf %573, %572 : vector<16x256xf32>
    %575 = math.tanh %574 : vector<16x256xf32>
    %cst_300 = arith.constant 1.000000e+00 : f32
    %576 = vector.broadcast %cst_300 : f32 to vector<16x256xf32>
    %577 = arith.addf %576, %575 : vector<16x256xf32>
    %cst_301 = arith.constant 5.000000e-01 : f32
    %578 = vector.broadcast %cst_301 : f32 to vector<16x256xf32>
    %579 = arith.mulf %578, %577 : vector<16x256xf32>
    %580 = arith.mulf %567, %579 : vector<16x256xf32>
    %581 = arith.truncf %580 : vector<16x256xf32> to vector<16x256xbf16>
    %c0_302 = arith.constant 0 : index
    %c0_303 = arith.constant 0 : index
    %c0_304 = arith.constant 0 : index
    %582 = vector.load %arg16[%c0_302, %c0_303, %c0_304] : memref<2x256x128xbf16, #tpu.memory_space<vmem>>, vector<1x256x128xbf16>
    %583 = vector.shape_cast %582 : vector<1x256x128xbf16> to vector<256x128xbf16>
    %cst_305 = arith.constant dense<0.000000e+00> : vector<16x128xf32>
    %584 = tpu.matmul %581, %583, %cst_305 {dimension_numbers = #tpu.dot_dimension_numbers<[1], [0], [0], [1], [0, 0, 1, 1], [], []>} : vector<16x256xbf16>, vector<256x128xbf16>, vector<16x128xf32> -> vector<16x128xf32>
    %c0_306 = arith.constant 0 : index
    %c0_307 = arith.constant 0 : index
    %c0_308 = arith.constant 0 : index
    %585 = vector.load %arg17[%c0_306, %c0_307, %c0_308] : memref<2x1x128xf32, #tpu.memory_space<vmem>>, vector<1x1x128xf32>
    %586 = vector.shape_cast %585 : vector<1x1x128xf32> to vector<1x128xf32>
    %587 = vector.broadcast %586 : vector<1x128xf32> to vector<16x128xf32>
    %588 = arith.addf %584, %587 : vector<16x128xf32>
    %589 = arith.addf %559, %588 : vector<16x128xf32>
    %c0_309 = arith.constant 0 : index
    %c0_310 = arith.constant 0 : index
    %c0_311 = arith.constant 0 : index
    %590 = vector.load %arg18[%c0_309, %c0_310, %c0_311] : memref<2x1x128xf32, #tpu.memory_space<vmem>>, vector<1x1x128xf32>
    %591 = vector.shape_cast %590 : vector<1x1x128xf32> to vector<1x128xf32>
    %c0_312 = arith.constant 0 : index
    %c0_313 = arith.constant 0 : index
    %c0_314 = arith.constant 0 : index
    %592 = vector.load %arg19[%c0_312, %c0_313, %c0_314] : memref<2x1x128xf32, #tpu.memory_space<vmem>>, vector<1x1x128xf32>
    %593 = vector.shape_cast %592 : vector<1x1x128xf32> to vector<1x128xf32>
    %cst_315 = arith.constant dense<0.000000e+00> : vector<16xf32>
    %594 = vector.multi_reduction <add>, %589, %cst_315 [1] : vector<16x128xf32> to vector<16xf32>
    %595 = vector.shape_cast %594 : vector<16xf32> to vector<16x1xf32>
    %cst_316 = arith.constant 1.280000e+02 : f32
    %596 = vector.broadcast %cst_316 : f32 to vector<16x1xf32>
    %597 = arith.divf %595, %596 : vector<16x1xf32>
    %598 = vector.broadcast %597 : vector<16x1xf32> to vector<16x128xf32>
    %599 = arith.subf %589, %598 : vector<16x128xf32>
    %600 = arith.mulf %599, %599 : vector<16x128xf32>
    %cst_317 = arith.constant dense<0.000000e+00> : vector<16xf32>
    %601 = vector.multi_reduction <add>, %600, %cst_317 [1] : vector<16x128xf32> to vector<16xf32>
    %602 = vector.shape_cast %601 : vector<16xf32> to vector<16x1xf32>
    %cst_318 = arith.constant 1.280000e+02 : f32
    %603 = vector.broadcast %cst_318 : f32 to vector<16x1xf32>
    %604 = arith.divf %602, %603 : vector<16x1xf32>
    %605 = vector.broadcast %597 : vector<16x1xf32> to vector<16x128xf32>
    %606 = arith.subf %589, %605 : vector<16x128xf32>
    %cst_319 = arith.constant 9.99999974E-6 : f32
    %607 = vector.broadcast %cst_319 : f32 to vector<16x1xf32>
    %608 = arith.addf %604, %607 : vector<16x1xf32>
    %609 = math.rsqrt %608 : vector<16x1xf32>
    %610 = vector.broadcast %609 : vector<16x1xf32> to vector<16x128xf32>
    %611 = arith.mulf %606, %610 : vector<16x128xf32>
    %612 = vector.broadcast %591 : vector<1x128xf32> to vector<16x128xf32>
    %613 = arith.mulf %611, %612 : vector<16x128xf32>
    %614 = vector.broadcast %593 : vector<1x128xf32> to vector<16x128xf32>
    %615 = arith.addf %613, %614 : vector<16x128xf32>
    %616 = arith.truncf %615 : vector<16x128xf32> to vector<16x128xbf16>
    %c1_320 = arith.constant 1 : index
    %c0_321 = arith.constant 0 : index
    %c0_322 = arith.constant 0 : index
    %617 = vector.load %arg8[%c1_320, %c0_321, %c0_322] : memref<2x128x384xbf16, #tpu.memory_space<vmem>>, vector<1x128x384xbf16>
    %618 = vector.shape_cast %617 : vector<1x128x384xbf16> to vector<128x384xbf16>
    %cst_323 = arith.constant dense<0.000000e+00> : vector<16x384xf32>
    %619 = tpu.matmul %616, %618, %cst_323 {dimension_numbers = #tpu.dot_dimension_numbers<[1], [0], [0], [1], [0, 0, 1, 1], [], []>} : vector<16x128xbf16>, vector<128x384xbf16>, vector<16x384xf32> -> vector<16x384xf32>
    %c1_324 = arith.constant 1 : index
    %c0_325 = arith.constant 0 : index
    %c0_326 = arith.constant 0 : index
    %620 = vector.load %arg9[%c1_324, %c0_325, %c0_326] : memref<2x1x384xf32, #tpu.memory_space<vmem>>, vector<1x1x384xf32>
    %621 = vector.shape_cast %620 : vector<1x1x384xf32> to vector<1x384xf32>
    %622 = vector.broadcast %621 : vector<1x384xf32> to vector<16x384xf32>
    %623 = arith.addf %619, %622 : vector<16x384xf32>
    %624 = vector.extract_strided_slice %623 {offsets = [0, 0], sizes = [16, 128], strides = [1, 1]} : vector<16x384xf32> to vector<16x128xf32>
    %625 = vector.extract_strided_slice %623 {offsets = [0, 128], sizes = [16, 128], strides = [1, 1]} : vector<16x384xf32> to vector<16x128xf32>
    %626 = vector.extract_strided_slice %623 {offsets = [0, 256], sizes = [16, 128], strides = [1, 1]} : vector<16x384xf32> to vector<16x128xf32>
    %627 = vector.extract_strided_slice %350 {offsets = [0, 0], sizes = [1, 8], strides = [1, 1]} : vector<2x8xf32> to vector<1x8xf32>
    %628 = vector.extract_strided_slice %624 {offsets = [0, 0], sizes = [8, 128], strides = [1, 1]} : vector<16x128xf32> to vector<8x128xf32>
    %629 = vector.extract_strided_slice %625 {offsets = [0, 0], sizes = [8, 128], strides = [1, 1]} : vector<16x128xf32> to vector<8x128xf32>
    %630 = vector.extract_strided_slice %626 {offsets = [0, 0], sizes = [8, 128], strides = [1, 1]} : vector<16x128xf32> to vector<8x128xf32>
    %631 = vector.extract_strided_slice %628 {offsets = [0, 0], sizes = [8, 32], strides = [1, 1]} : vector<8x128xf32> to vector<8x32xf32>
    %632 = vector.extract_strided_slice %629 {offsets = [0, 0], sizes = [8, 32], strides = [1, 1]} : vector<8x128xf32> to vector<8x32xf32>
    %633 = vector.extract_strided_slice %630 {offsets = [0, 0], sizes = [8, 32], strides = [1, 1]} : vector<8x128xf32> to vector<8x32xf32>
    %cst_327 = arith.constant dense<0.000000e+00> : vector<8x8xf32>
    %634 = tpu.matmul %631, %632, %cst_327 {dimension_numbers = #tpu.dot_dimension_numbers<[1], [1], [0], [0], [0, 0, 1, 0], [], []>} : vector<8x32xf32>, vector<8x32xf32>, vector<8x8xf32> -> vector<8x8xf32>
    %cst_328 = arith.constant 0.176776692 : f32
    %635 = vector.broadcast %cst_328 : f32 to vector<8x8xf32>
    %636 = arith.mulf %634, %635 : vector<8x8xf32>
    %637 = vector.broadcast %627 : vector<1x8xf32> to vector<8x8xf32>
    %638 = arith.addf %636, %637 : vector<8x8xf32>
    %cst_329 = arith.constant dense<0xFF800000> : vector<8xf32>
    %639 = vector.multi_reduction <maximumf>, %638, %cst_329 [1] : vector<8x8xf32> to vector<8xf32>
    %640 = vector.shape_cast %639 : vector<8xf32> to vector<8x1xf32>
    %641 = vector.broadcast %640 : vector<8x1xf32> to vector<8x8xf32>
    %642 = arith.subf %638, %641 : vector<8x8xf32>
    %643 = math.exp %642 : vector<8x8xf32>
    %cst_330 = arith.constant dense<0.000000e+00> : vector<8xf32>
    %644 = vector.multi_reduction <add>, %643, %cst_330 [1] : vector<8x8xf32> to vector<8xf32>
    %645 = vector.shape_cast %644 : vector<8xf32> to vector<8x1xf32>
    %646 = tpu.reciprocal %645 {approx = true} : vector<8x1xf32> -> vector<8x1xf32>
    %647 = vector.broadcast %646 : vector<8x1xf32> to vector<8x8xf32>
    %648 = arith.mulf %643, %647 : vector<8x8xf32>
    %cst_331 = arith.constant dense<0.000000e+00> : vector<8x32xf32>
    %649 = tpu.matmul %648, %633, %cst_331 {dimension_numbers = #tpu.dot_dimension_numbers<[1], [0], [0], [1], [0, 0, 1, 1], [], []>} : vector<8x8xf32>, vector<8x32xf32>, vector<8x32xf32> -> vector<8x32xf32>
    %650 = vector.extract_strided_slice %628 {offsets = [0, 32], sizes = [8, 32], strides = [1, 1]} : vector<8x128xf32> to vector<8x32xf32>
    %651 = vector.extract_strided_slice %629 {offsets = [0, 32], sizes = [8, 32], strides = [1, 1]} : vector<8x128xf32> to vector<8x32xf32>
    %652 = vector.extract_strided_slice %630 {offsets = [0, 32], sizes = [8, 32], strides = [1, 1]} : vector<8x128xf32> to vector<8x32xf32>
    %cst_332 = arith.constant dense<0.000000e+00> : vector<8x8xf32>
    %653 = tpu.matmul %650, %651, %cst_332 {dimension_numbers = #tpu.dot_dimension_numbers<[1], [1], [0], [0], [0, 0, 1, 0], [], []>} : vector<8x32xf32>, vector<8x32xf32>, vector<8x8xf32> -> vector<8x8xf32>
    %cst_333 = arith.constant 0.176776692 : f32
    %654 = vector.broadcast %cst_333 : f32 to vector<8x8xf32>
    %655 = arith.mulf %653, %654 : vector<8x8xf32>
    %656 = vector.broadcast %627 : vector<1x8xf32> to vector<8x8xf32>
    %657 = arith.addf %655, %656 : vector<8x8xf32>
    %cst_334 = arith.constant dense<0xFF800000> : vector<8xf32>
    %658 = vector.multi_reduction <maximumf>, %657, %cst_334 [1] : vector<8x8xf32> to vector<8xf32>
    %659 = vector.shape_cast %658 : vector<8xf32> to vector<8x1xf32>
    %660 = vector.broadcast %659 : vector<8x1xf32> to vector<8x8xf32>
    %661 = arith.subf %657, %660 : vector<8x8xf32>
    %662 = math.exp %661 : vector<8x8xf32>
    %cst_335 = arith.constant dense<0.000000e+00> : vector<8xf32>
    %663 = vector.multi_reduction <add>, %662, %cst_335 [1] : vector<8x8xf32> to vector<8xf32>
    %664 = vector.shape_cast %663 : vector<8xf32> to vector<8x1xf32>
    %665 = tpu.reciprocal %664 {approx = true} : vector<8x1xf32> -> vector<8x1xf32>
    %666 = vector.broadcast %665 : vector<8x1xf32> to vector<8x8xf32>
    %667 = arith.mulf %662, %666 : vector<8x8xf32>
    %cst_336 = arith.constant dense<0.000000e+00> : vector<8x32xf32>
    %668 = tpu.matmul %667, %652, %cst_336 {dimension_numbers = #tpu.dot_dimension_numbers<[1], [0], [0], [1], [0, 0, 1, 1], [], []>} : vector<8x8xf32>, vector<8x32xf32>, vector<8x32xf32> -> vector<8x32xf32>
    %669 = vector.extract_strided_slice %628 {offsets = [0, 64], sizes = [8, 32], strides = [1, 1]} : vector<8x128xf32> to vector<8x32xf32>
    %670 = vector.extract_strided_slice %629 {offsets = [0, 64], sizes = [8, 32], strides = [1, 1]} : vector<8x128xf32> to vector<8x32xf32>
    %671 = vector.extract_strided_slice %630 {offsets = [0, 64], sizes = [8, 32], strides = [1, 1]} : vector<8x128xf32> to vector<8x32xf32>
    %cst_337 = arith.constant dense<0.000000e+00> : vector<8x8xf32>
    %672 = tpu.matmul %669, %670, %cst_337 {dimension_numbers = #tpu.dot_dimension_numbers<[1], [1], [0], [0], [0, 0, 1, 0], [], []>} : vector<8x32xf32>, vector<8x32xf32>, vector<8x8xf32> -> vector<8x8xf32>
    %cst_338 = arith.constant 0.176776692 : f32
    %673 = vector.broadcast %cst_338 : f32 to vector<8x8xf32>
    %674 = arith.mulf %672, %673 : vector<8x8xf32>
    %675 = vector.broadcast %627 : vector<1x8xf32> to vector<8x8xf32>
    %676 = arith.addf %674, %675 : vector<8x8xf32>
    %cst_339 = arith.constant dense<0xFF800000> : vector<8xf32>
    %677 = vector.multi_reduction <maximumf>, %676, %cst_339 [1] : vector<8x8xf32> to vector<8xf32>
    %678 = vector.shape_cast %677 : vector<8xf32> to vector<8x1xf32>
    %679 = vector.broadcast %678 : vector<8x1xf32> to vector<8x8xf32>
    %680 = arith.subf %676, %679 : vector<8x8xf32>
    %681 = math.exp %680 : vector<8x8xf32>
    %cst_340 = arith.constant dense<0.000000e+00> : vector<8xf32>
    %682 = vector.multi_reduction <add>, %681, %cst_340 [1] : vector<8x8xf32> to vector<8xf32>
    %683 = vector.shape_cast %682 : vector<8xf32> to vector<8x1xf32>
    %684 = tpu.reciprocal %683 {approx = true} : vector<8x1xf32> -> vector<8x1xf32>
    %685 = vector.broadcast %684 : vector<8x1xf32> to vector<8x8xf32>
    %686 = arith.mulf %681, %685 : vector<8x8xf32>
    %cst_341 = arith.constant dense<0.000000e+00> : vector<8x32xf32>
    %687 = tpu.matmul %686, %671, %cst_341 {dimension_numbers = #tpu.dot_dimension_numbers<[1], [0], [0], [1], [0, 0, 1, 1], [], []>} : vector<8x8xf32>, vector<8x32xf32>, vector<8x32xf32> -> vector<8x32xf32>
    %688 = vector.extract_strided_slice %628 {offsets = [0, 96], sizes = [8, 32], strides = [1, 1]} : vector<8x128xf32> to vector<8x32xf32>
    %689 = vector.extract_strided_slice %629 {offsets = [0, 96], sizes = [8, 32], strides = [1, 1]} : vector<8x128xf32> to vector<8x32xf32>
    %690 = vector.extract_strided_slice %630 {offsets = [0, 96], sizes = [8, 32], strides = [1, 1]} : vector<8x128xf32> to vector<8x32xf32>
    %cst_342 = arith.constant dense<0.000000e+00> : vector<8x8xf32>
    %691 = tpu.matmul %688, %689, %cst_342 {dimension_numbers = #tpu.dot_dimension_numbers<[1], [1], [0], [0], [0, 0, 1, 0], [], []>} : vector<8x32xf32>, vector<8x32xf32>, vector<8x8xf32> -> vector<8x8xf32>
    %cst_343 = arith.constant 0.176776692 : f32
    %692 = vector.broadcast %cst_343 : f32 to vector<8x8xf32>
    %693 = arith.mulf %691, %692 : vector<8x8xf32>
    %694 = vector.broadcast %627 : vector<1x8xf32> to vector<8x8xf32>
    %695 = arith.addf %693, %694 : vector<8x8xf32>
    %cst_344 = arith.constant dense<0xFF800000> : vector<8xf32>
    %696 = vector.multi_reduction <maximumf>, %695, %cst_344 [1] : vector<8x8xf32> to vector<8xf32>
    %697 = vector.shape_cast %696 : vector<8xf32> to vector<8x1xf32>
    %698 = vector.broadcast %697 : vector<8x1xf32> to vector<8x8xf32>
    %699 = arith.subf %695, %698 : vector<8x8xf32>
    %700 = math.exp %699 : vector<8x8xf32>
    %cst_345 = arith.constant dense<0.000000e+00> : vector<8xf32>
    %701 = vector.multi_reduction <add>, %700, %cst_345 [1] : vector<8x8xf32> to vector<8xf32>
    %702 = vector.shape_cast %701 : vector<8xf32> to vector<8x1xf32>
    %703 = tpu.reciprocal %702 {approx = true} : vector<8x1xf32> -> vector<8x1xf32>
    %704 = vector.broadcast %703 : vector<8x1xf32> to vector<8x8xf32>
    %705 = arith.mulf %700, %704 : vector<8x8xf32>
    %cst_346 = arith.constant dense<0.000000e+00> : vector<8x32xf32>
    %706 = tpu.matmul %705, %690, %cst_346 {dimension_numbers = #tpu.dot_dimension_numbers<[1], [0], [0], [1], [0, 0, 1, 1], [], []>} : vector<8x8xf32>, vector<8x32xf32>, vector<8x32xf32> -> vector<8x32xf32>
    %707 = tpu.concatenate %649, %668, %687, %706 in 1 : vector<8x32xf32>, vector<8x32xf32>, vector<8x32xf32>, vector<8x32xf32> -> vector<8x128xf32>
    %708 = vector.extract_strided_slice %350 {offsets = [1, 0], sizes = [1, 8], strides = [1, 1]} : vector<2x8xf32> to vector<1x8xf32>
    %709 = vector.extract_strided_slice %624 {offsets = [8, 0], sizes = [8, 128], strides = [1, 1]} : vector<16x128xf32> to vector<8x128xf32>
    %710 = vector.extract_strided_slice %625 {offsets = [8, 0], sizes = [8, 128], strides = [1, 1]} : vector<16x128xf32> to vector<8x128xf32>
    %711 = vector.extract_strided_slice %626 {offsets = [8, 0], sizes = [8, 128], strides = [1, 1]} : vector<16x128xf32> to vector<8x128xf32>
    %712 = vector.extract_strided_slice %709 {offsets = [0, 0], sizes = [8, 32], strides = [1, 1]} : vector<8x128xf32> to vector<8x32xf32>
    %713 = vector.extract_strided_slice %710 {offsets = [0, 0], sizes = [8, 32], strides = [1, 1]} : vector<8x128xf32> to vector<8x32xf32>
    %714 = vector.extract_strided_slice %711 {offsets = [0, 0], sizes = [8, 32], strides = [1, 1]} : vector<8x128xf32> to vector<8x32xf32>
    %cst_347 = arith.constant dense<0.000000e+00> : vector<8x8xf32>
    %715 = tpu.matmul %712, %713, %cst_347 {dimension_numbers = #tpu.dot_dimension_numbers<[1], [1], [0], [0], [0, 0, 1, 0], [], []>} : vector<8x32xf32>, vector<8x32xf32>, vector<8x8xf32> -> vector<8x8xf32>
    %cst_348 = arith.constant 0.176776692 : f32
    %716 = vector.broadcast %cst_348 : f32 to vector<8x8xf32>
    %717 = arith.mulf %715, %716 : vector<8x8xf32>
    %718 = vector.broadcast %708 : vector<1x8xf32> to vector<8x8xf32>
    %719 = arith.addf %717, %718 : vector<8x8xf32>
    %cst_349 = arith.constant dense<0xFF800000> : vector<8xf32>
    %720 = vector.multi_reduction <maximumf>, %719, %cst_349 [1] : vector<8x8xf32> to vector<8xf32>
    %721 = vector.shape_cast %720 : vector<8xf32> to vector<8x1xf32>
    %722 = vector.broadcast %721 : vector<8x1xf32> to vector<8x8xf32>
    %723 = arith.subf %719, %722 : vector<8x8xf32>
    %724 = math.exp %723 : vector<8x8xf32>
    %cst_350 = arith.constant dense<0.000000e+00> : vector<8xf32>
    %725 = vector.multi_reduction <add>, %724, %cst_350 [1] : vector<8x8xf32> to vector<8xf32>
    %726 = vector.shape_cast %725 : vector<8xf32> to vector<8x1xf32>
    %727 = tpu.reciprocal %726 {approx = true} : vector<8x1xf32> -> vector<8x1xf32>
    %728 = vector.broadcast %727 : vector<8x1xf32> to vector<8x8xf32>
    %729 = arith.mulf %724, %728 : vector<8x8xf32>
    %cst_351 = arith.constant dense<0.000000e+00> : vector<8x32xf32>
    %730 = tpu.matmul %729, %714, %cst_351 {dimension_numbers = #tpu.dot_dimension_numbers<[1], [0], [0], [1], [0, 0, 1, 1], [], []>} : vector<8x8xf32>, vector<8x32xf32>, vector<8x32xf32> -> vector<8x32xf32>
    %731 = vector.extract_strided_slice %709 {offsets = [0, 32], sizes = [8, 32], strides = [1, 1]} : vector<8x128xf32> to vector<8x32xf32>
    %732 = vector.extract_strided_slice %710 {offsets = [0, 32], sizes = [8, 32], strides = [1, 1]} : vector<8x128xf32> to vector<8x32xf32>
    %733 = vector.extract_strided_slice %711 {offsets = [0, 32], sizes = [8, 32], strides = [1, 1]} : vector<8x128xf32> to vector<8x32xf32>
    %cst_352 = arith.constant dense<0.000000e+00> : vector<8x8xf32>
    %734 = tpu.matmul %731, %732, %cst_352 {dimension_numbers = #tpu.dot_dimension_numbers<[1], [1], [0], [0], [0, 0, 1, 0], [], []>} : vector<8x32xf32>, vector<8x32xf32>, vector<8x8xf32> -> vector<8x8xf32>
    %cst_353 = arith.constant 0.176776692 : f32
    %735 = vector.broadcast %cst_353 : f32 to vector<8x8xf32>
    %736 = arith.mulf %734, %735 : vector<8x8xf32>
    %737 = vector.broadcast %708 : vector<1x8xf32> to vector<8x8xf32>
    %738 = arith.addf %736, %737 : vector<8x8xf32>
    %cst_354 = arith.constant dense<0xFF800000> : vector<8xf32>
    %739 = vector.multi_reduction <maximumf>, %738, %cst_354 [1] : vector<8x8xf32> to vector<8xf32>
    %740 = vector.shape_cast %739 : vector<8xf32> to vector<8x1xf32>
    %741 = vector.broadcast %740 : vector<8x1xf32> to vector<8x8xf32>
    %742 = arith.subf %738, %741 : vector<8x8xf32>
    %743 = math.exp %742 : vector<8x8xf32>
    %cst_355 = arith.constant dense<0.000000e+00> : vector<8xf32>
    %744 = vector.multi_reduction <add>, %743, %cst_355 [1] : vector<8x8xf32> to vector<8xf32>
    %745 = vector.shape_cast %744 : vector<8xf32> to vector<8x1xf32>
    %746 = tpu.reciprocal %745 {approx = true} : vector<8x1xf32> -> vector<8x1xf32>
    %747 = vector.broadcast %746 : vector<8x1xf32> to vector<8x8xf32>
    %748 = arith.mulf %743, %747 : vector<8x8xf32>
    %cst_356 = arith.constant dense<0.000000e+00> : vector<8x32xf32>
    %749 = tpu.matmul %748, %733, %cst_356 {dimension_numbers = #tpu.dot_dimension_numbers<[1], [0], [0], [1], [0, 0, 1, 1], [], []>} : vector<8x8xf32>, vector<8x32xf32>, vector<8x32xf32> -> vector<8x32xf32>
    %750 = vector.extract_strided_slice %709 {offsets = [0, 64], sizes = [8, 32], strides = [1, 1]} : vector<8x128xf32> to vector<8x32xf32>
    %751 = vector.extract_strided_slice %710 {offsets = [0, 64], sizes = [8, 32], strides = [1, 1]} : vector<8x128xf32> to vector<8x32xf32>
    %752 = vector.extract_strided_slice %711 {offsets = [0, 64], sizes = [8, 32], strides = [1, 1]} : vector<8x128xf32> to vector<8x32xf32>
    %cst_357 = arith.constant dense<0.000000e+00> : vector<8x8xf32>
    %753 = tpu.matmul %750, %751, %cst_357 {dimension_numbers = #tpu.dot_dimension_numbers<[1], [1], [0], [0], [0, 0, 1, 0], [], []>} : vector<8x32xf32>, vector<8x32xf32>, vector<8x8xf32> -> vector<8x8xf32>
    %cst_358 = arith.constant 0.176776692 : f32
    %754 = vector.broadcast %cst_358 : f32 to vector<8x8xf32>
    %755 = arith.mulf %753, %754 : vector<8x8xf32>
    %756 = vector.broadcast %708 : vector<1x8xf32> to vector<8x8xf32>
    %757 = arith.addf %755, %756 : vector<8x8xf32>
    %cst_359 = arith.constant dense<0xFF800000> : vector<8xf32>
    %758 = vector.multi_reduction <maximumf>, %757, %cst_359 [1] : vector<8x8xf32> to vector<8xf32>
    %759 = vector.shape_cast %758 : vector<8xf32> to vector<8x1xf32>
    %760 = vector.broadcast %759 : vector<8x1xf32> to vector<8x8xf32>
    %761 = arith.subf %757, %760 : vector<8x8xf32>
    %762 = math.exp %761 : vector<8x8xf32>
    %cst_360 = arith.constant dense<0.000000e+00> : vector<8xf32>
    %763 = vector.multi_reduction <add>, %762, %cst_360 [1] : vector<8x8xf32> to vector<8xf32>
    %764 = vector.shape_cast %763 : vector<8xf32> to vector<8x1xf32>
    %765 = tpu.reciprocal %764 {approx = true} : vector<8x1xf32> -> vector<8x1xf32>
    %766 = vector.broadcast %765 : vector<8x1xf32> to vector<8x8xf32>
    %767 = arith.mulf %762, %766 : vector<8x8xf32>
    %cst_361 = arith.constant dense<0.000000e+00> : vector<8x32xf32>
    %768 = tpu.matmul %767, %752, %cst_361 {dimension_numbers = #tpu.dot_dimension_numbers<[1], [0], [0], [1], [0, 0, 1, 1], [], []>} : vector<8x8xf32>, vector<8x32xf32>, vector<8x32xf32> -> vector<8x32xf32>
    %769 = vector.extract_strided_slice %709 {offsets = [0, 96], sizes = [8, 32], strides = [1, 1]} : vector<8x128xf32> to vector<8x32xf32>
    %770 = vector.extract_strided_slice %710 {offsets = [0, 96], sizes = [8, 32], strides = [1, 1]} : vector<8x128xf32> to vector<8x32xf32>
    %771 = vector.extract_strided_slice %711 {offsets = [0, 96], sizes = [8, 32], strides = [1, 1]} : vector<8x128xf32> to vector<8x32xf32>
    %cst_362 = arith.constant dense<0.000000e+00> : vector<8x8xf32>
    %772 = tpu.matmul %769, %770, %cst_362 {dimension_numbers = #tpu.dot_dimension_numbers<[1], [1], [0], [0], [0, 0, 1, 0], [], []>} : vector<8x32xf32>, vector<8x32xf32>, vector<8x8xf32> -> vector<8x8xf32>
    %cst_363 = arith.constant 0.176776692 : f32
    %773 = vector.broadcast %cst_363 : f32 to vector<8x8xf32>
    %774 = arith.mulf %772, %773 : vector<8x8xf32>
    %775 = vector.broadcast %708 : vector<1x8xf32> to vector<8x8xf32>
    %776 = arith.addf %774, %775 : vector<8x8xf32>
    %cst_364 = arith.constant dense<0xFF800000> : vector<8xf32>
    %777 = vector.multi_reduction <maximumf>, %776, %cst_364 [1] : vector<8x8xf32> to vector<8xf32>
    %778 = vector.shape_cast %777 : vector<8xf32> to vector<8x1xf32>
    %779 = vector.broadcast %778 : vector<8x1xf32> to vector<8x8xf32>
    %780 = arith.subf %776, %779 : vector<8x8xf32>
    %781 = math.exp %780 : vector<8x8xf32>
    %cst_365 = arith.constant dense<0.000000e+00> : vector<8xf32>
    %782 = vector.multi_reduction <add>, %781, %cst_365 [1] : vector<8x8xf32> to vector<8xf32>
    %783 = vector.shape_cast %782 : vector<8xf32> to vector<8x1xf32>
    %784 = tpu.reciprocal %783 {approx = true} : vector<8x1xf32> -> vector<8x1xf32>
    %785 = vector.broadcast %784 : vector<8x1xf32> to vector<8x8xf32>
    %786 = arith.mulf %781, %785 : vector<8x8xf32>
    %cst_366 = arith.constant dense<0.000000e+00> : vector<8x32xf32>
    %787 = tpu.matmul %786, %771, %cst_366 {dimension_numbers = #tpu.dot_dimension_numbers<[1], [0], [0], [1], [0, 0, 1, 1], [], []>} : vector<8x8xf32>, vector<8x32xf32>, vector<8x32xf32> -> vector<8x32xf32>
    %788 = tpu.concatenate %730, %749, %768, %787 in 1 : vector<8x32xf32>, vector<8x32xf32>, vector<8x32xf32>, vector<8x32xf32> -> vector<8x128xf32>
    %789 = tpu.concatenate %707, %788 in 0 : vector<8x128xf32>, vector<8x128xf32> -> vector<16x128xf32>
    %790 = arith.truncf %789 : vector<16x128xf32> to vector<16x128xbf16>
    %c1_367 = arith.constant 1 : index
    %c0_368 = arith.constant 0 : index
    %c0_369 = arith.constant 0 : index
    %791 = vector.load %arg10[%c1_367, %c0_368, %c0_369] : memref<2x128x128xbf16, #tpu.memory_space<vmem>>, vector<1x128x128xbf16>
    %792 = vector.shape_cast %791 : vector<1x128x128xbf16> to vector<128x128xbf16>
    %cst_370 = arith.constant dense<0.000000e+00> : vector<16x128xf32>
    %793 = tpu.matmul %790, %792, %cst_370 {dimension_numbers = #tpu.dot_dimension_numbers<[1], [0], [0], [1], [0, 0, 1, 1], [], []>} : vector<16x128xbf16>, vector<128x128xbf16>, vector<16x128xf32> -> vector<16x128xf32>
    %c1_371 = arith.constant 1 : index
    %c0_372 = arith.constant 0 : index
    %c0_373 = arith.constant 0 : index
    %794 = vector.load %arg11[%c1_371, %c0_372, %c0_373] : memref<2x1x128xf32, #tpu.memory_space<vmem>>, vector<1x1x128xf32>
    %795 = vector.shape_cast %794 : vector<1x1x128xf32> to vector<1x128xf32>
    %796 = vector.broadcast %795 : vector<1x128xf32> to vector<16x128xf32>
    %797 = arith.addf %793, %796 : vector<16x128xf32>
    %798 = arith.addf %615, %797 : vector<16x128xf32>
    %c1_374 = arith.constant 1 : index
    %c0_375 = arith.constant 0 : index
    %c0_376 = arith.constant 0 : index
    %799 = vector.load %arg12[%c1_374, %c0_375, %c0_376] : memref<2x1x128xf32, #tpu.memory_space<vmem>>, vector<1x1x128xf32>
    %800 = vector.shape_cast %799 : vector<1x1x128xf32> to vector<1x128xf32>
    %c1_377 = arith.constant 1 : index
    %c0_378 = arith.constant 0 : index
    %c0_379 = arith.constant 0 : index
    %801 = vector.load %arg13[%c1_377, %c0_378, %c0_379] : memref<2x1x128xf32, #tpu.memory_space<vmem>>, vector<1x1x128xf32>
    %802 = vector.shape_cast %801 : vector<1x1x128xf32> to vector<1x128xf32>
    %cst_380 = arith.constant dense<0.000000e+00> : vector<16xf32>
    %803 = vector.multi_reduction <add>, %798, %cst_380 [1] : vector<16x128xf32> to vector<16xf32>
    %804 = vector.shape_cast %803 : vector<16xf32> to vector<16x1xf32>
    %cst_381 = arith.constant 1.280000e+02 : f32
    %805 = vector.broadcast %cst_381 : f32 to vector<16x1xf32>
    %806 = arith.divf %804, %805 : vector<16x1xf32>
    %807 = vector.broadcast %806 : vector<16x1xf32> to vector<16x128xf32>
    %808 = arith.subf %798, %807 : vector<16x128xf32>
    %809 = arith.mulf %808, %808 : vector<16x128xf32>
    %cst_382 = arith.constant dense<0.000000e+00> : vector<16xf32>
    %810 = vector.multi_reduction <add>, %809, %cst_382 [1] : vector<16x128xf32> to vector<16xf32>
    %811 = vector.shape_cast %810 : vector<16xf32> to vector<16x1xf32>
    %cst_383 = arith.constant 1.280000e+02 : f32
    %812 = vector.broadcast %cst_383 : f32 to vector<16x1xf32>
    %813 = arith.divf %811, %812 : vector<16x1xf32>
    %814 = vector.broadcast %806 : vector<16x1xf32> to vector<16x128xf32>
    %815 = arith.subf %798, %814 : vector<16x128xf32>
    %cst_384 = arith.constant 9.99999974E-6 : f32
    %816 = vector.broadcast %cst_384 : f32 to vector<16x1xf32>
    %817 = arith.addf %813, %816 : vector<16x1xf32>
    %818 = math.rsqrt %817 : vector<16x1xf32>
    %819 = vector.broadcast %818 : vector<16x1xf32> to vector<16x128xf32>
    %820 = arith.mulf %815, %819 : vector<16x128xf32>
    %821 = vector.broadcast %800 : vector<1x128xf32> to vector<16x128xf32>
    %822 = arith.mulf %820, %821 : vector<16x128xf32>
    %823 = vector.broadcast %802 : vector<1x128xf32> to vector<16x128xf32>
    %824 = arith.addf %822, %823 : vector<16x128xf32>
    %825 = arith.truncf %824 : vector<16x128xf32> to vector<16x128xbf16>
    %c1_385 = arith.constant 1 : index
    %c0_386 = arith.constant 0 : index
    %c0_387 = arith.constant 0 : index
    %826 = vector.load %arg14[%c1_385, %c0_386, %c0_387] : memref<2x128x256xbf16, #tpu.memory_space<vmem>>, vector<1x128x256xbf16>
    %827 = vector.shape_cast %826 : vector<1x128x256xbf16> to vector<128x256xbf16>
    %cst_388 = arith.constant dense<0.000000e+00> : vector<16x256xf32>
    %828 = tpu.matmul %825, %827, %cst_388 {dimension_numbers = #tpu.dot_dimension_numbers<[1], [0], [0], [1], [0, 0, 1, 1], [], []>} : vector<16x128xbf16>, vector<128x256xbf16>, vector<16x256xf32> -> vector<16x256xf32>
    %c1_389 = arith.constant 1 : index
    %c0_390 = arith.constant 0 : index
    %c0_391 = arith.constant 0 : index
    %829 = vector.load %arg15[%c1_389, %c0_390, %c0_391] : memref<2x1x256xf32, #tpu.memory_space<vmem>>, vector<1x1x256xf32>
    %830 = vector.shape_cast %829 : vector<1x1x256xf32> to vector<1x256xf32>
    %831 = vector.broadcast %830 : vector<1x256xf32> to vector<16x256xf32>
    %832 = arith.addf %828, %831 : vector<16x256xf32>
    %833 = arith.mulf %832, %832 : vector<16x256xf32>
    %834 = arith.mulf %832, %833 : vector<16x256xf32>
    %cst_392 = arith.constant 4.471500e-02 : f32
    %835 = vector.broadcast %cst_392 : f32 to vector<16x256xf32>
    %836 = arith.mulf %835, %834 : vector<16x256xf32>
    %837 = arith.addf %832, %836 : vector<16x256xf32>
    %cst_393 = arith.constant 0.797884583 : f32
    %838 = vector.broadcast %cst_393 : f32 to vector<16x256xf32>
    %839 = arith.mulf %838, %837 : vector<16x256xf32>
    %840 = math.tanh %839 : vector<16x256xf32>
    %cst_394 = arith.constant 1.000000e+00 : f32
    %841 = vector.broadcast %cst_394 : f32 to vector<16x256xf32>
    %842 = arith.addf %841, %840 : vector<16x256xf32>
    %cst_395 = arith.constant 5.000000e-01 : f32
    %843 = vector.broadcast %cst_395 : f32 to vector<16x256xf32>
    %844 = arith.mulf %843, %842 : vector<16x256xf32>
    %845 = arith.mulf %832, %844 : vector<16x256xf32>
    %846 = arith.truncf %845 : vector<16x256xf32> to vector<16x256xbf16>
    %c1_396 = arith.constant 1 : index
    %c0_397 = arith.constant 0 : index
    %c0_398 = arith.constant 0 : index
    %847 = vector.load %arg16[%c1_396, %c0_397, %c0_398] : memref<2x256x128xbf16, #tpu.memory_space<vmem>>, vector<1x256x128xbf16>
    %848 = vector.shape_cast %847 : vector<1x256x128xbf16> to vector<256x128xbf16>
    %cst_399 = arith.constant dense<0.000000e+00> : vector<16x128xf32>
    %849 = tpu.matmul %846, %848, %cst_399 {dimension_numbers = #tpu.dot_dimension_numbers<[1], [0], [0], [1], [0, 0, 1, 1], [], []>} : vector<16x256xbf16>, vector<256x128xbf16>, vector<16x128xf32> -> vector<16x128xf32>
    %c1_400 = arith.constant 1 : index
    %c0_401 = arith.constant 0 : index
    %c0_402 = arith.constant 0 : index
    %850 = vector.load %arg17[%c1_400, %c0_401, %c0_402] : memref<2x1x128xf32, #tpu.memory_space<vmem>>, vector<1x1x128xf32>
    %851 = vector.shape_cast %850 : vector<1x1x128xf32> to vector<1x128xf32>
    %852 = vector.broadcast %851 : vector<1x128xf32> to vector<16x128xf32>
    %853 = arith.addf %849, %852 : vector<16x128xf32>
    %854 = arith.addf %824, %853 : vector<16x128xf32>
    %c1_403 = arith.constant 1 : index
    %c0_404 = arith.constant 0 : index
    %c0_405 = arith.constant 0 : index
    %855 = vector.load %arg18[%c1_403, %c0_404, %c0_405] : memref<2x1x128xf32, #tpu.memory_space<vmem>>, vector<1x1x128xf32>
    %856 = vector.shape_cast %855 : vector<1x1x128xf32> to vector<1x128xf32>
    %c1_406 = arith.constant 1 : index
    %c0_407 = arith.constant 0 : index
    %c0_408 = arith.constant 0 : index
    %857 = vector.load %arg19[%c1_406, %c0_407, %c0_408] : memref<2x1x128xf32, #tpu.memory_space<vmem>>, vector<1x1x128xf32>
    %858 = vector.shape_cast %857 : vector<1x1x128xf32> to vector<1x128xf32>
    %cst_409 = arith.constant dense<0.000000e+00> : vector<16xf32>
    %859 = vector.multi_reduction <add>, %854, %cst_409 [1] : vector<16x128xf32> to vector<16xf32>
    %860 = vector.shape_cast %859 : vector<16xf32> to vector<16x1xf32>
    %cst_410 = arith.constant 1.280000e+02 : f32
    %861 = vector.broadcast %cst_410 : f32 to vector<16x1xf32>
    %862 = arith.divf %860, %861 : vector<16x1xf32>
    %863 = vector.broadcast %862 : vector<16x1xf32> to vector<16x128xf32>
    %864 = arith.subf %854, %863 : vector<16x128xf32>
    %865 = arith.mulf %864, %864 : vector<16x128xf32>
    %cst_411 = arith.constant dense<0.000000e+00> : vector<16xf32>
    %866 = vector.multi_reduction <add>, %865, %cst_411 [1] : vector<16x128xf32> to vector<16xf32>
    %867 = vector.shape_cast %866 : vector<16xf32> to vector<16x1xf32>
    %cst_412 = arith.constant 1.280000e+02 : f32
    %868 = vector.broadcast %cst_412 : f32 to vector<16x1xf32>
    %869 = arith.divf %867, %868 : vector<16x1xf32>
    %870 = vector.broadcast %862 : vector<16x1xf32> to vector<16x128xf32>
    %871 = arith.subf %854, %870 : vector<16x128xf32>
    %cst_413 = arith.constant 9.99999974E-6 : f32
    %872 = vector.broadcast %cst_413 : f32 to vector<16x1xf32>
    %873 = arith.addf %869, %872 : vector<16x1xf32>
    %874 = math.rsqrt %873 : vector<16x1xf32>
    %875 = vector.broadcast %874 : vector<16x1xf32> to vector<16x128xf32>
    %876 = arith.mulf %871, %875 : vector<16x128xf32>
    %877 = vector.broadcast %856 : vector<1x128xf32> to vector<16x128xf32>
    %878 = arith.mulf %876, %877 : vector<16x128xf32>
    %879 = vector.broadcast %858 : vector<1x128xf32> to vector<16x128xf32>
    %880 = arith.addf %878, %879 : vector<16x128xf32>
    %881 = vector.shape_cast %880 : vector<16x128xf32> to vector<2x8x128xf32>
    %882 = vector.extract_strided_slice %881 {offsets = [0, 0, 0], sizes = [2, 1, 128], strides = [1, 1, 1]} : vector<2x8x128xf32> to vector<2x1x128xf32>
    %883 = vector.shape_cast %882 : vector<2x1x128xf32> to vector<2x128xf32>
    %c0_414 = arith.constant 0 : index
    %c0_415 = arith.constant 0 : index
    %884 = vector.load %arg20[%c0_414, %c0_415] : memref<2x128xf32, #tpu.memory_space<vmem>>, vector<2x128xf32>
    tpu.vector_store %arg20[%c0_414, %c0_415], %883 {strides = array<i32>} : memref<2x128xf32, #tpu.memory_space<vmem>>, vector<2x128xf32>,
    return
  }
}

</mosaic_0001>

<bundles_post_ra>
// kernel: roberta_for_search.1
= control target key start
LH: loop header
LB: loop body
LE: loop exit
PB: predicated region body
PF: predicated region fallthrough
CT: control target
= control target key end

     0   :  { %s7918_s0 = inlined_call_operand.vmem [shape: s32[2,8], index: 0, kind: input, shape index: {}]   ;;  %s7919_s1 = inlined_call_operand.vmem [shape: s32[2,8], index: 1, kind: input, shape index: {}]   ;;  %s7920_s2 = inlined_call_operand.vmem [shape: s32[2,8], index: 2, kind: input, shape index: {}]   ;;  %s7921_s3 = inlined_call_operand.hbm [shape: f32[100,128], index: 3, kind: input, shape index: {}]   ;;  %s7922_s4 = inlined_call_operand.hbm [shape: f32[64,128], index: 4, kind: input, shape index: {}]   ;;  %s7923_s5 = inlined_call_operand.vmem [shape: f32[2,128], index: 5, kind: input, shape index: {}]   ;;  %s7924_s6 = inlined_call_operand.hbm [shape: f32[1,128], index: 6, kind: input, shape index: {}]   ;;  %s7925_s7 = inlined_call_operand.hbm [shape: f32[1,128], index: 7, kind: input, shape index: {}]   ;;  %s7926_s8 = inlined_call_operand.hbm [shape: bf16[2,128,384], index: 8, kind: input, shape index: {}]   ;;  %s7927_s9 = inlined_call_operand.hbm [shape: f32[2,1,384], index: 9, kind: input, shape index: {}]   ;;  %s7928_s10 = inlined_call_operand.hbm [shape: bf16[2,128,128], index: 10, kind: input, shape index: {}]   ;;  %s7929_s11 = inlined_call_operand.hbm [shape: f32[2,1,128], index: 11, kind: input, shape index: {}]   ;;  %s7930_s12 = inlined_call_operand.vmem [shape: f32[2,1,128], index: 12, kind: input, shape index: {}]   ;;  %s7931_s13 = inlined_call_operand.hbm [shape: f32[2,1,128], index: 13, kind: input, shape index: {}]   ;;  %s7932_s14 = inlined_call_operand.hbm [shape: bf16[2,128,256], index: 14, kind: input, shape index: {}]   ;;  %s7933_s15 = inlined_call_operand.hbm [shape: f32[2,1,256], index: 15, kind: input, shape index: {}]   ;;  %s7934_s16 = inlined_call_operand.hbm [shape: bf16[2,256,128], index: 16, kind: input, shape index: {}]   ;;  %s7935_s17 = inlined_call_operand.hbm [shape: f32[2,1,128], index: 17, kind: input, shape index: {}]   ;;  %s7936_s18 = inlined_call_operand.vmem [shape: f32[2,1,128], index: 18, kind: input, shape index: {}]   ;;  %s7937_s19 = inlined_call_operand.vmem [shape: f32[2,1,128], index: 19, kind: input, shape index: {}]   ;;  %s7938_s20 = inlined_call_operand.hbm [shape: f32[2,128], index: 20, kind: output, shape index: {}]  }
   0x1   :  { %7952 = sst [smem:[#allocation43_spill]] %s7918_s0 }
   0x2   :  { %7953 = sst [smem:[#allocation44_spill]] %s7919_s1 }
   0x3   :  { %7954 = sst [smem:[#allocation45_spill]] %s7920_s2 }
   0x4   :  { %7955 = sst [smem:[#allocation46_spill]] %s7921_s3 }
   0x5   :  { %7956 = sst [smem:[#allocation47_spill]] %s7922_s4 }
   0x6   :  { %7957 = sst [smem:[#allocation48_spill]] %s7930_s12 }
   0x7   :  { %7958 = sst [smem:[#allocation49_spill]] %s7936_s18 }
   0x8   :  { %7959 = sst [smem:[#allocation50_spill]] %s7937_s19 }
   0x9   :  { %7960 = sst [smem:[#allocation51_spill]] %s7938_s20 }
   0xa   :  { %25 = vsyncpa [#allocation5], 0 }
   0xb   :  { %26 = vsyncpa [#allocation7], 0 }
   0xc   :  { %27 = vsyncpa [#allocation3], 0 }
   0xd   :  { %28 = vsyncpa [#allocation10], 0 }
   0xe   :  { %29 = vsyncpa [#allocation13], 0 }
   0xf   :  { %30 = vsyncpa [#allocation16], 0 }
  0x10   :  { %31 = vsyncpa [#allocation19], 0 }
  0x11   :  { %32 = vsyncpa [#allocation22], 0 }
  0x12   :  { %33 = vsyncpa [#allocation25], 0 }
  0x13   :  { %34 = vsyncpa [#allocation4], 0  ;;  %s6779_s1 = smov [#allocation9]   ;;  %s6780_s23 = smov [#allocation12]  }
  0x14   :  { %s74_s22 = sshll.u32 %s6779_s1, 4  ;;  %s99_s24 = sshll.u32 %s6780_s23, 4  ;;  %s75_s22 = int_to_ptr.vmem [resolvable:$true] %s74_s22  ;;  %s100_s24 = int_to_ptr.vmem [resolvable:$true] %s99_s24 }
  0x15   :  { %s6415_s2 = scalar_lea.vmem %s75_s22, 1024  ;;  %p6420_p1 = scmp.lt.s32.totalorder %s75_s22, %s75_s22 }
  0x16   :  { %p6416_p0 = scmp.ne.s32.totalorder %s75_s22, %s6415_s2  ;;  %p6421_p2 = scmp.lt.s32.totalorder %s6415_s2, %s6415_s2 }
  0x18   :  { %p6422_p3 = por %p6421_p2, %p6420_p1 }
  0x1a   :  { %p6423_p4 = pnand %p6422_p3, %p6416_p0 }
  0x1c   :  { %6426 = shalt.err (!%p6423_p4)
}
  0x1d   :  { %s6781_s25 = smov 128   ;;  %s6782_s3 = smov 8  }
  0x1e   :  { %s7961_s28 = sld [smem:[#allocation47_spill]]  ;;  %s6435_s4 = scalar_lea.vmem %s100_s24, 16 }
  0x1f   :  { %p6436_p5 = scmp.ne.s32.totalorder %s100_s24, %s6435_s4  ;;  %s6439_s29 = scalar_lea.vmem %s100_s24, 32 }
  0x20   :  { %p6440_p6 = scmp.lt.s32.totalorder %s100_s24, %s100_s24  ;;  %p6441_p7 = scmp.lt.s32.totalorder %s6439_s29, %s6435_s4 }
  0x22   :  { %p6442_p8 = por %p6441_p7, %p6440_p6 }
  0x24   :  { %80 = dma.hbm_to_vmem [thread:$0]  %s7961_s28, 1024, %s75_s22, [#allocation10], %s6781_s25, %s6781_s25, %s6782_s3  }
  0x25   :  { %p6443_p9 = pnand %p6442_p8, %p6436_p5 }
  0x27   :  { %6446 = shalt.err (!%p6443_p9)
}
  0x28   :  { %102 = dma.hbm_to_vmem [thread:$0]  %s7925_s7, 16, %s100_s24, [#allocation13]  }
  0x29   :  { %s6783_s21 = smov [#allocation15]  }
  0x2a   :  { %s120_s1 = sshll.u32 %s6783_s21, 4  ;;  %s121_s1 = int_to_ptr.vmem [resolvable:$true] %s120_s1 }
  0x2b   :  { %s6455_s23 = scalar_lea.vmem %s121_s1, 96  ;;  %p6460_p11 = scmp.lt.s32.totalorder %s121_s1, %s121_s1 }
  0x2c   :  { %p6456_p10 = scmp.ne.s32.totalorder %s121_s1, %s6455_s23  ;;  %p6461_p12 = scmp.lt.s32.totalorder %s6455_s23, %s6455_s23 }
  0x2e   :  { %p6462_p13 = por %p6461_p12, %p6460_p11 }
  0x30   :  { %p6463_p0 = pnand %p6462_p13, %p6456_p10 }
  0x32   :  { %6466 = shalt.err (!%p6463_p0)
}
  0x33   :  { %s6784_s22 = smov 48   ;;  %s6785_s2 = smov 3  }
  0x34   :  { %126 = dma.hbm_to_vmem [thread:$0]  %s7927_s9, 96, %s121_s1, [#allocation16], %s6784_s22, %s6784_s22, %s6785_s2  }
  0x35   :  { %s6786_s28 = smov [#allocation18]  }
  0x36   :  { %s144_s4 = sshll.u32 %s6786_s28, 4  ;;  %s145_s4 = int_to_ptr.vmem [resolvable:$true] %s144_s4 }
  0x37   :  { %s6475_s7 = scalar_lea.vmem %s145_s4, 32  ;;  %p6480_p2 = scmp.lt.s32.totalorder %s145_s4, %s145_s4 }
  0x38   :  { %p6476_p1 = scmp.ne.s32.totalorder %s145_s4, %s6475_s7  ;;  %p6481_p3 = scmp.lt.s32.totalorder %s6475_s7, %s6475_s7 }
  0x3a   :  { %p6482_p4 = por %p6481_p3, %p6480_p2 }
  0x3c   :  { %p6483_p5 = pnand %p6482_p4, %p6476_p1 }
  0x3e   :  { %6486 = shalt.err (!%p6483_p5)
}
  0x3f   :  { %s6787_s24 = smov 16   ;;  %s6788_s29 = smov 1  }
  0x40   :  { %150 = dma.hbm_to_vmem [thread:$0]  %s7929_s11, 32, %s145_s4, [#allocation19], %s6787_s24, %s6787_s24, %s6788_s29  }
  0x41   :  { %s6789_s9 = smov [#allocation21]  }
  0x42   :  { %s170_s21 = sshll.u32 %s6789_s9, 4  ;;  %s171_s21 = int_to_ptr.vmem [resolvable:$true] %s170_s21 }
  0x43   :  { %s6495_s1 = scalar_lea.vmem %s171_s21, 4096  ;;  %p6500_p7 = scmp.lt.s32.totalorder %s171_s21, %s171_s21 }
  0x44   :  { %p6496_p6 = scmp.ne.s32.totalorder %s171_s21, %s6495_s1  ;;  %p6501_p8 = scmp.lt.s32.totalorder %s6495_s1, %s6495_s1 }
  0x46   :  { %p6502_p9 = por %p6501_p8, %p6500_p7 }
  0x48   :  { %p6503_p10 = pnand %p6502_p9, %p6496_p6 }
  0x4a   :  { %6506 = shalt.err (!%p6503_p10)
}
  0x4b   :  { %176 = dma.hbm_to_vmem [thread:$0]  %s7932_s14, 4096, %s171_s21, [#allocation22], %s6781_s25, %s6781_s25, %s6782_s3  }
  0x4c   :  { %s6790_s2 = smov [#allocation24]   ;;  %s7962_s28 = sld [smem:[#allocation43_spill]] }
  0x4d   :  { %s194_s26 = sshll.u32 %s6790_s2, 4  ;;  %s195_s26 = int_to_ptr.vmem [resolvable:$true] %s194_s26 }
  0x4e   :  { %s6515_s7 = scalar_lea.vmem %s195_s26, 4096  ;;  %p6520_p12 = scmp.lt.s32.totalorder %s195_s26, %s195_s26 }
  0x4f   :  { %p6516_p11 = scmp.ne.s32.totalorder %s195_s26, %s6515_s7  ;;  %p6521_p13 = scmp.lt.s32.totalorder %s6515_s7, %s6515_s7 }
  0x51   :  { %p6522_p0 = por %p6521_p13, %p6520_p12 }
  0x52   :  { %s41_s4 = sshll.u32 %s7962_s28, 4  ;;  %s42_s4 = int_to_ptr.vmem [resolvable:$true] %s41_s4 }
  0x53   :  { %p6523_p1 = pnand %p6522_p0, %p6516_p11 }
  0x55   :  { %6526 = shalt.err (!%p6523_p1)
}
  0x56   :  { %s7941_s30 = smov 64   ;;  %s6792_s0 = smov 4  }
  0x57   :  { %200 = dma.hbm_to_vmem [thread:$0]  %s7934_s16, 4096, %s195_s26, [#allocation25], %s7941_s30, %s7941_s30, %s6792_s0  }
  0x58   :  { %s7963_s23 = sld [smem:[#allocation44_spill]]  ;;  %s6527_s2 = scalar_lea.vmem %s42_s4, 32 }
  0x59   :  { %p6528_p2 = scmp.ne.s32.totalorder %s42_s4, %s6527_s2  ;;  %p6532_p3 = scmp.lt.s32.totalorder %s42_s4, %s42_s4 }
  0x5a   :  { %p6533_p4 = scmp.lt.s32.totalorder %s6527_s2, %s6527_s2 }
  0x5c   :  { %p6534_p5 = por %p6533_p4, %p6532_p3 }
  0x5e   :  { %s51_s22 = sshll.u32 %s7963_s23, 4  ;;  %p6535_p6 = pnand %p6534_p5, %p6528_p2  ;;  %s52_s22 = int_to_ptr.vmem [resolvable:$true] %s51_s22 }
  0x60   :  { %6538 = shalt.err (!%p6535_p6)
}
  0x61   :  { %s6793_s11 = smov [#allocation2]   ;;  %s6539_s27 = scalar_lea.vmem %s52_s22, 32 }
  0x62   :  { %44 = dma.vmem_to_smem %s42_s4, 32, %s6793_s11, [#allocation5]  }
  0x63   :  { %p6540_p7 = scmp.ne.s32.totalorder %s52_s22, %s6539_s27  ;;  %p6544_p8 = scmp.lt.s32.totalorder %s52_s22, %s52_s22 }
  0x64   :  { %p6545_p9 = scmp.lt.s32.totalorder %s6539_s27, %s6539_s27 }
  0x66   :  { %p6546_p10 = por %p6545_p9, %p6544_p8 }
  0x68   :  { %p6547_p11 = pnand %p6546_p10, %p6540_p7 }
  0x6a   :  { %6550 = shalt.err (!%p6547_p11)
}
  0x6b   :  { %s6794_s16 = smov [#allocation6]   ;;  %s6795_s26 = smov [#allocation8]  }
  0x6c   :  { %54 = dma.vmem_to_smem %s52_s22, 32, %s6794_s16, [#allocation7]  }
  0x6d   :  { %s62_s28 = sshll.u32 %s6795_s26, 4  ;;  %s6796_s7 = smov [#allocation11]   ;;  %s63_s28 = int_to_ptr.vmem [resolvable:$true] %s62_s28 }
  0x6e   :  { %s89_s14 = sshll.u32 %s6796_s7, 4  ;;  %s6559_s9 = scalar_lea.vmem %s63_s28, 1664  ;;  %s90_s14 = int_to_ptr.vmem [resolvable:$true] %s89_s14 }
  0x6f   :  { %p6560_p12 = scmp.ne.s32.totalorder %s63_s28, %s6559_s9  ;;  %p6564_p13 = scmp.lt.s32.totalorder %s63_s28, %s63_s28 }
  0x70   :  { %p6565_p0 = scmp.lt.s32.totalorder %s6559_s9, %s6559_s9 }
  0x72   :  { %p6566_p1 = por %p6565_p0, %p6564_p13 }
  0x74   :  { %p6567_p2 = pnand %p6566_p1, %p6560_p12 }
  0x76   :  { %6570 = shalt.err (!%p6567_p2)
}
  0x77   :  { %s7964_s1 = sld [smem:[#allocation46_spill]]  ;;  %s6579_s23 = scalar_lea.vmem %s90_s14, 16 }
  0x78   :  { %p6580_p3 = scmp.ne.s32.totalorder %s90_s14, %s6579_s23  ;;  %s6583_s22 = scalar_lea.vmem %s90_s14, 32 }
  0x79   :  { %p6584_p4 = scmp.lt.s32.totalorder %s90_s14, %s90_s14  ;;  %p6585_p5 = scmp.lt.s32.totalorder %s6583_s22, %s6579_s23 }
  0x7b   :  { %p6586_p6 = por %p6585_p5, %p6584_p4 }
  0x7d   :  { %68 = dma.hbm_to_vmem [thread:$0]  %s7964_s1, 1664, %s63_s28, [#allocation3], %s6781_s25, %s6781_s25, %s6782_s3  }
  0x7e   :  { %p6587_p7 = pnand %p6586_p6, %p6580_p3 }
  0x80   :  { %6590 = shalt.err (!%p6587_p7)
}
  0x81   :  { %92 = dma.hbm_to_vmem [thread:$0]  %s7924_s6, 16, %s90_s14, [#allocation10]  }
  0x82   :  { %s6797_s27 = smov [#allocation14]  }
  0x83   :  { %s108_s16 = sshll.u32 %s6797_s27, 4  ;;  %s109_s16 = int_to_ptr.vmem [resolvable:$true] %s108_s16 }
  0x84   :  { %s6599_s26 = scalar_lea.vmem %s109_s16, 6144  ;;  %p6604_p9 = scmp.lt.s32.totalorder %s109_s16, %s109_s16 }
  0x85   :  { %p6600_p8 = scmp.ne.s32.totalorder %s109_s16, %s6599_s26  ;;  %p6605_p10 = scmp.lt.s32.totalorder %s6599_s26, %s6599_s26 }
  0x87   :  { %p6606_p11 = por %p6605_p10, %p6604_p9 }
  0x89   :  { %p6607_p12 = pnand %p6606_p11, %p6600_p8 }
  0x8b   :  { %6610 = shalt.err (!%p6607_p12)
}
  0x8c   :  { %s6798_s25 = smov 192   ;;  %s6799_s3 = smov 12  }
  0x8d   :  { %114 = dma.hbm_to_vmem [thread:$0]  %s7926_s8, 6144, %s109_s16, [#allocation13], %s6798_s25, %s6798_s25, %s6799_s3  }
  0x8e   :  { %s6800_s9 = smov [#allocation17]   ;;  %s6801_s6 = smov [#allocation20]  }
  0x8f   :  { %s132_s4 = sshll.u32 %s6800_s9, 4  ;;  %s158_s14 = sshll.u32 %s6801_s6, 4  ;;  %s133_s4 = int_to_ptr.vmem [resolvable:$true] %s132_s4  ;;  %s159_s14 = int_to_ptr.vmem [resolvable:$true] %s158_s14 }
  0x90   :  { %s6619_s21 = scalar_lea.vmem %s133_s4, 2048  ;;  %p6624_p0 = scmp.lt.s32.totalorder %s133_s4, %s133_s4 }
  0x91   :  { %p6620_p13 = scmp.ne.s32.totalorder %s133_s4, %s6619_s21  ;;  %p6625_p1 = scmp.lt.s32.totalorder %s6619_s21, %s6619_s21 }
  0x93   :  { %p6626_p2 = por %p6625_p1, %p6624_p0 }
  0x95   :  { %p6627_p3 = pnand %p6626_p2, %p6620_p13 }
  0x97   :  { %6630 = shalt.err (!%p6627_p3)
}
  0x98   :  { %138 = dma.hbm_to_vmem [thread:$0]  %s7928_s10, 2048, %s133_s4, [#allocation16], %s7941_s30, %s7941_s30, %s6792_s0  }
  0x99   :  { %s6639_s8 = scalar_lea.vmem %s159_s14, 32  ;;  %p6644_p5 = scmp.lt.s32.totalorder %s159_s14, %s159_s14 }
  0x9a   :  { %p6640_p4 = scmp.ne.s32.totalorder %s159_s14, %s6639_s8  ;;  %p6645_p6 = scmp.lt.s32.totalorder %s6639_s8, %s6639_s8 }
  0x9c   :  { %p6646_p7 = por %p6645_p6, %p6644_p5 }
  0x9e   :  { %p6647_p8 = pnand %p6646_p7, %p6640_p4 }
  0xa0   :  { %6650 = shalt.err (!%p6647_p8)
}
  0xa1   :  { %164 = dma.hbm_to_vmem [thread:$0]  %s7931_s13, 32, %s159_s14, [#allocation19], %s6787_s24, %s6787_s24, %s6788_s29  }
  0xa2   :  { %s6802_s11 = smov [#allocation23]  }
  0xa3   :  { %s182_s27 = sshll.u32 %s6802_s11, 4  ;;  %s183_s27 = int_to_ptr.vmem [resolvable:$true] %s182_s27 }
  0xa4   :  { %s6659_s16 = scalar_lea.vmem %s183_s27, 64  ;;  %p6664_p10 = scmp.lt.s32.totalorder %s183_s27, %s183_s27 }
  0xa5   :  { %p6660_p9 = scmp.ne.s32.totalorder %s183_s27, %s6659_s16  ;;  %p6665_p11 = scmp.lt.s32.totalorder %s6659_s16, %s6659_s16 }
  0xa7   :  { %p6666_p12 = por %p6665_p11, %p6664_p10 }
  0xa9   :  { %p6667_p13 = pnand %p6666_p12, %p6660_p9 }
  0xab   :  { %6670 = shalt.err (!%p6667_p13)
}
  0xac   :  { %s7939_s10 = smov 32   ;;  %s6804_s0 = smov 2  }
  0xad   :  { %188 = dma.hbm_to_vmem [thread:$0]  %s7933_s15, 64, %s183_s27, [#allocation22], %s7939_s10, %s7939_s10, %s6804_s0  }
  0xae   :  { %s6805_s3 = smov [#allocation26]  }
  0xaf   :  { %s206_s13 = sshll.u32 %s6805_s3, 4  ;;  %s207_s13 = int_to_ptr.vmem [resolvable:$true] %s206_s13 }
  0xb0   :  { %s6679_s28 = scalar_lea.vmem %s207_s13, 32  ;;  %p6684_p1 = scmp.lt.s32.totalorder %s207_s13, %s207_s13 }
  0xb1   :  { %p6680_p0 = scmp.ne.s32.totalorder %s207_s13, %s6679_s28  ;;  %p6685_p2 = scmp.lt.s32.totalorder %s6679_s28, %s6679_s28 }
  0xb3   :  { %p6686_p3 = por %p6685_p2, %p6684_p1 }
  0xb5   :  { %p6687_p4 = pnand %p6686_p3, %p6680_p0 }
  0xb7   :  { %6690 = shalt.err (!%p6687_p4)
}
  0xb8   :  { %212 = dma.hbm_to_vmem [thread:$0]  %s7935_s17, 32, %s207_s13, [#allocation25], %s6787_s24, %s6787_s24, %s6788_s29  }
  0xb9   :  { %6711 = dma.done.wait [#allocation5], 32  }
  0xba   :  { %6712 = vsyncadd [#allocation5], 4294967264 }
  0xbb   :  { %6713 = dma.done.wait [#allocation7], 32  }
  0xbc   :  { %6714 = vsyncadd [#allocation7], 4294967264 }
  0xbd   :  { %6715 = dma.done.wait [#allocation3], 1664  }
  0xbe   :  { %6716 = vsyncadd [#allocation3], 4294965632 }
  0xbf   :  { %6717 = dma.done.wait [#allocation10], 1040  }
  0xc0   :  { %6718 = vsyncadd [#allocation10], 4294966256 }
  0xc1   :  { %6719 = dma.done.wait [#allocation13], 6160  }
  0xc2   :  { %6720 = vsyncadd [#allocation13], 4294961136 }
  0xc3   :  { %6721 = dma.done.wait [#allocation16], 2144  }
  0xc4   :  { %6722 = vsyncadd [#allocation16], 4294965152 }
  0xc5   :  { %6723 = dma.done.wait [#allocation19], 64  }
  0xc6   :  { %6724 = vsyncadd [#allocation19], 4294967232 }
  0xc7   :  { %6725 = dma.done.wait [#allocation22], 4160  }
  0xc8   :  { %6726 = vsyncadd [#allocation22], 4294963136 }
  0xc9   :  { %6727 = dma.done.wait [#allocation25], 4128  }
  0xca   :  { %6728 = vsyncadd [#allocation25], 4294963168 }
  0xcb   :  { %262 = sfence }
  0xcc   :  { %s264_s15 = sld [smem:[#allocation2]]  ;;  %vm704_vm0 = vcmask 1040384   ;;  %vm706_vm1 = vcmask 1041408   ;;  %vm708_vm2 = vcmask 1042432   ;;  %vm710_vm3 = vcmask 1043456  }
  0xcd   :  { %s269_s17 = sld [smem:[#allocation6]]  ;;  %vm712_vm4 = vcmask 1044480   ;;  %vm714_vm5 = vcmask 1045504   ;;  %vm716_vm6 = vcmask 1046528   ;;  %vm6808_vm7 = vmmov 0  }
  0xce   :  { %s5248_s24 = sld [smem:[#allocation2 + $0x1]]  ;;  %vm1032_vm8 = vcmask 261120   ;;  %vm1115_vm9 = vcmask 64512   ;;  %vm1715_vm10 = vcmask 523264   ;;  %vm1717_vm11 = vcmask 785408  }
  0xcf   :  { %s5254_s29 = sld [smem:[#allocation6 + $0x1]]  ;;  %vm5163_vm12 = vcmask 1041409  }
  0xd0   :  { %s6987_s4 = sld [smem:[#allocation2 + $0x2]] }
  0xd1   :  { %s5266_s14 = sld [smem:[#allocation6 + $0x2]] }
  0xd2   :  { %p265_p5 = scmp.gt.s32.totalorder %s264_s15, 0  ;;  %p5238_p6 = scmp.lt.s32.totalorder %s264_s15, 99 }
  0xd3   :  { %p270_p7 = scmp.gt.s32.totalorder %s269_s17, 0  ;;  %p5243_p8 = scmp.lt.s32.totalorder %s269_s17, 1 }
  0xd4   :  { %s266_s6 = scalar_select %p265_p5, %s264_s15, 0 }
  0xd5   :  { %s8011_s17 = smov (!%p270_p7, %s269_s17), 0  ;;  %p274_p9 = scmp.ne.s32.totalorder %s264_s15, 1 }
  0xd6   :  { %s8013_s6 = smov (!%p5238_p6, %s266_s6), 99  ;;  %s8015_s17 = smov (!%p5243_p8, %s8011_s17), 1 }
  0xd7   :  { %p289_p10 = scmp.gt.s32.totalorder %s5248_s24, 0  ;;  %p5249_p11 = scmp.lt.s32.totalorder %s5248_s24, 99 }
  0xd8   :  { %s6993_s21 = scalar_select %p274_p9, 1, 0 }
  0xd9   :  { %s290_s1 = scalar_select %p289_p10, %s5248_s24, 0 }
  0xda   :  { %p294_p12 = scmp.gt.s32.totalorder %s5254_s29, 0  ;;  %p5255_p13 = scmp.lt.s32.totalorder %s5254_s29, 1 }
  0xdb   :  { %p298_p0 = scmp.ne.s32.totalorder %s5248_s24, 1  ;;  %s8017_s1 = smov (!%p5249_p11, %s290_s1), 99 }
  0xdc   :  { %p314_p1 = scmp.gt.s32.totalorder %s6987_s4, 0  ;;  %s8019_s29 = smov (!%p294_p12, %s5254_s29), 0 }
  0xdd   :  { %s7000_s8 = scalar_select %p298_p0, 1, 0 }
  0xde   :  { %s8021_s29 = smov (!%p5255_p13, %s8019_s29), 1  ;;  %p5261_p2 = scmp.lt.s32.totalorder %s6987_s4, 99 }
  0xdf   :  { %s7006_s22 = sadd.s32 %s7000_s8, %s6993_s21  ;;  %p319_p3 = scmp.gt.s32.totalorder %s5266_s14, 0 }
  0xe0   :  { %s315_s0 = scalar_select %p314_p1, %s6987_s4, 0 }
  0xe1   :  { %p5267_p4 = scmp.lt.s32.totalorder %s5266_s14, 1  ;;  %p323_p5 = scmp.ne.s32.totalorder %s6987_s4, 1 }
  0xe2   :  { %s8023_s0 = smov (!%p5261_p2, %s315_s0), 99  ;;  %s8025_s14 = smov (!%p319_p3, %s5266_s14), 0 }
  0xe3   :  { %s7019_s26 = scalar_select %p323_p5, 1, 0 }
  0xe4   :  { %s8027_s14 = smov (!%p5267_p4, %s8025_s14), 1  ;;  %s5272_s13 = sld [smem:[#allocation2 + $0x3]] }
  0xe5   :  { %s7025_s25 = sadd.s32 %s7019_s26, %s7006_s22  ;;  %s5278_s28 = sld [smem:[#allocation6 + $0x3]] }
  0xe6   :  { %s5284_s24 = sld [smem:[#allocation2 + $0x4]] }
  0xe7   :  { %s5290_s10 = sld [smem:[#allocation6 + $0x4]] }
  0xe8   :  { %s7037_s30 = sld [smem:[#allocation2 + $0x5]] }
  0xe9   :  { %s7077_s20 = sld [smem:[#allocation2 + $0x6]] }
  0xea   :  { %p339_p6 = scmp.gt.s32.totalorder %s5272_s13, 0  ;;  %p5273_p7 = scmp.lt.s32.totalorder %s5272_s13, 99 }
  0xeb   :  { %p344_p8 = scmp.gt.s32.totalorder %s5278_s28, 0  ;;  %p5279_p9 = scmp.lt.s32.totalorder %s5278_s28, 1 }
  0xec   :  { %s340_s27 = scalar_select %p339_p6, %s5272_s13, 0 }
  0xed   :  { %s8029_s28 = smov (!%p344_p8, %s5278_s28), 0  ;;  %p348_p10 = scmp.ne.s32.totalorder %s5272_s13, 1 }
  0xee   :  { %s8031_s27 = smov (!%p5273_p7, %s340_s27), 99  ;;  %s8033_s28 = smov (!%p5279_p9, %s8029_s28), 1 }
  0xef   :  { %7965 = sst [smem:[#allocation38_spill]] %s8033_s28  ;;  %p364_p11 = scmp.gt.s32.totalorder %s5284_s24, 0 }
  0xf0   :  { %s7047_s2 = scalar_select %p348_p10, 1, 0 }
  0xf1   :  { %s365_s11 = scalar_select %p364_p11, %s5284_s24, 0 }
  0xf2   :  { %s7051_s15 = sadd.s32 %s7047_s2, %s7025_s25  ;;  %p5285_p12 = scmp.lt.s32.totalorder %s5284_s24, 99 }
  0xf3   :  { %p369_p13 = scmp.gt.s32.totalorder %s5290_s10, 0  ;;  %p5291_p0 = scmp.lt.s32.totalorder %s5290_s10, 1 }
  0xf4   :  { %s8035_s11 = smov (!%p5285_p12, %s365_s11), 99  ;;  %p373_p1 = scmp.ne.s32.totalorder %s5284_s24, 1 }
  0xf5   :  { %s8037_s10 = smov (!%p369_p13, %s5290_s10), 0  ;;  %p389_p2 = scmp.gt.s32.totalorder %s7037_s30, 0 }
  0xf6   :  { %s8039_s10 = smov (!%p5291_p0, %s8037_s10), 1  ;;  %p5297_p3 = scmp.lt.s32.totalorder %s7037_s30, 99 }
  0xf7   :  { %7966 = sst [smem:[#allocation39_spill]] %s8039_s10  ;;  %p398_p4 = scmp.ne.s32.totalorder %s7037_s30, 1 }
  0xf8   :  { %s7059_s13 = scalar_select %p373_p1, 1, 0 }
  0xf9   :  { %s390_s16 = scalar_select %p389_p2, %s7037_s30, 0 }
  0xfa   :  { %7967 = sst [smem:[#allocation40_spill]] %s7059_s13  ;;  %s7067_s3 = sadd.s32 %s7059_s13, %s7051_s15 }
  0xfb   :  { %s5302_s24 = sld [smem:[#allocation6 + $0x5]]  ;;  %s8041_s16 = smov (!%p5297_p3, %s390_s16), 99 }
  0xfc   :  { %7968 = sst [smem:[#allocation41_spill]] %s8041_s16  ;;  %p414_p7 = scmp.gt.s32.totalorder %s7077_s20, 0 }
  0xfd   :  { %s7079_s7 = scalar_select %p398_p4, 1, 0 }
  0xfe   :  { %s7085_s4 = sld [smem:[#allocation6 + $0x6]]  ;;  %p5309_p8 = scmp.lt.s32.totalorder %s7077_s20, 99 }
  0xff   :  { %7969 = sst [smem:[#allocation42_spill]] %s7079_s7  ;;  %s7083_s9 = sadd.s32 %s7079_s7, %s7067_s3 }
 0x100   :  { %s7089_s23 = sld [smem:[#allocation2 + $0x7]]  ;;  %s305_s10 = scalar_lea.vmem [#allocation8], %s8017_s1 }
 0x101   :  { %p394_p5 = scmp.gt.s32.totalorder %s5302_s24, 0  ;;  %p5303_p6 = scmp.lt.s32.totalorder %s5302_s24, 1  ;;  %v306_v0 = vld [vmem:[%s305_s10] sm:$0x1] }
 0x102   :  { %s7970_s30 = smul.u32 %s7006_s22, %s7000_s8  ;;  %s330_s28 = scalar_lea.vmem [#allocation8], %s8023_s0 }
 0x103   :  { %s8043_s24 = smov (!%p394_p5, %s5302_s24), 0  ;;  %v331_v2 = vld [vmem:[%s330_s28] sm:$0x1]  ;;  %s7971_s13 = smul.u32 %s7025_s25, %s7019_s26 }
 0x104   :  { %s8045_s24 = smov (!%p5303_p6, %s8043_s24), 1  ;;  %p419_p9 = scmp.gt.s32.totalorder %s7085_s4, 0 }
 0x105   :  { %s6731_s7 = scalar_lea.vmem [#allocation9], %s7970_s30  ;;  %s6734_s18 = scalar_lea.vmem [#allocation9], %s7971_s13 }
 0x106   :  { %v6733_v1 = vld [vmem:[%s6731_s7 + $0x1] sm:$0x1]  ;;  %s415_s16 = scalar_select %p414_p7, %s7077_s20, 0 }
 0x107   :  { %v6736_v3 = vld [vmem:[%s6734_s18 + $0x1] sm:$0x1]  ;;  %s420_s19 = scalar_select %p419_p9, %s7085_s4, 0  ;;  %v309_v7 = vadd.f32 %v6733_v1, %v306_v0 }
 0x108   :  { %s280_s1 = scalar_lea.vmem [#allocation8], %s8013_s6  ;;  %s7972_s10 = smul.u32 %s6993_s21, %s6993_s21  ;;  %v334_v8 = vadd.f32 %v6736_v3, %v331_v2 }
 0x109   :  { %v281_v4 = vld [vmem:[%s280_s1] sm:$0x1]  ;;  %s7973_s7 = scalar_lea.vmem %s7923_s5, %s8021_s29  ;;  %s8047_s16 = smov (!%p5309_p8, %s415_s16), 99 }
 0x10a   :  { %s6737_s12 = scalar_lea.vmem [#allocation9], %s7972_s10  ;;  %v311_v6 = vld [vmem:[%s7973_s7] sm:$0x1]  ;;  %p5315_p10 = scmp.lt.s32.totalorder %s7085_s4, 1 }
 0x10b   :  { %v6739_v5 = vld [vmem:[%s6737_s12 + $0x1] sm:$0x1]  ;;  %p423_p11 = scmp.ne.s32.totalorder %s7077_s20, 1  ;;  %p439_p12 = scmp.gt.s32.totalorder %s7089_s23, 0  ;;  %v312_v12 = vadd.f32 %v311_v6, %v309_v7 }
 0x10c   :  { %s8049_s19 = smov (!%p5315_p10, %s420_s19), 1  ;;  %s355_s12 = scalar_lea.vmem [#allocation8], %s8031_s27  ;;  %v284_v11 = vadd.f32 %v6739_v5, %v281_v4 }
 0x10d   :  { %s7974_s29 = sld [smem:[#allocation40_spill]]  ;;  %v356_v9 = vld [vmem:[%s355_s12] sm:$0x1]  ;;  %s7975_s6 = smul.u32 %s7051_s15, %s7047_s2  ;;  %v663_v21 = vrot.slane %v312_v12, 7 }
 0x10e   :  { %s7132_s0 = scalar_select %p423_p11, 1, 0 }
 0x10f   :  { %s6740_s21 = scalar_lea.vmem [#allocation9], %s7975_s6  ;;  %s7976_s20 = sld [smem:[#allocation38_spill]] }
 0x110   :  { %v6742_v10 = vld [vmem:[%s6740_s21 + $0x1] sm:$0x1]  ;;  %s7977_s28 = scalar_lea.vmem %s7923_s5, %s8027_s14  ;;  %s435_s15 = scalar_lea.vmem %s7923_s5, %s8049_s19 }
 0x111   :  { %v336_v13 = vld [vmem:[%s7977_s28] sm:$0x1]  ;;  %p5321_p13 = scmp.lt.s32.totalorder %s7089_s23, 99  ;;  %s7978_s30 = scalar_lea.vmem %s7923_s5, %s8015_s17  ;;  %v359_v15 = vadd.f32 %v6742_v10, %v356_v9 }
 0x112   :  { %v286_v14 = vld [vmem:[%s7978_s30] sm:$0x1]  ;;  %s7151_s18 = sadd.s32 %s7132_s0, %s7083_s9  ;;  %s7153_s1 = sld [smem:[#allocation6 + $0x7]]  ;;  %v337_v18 = vadd.f32 %v336_v13, %v334_v8 }
 0x113   :  { %s7979_s10 = sld [smem:[#allocation41_spill]]  ;;  %s380_s14 = scalar_lea.vmem [#allocation8], %s8035_s11  ;;  %v287_v20 = vadd.f32 %v286_v14, %v284_v11  ;;  %v436_v38 = vld [vmem:[%s435_s15] sm:$0x1] }
 0x114   :  { %s7980_s8 = sld [smem:[#allocation42_spill]]  ;;  %v381_v16 = vld [vmem:[%s380_s14] sm:$0x1]  ;;  %s7981_s22 = smul.u32 %s7067_s3, %s7974_s29  ;;  %v666_v27 = vrot.slane %v337_v18, 6 }
 0x115   :  { %s7982_s12 = sld [smem:[#allocation39_spill]]  ;;  %s426_s6 = smul.u32 %s7151_s18, %s7132_s0  ;;  %v705_v31 = vsel %vm704_vm0, %v287_v20, %v663_v21 }
 0x116   :  { %s6743_s7 = scalar_lea.vmem [#allocation9], %s7981_s22  ;;  %p448_p0 = scmp.ne.s32.totalorder %s7089_s23, 1  ;;  %v707_v36 = vsel %vm706_vm1, %v705_v31, %v666_v27 }
 0x117   :  { %v6745_v17 = vld [vmem:[%s6743_s7 + $0x1] sm:$0x1]  ;;  %s7983_s26 = scalar_lea.vmem %s7923_s5, %s7976_s20  ;;  %s7170_s3 = sld [smem:[#allocation2 + $0x80]] }
 0x118   :  { %v361_v19 = vld [vmem:[%s7983_s26] sm:$0x1]  ;;  %s440_s25 = scalar_select %p439_p12, %s7089_s23, 0  ;;  %v384_v22 = vadd.f32 %v6745_v17, %v381_v16 }
 0x119   :  { %s405_s11 = scalar_lea.vmem [#allocation8], %s7979_s10  ;;  %v362_v25 = vadd.f32 %v361_v19, %v359_v15  ;;  %p444_p1 = scmp.gt.s32.totalorder %s7153_s1, 0 }
 0x11a   :  { %v406_v23 = vld [vmem:[%s405_s11] sm:$0x1]  ;;  %s7984_s29 = smul.u32 %s7083_s9, %s7980_s8  ;;  %s8051_s25 = smov (!%p5321_p13, %s440_s25), 99 }
 0x11b   :  { %s7985_s27 = scalar_lea.vmem %s7923_s5, %s7982_s12  ;;  %s430_s4 = scalar_lea.vmem [#allocation8], %s8047_s16  ;;  %v669_v34 = vrot.slane %v362_v25, 5 }
 0x11c   :  { %s6746_s0 = scalar_lea.vmem [#allocation9], %s7984_s29  ;;  %v386_v26 = vld [vmem:[%s7985_s27] sm:$0x1]  ;;  %s6749_s9 = scalar_lea.vmem [#allocation9], %s426_s6 }
 0x11d   :  { %v6748_v24 = vld [vmem:[%s6746_s0 + $0x1] sm:$0x1]  ;;  %v431_v29 = vld [vmem:[%s430_s4] sm:$0x1]  ;;  %p5327_p2 = scmp.lt.s32.totalorder %s7153_s1, 1  ;;  %v387_v32 = vadd.f32 %v386_v26, %v384_v22  ;;  %s7986_s30 = scalar_lea.vmem %s7923_s5, %s8045_s24  ;;  %v709_v40 = vsel %vm708_vm2, %v707_v36, %v669_v34 }
 0x11e   :  { %v409_v28 = vadd.f32 %v6748_v24, %v406_v23  ;;  %v6751_v30 = vld [vmem:[%s6749_s9 + $0x1] sm:$0x1]  ;;  %v411_v33 = vld [vmem:[%s7986_s30] sm:$0x1]  ;;  %s8053_s1 = smov (!%p444_p1, %s7153_s1), 0  ;;  %p464_p3 = scmp.gt.s32.totalorder %s7170_s3, 0 }
 0x11f   :  { %s449_s10 = scalar_select %p448_p0, 1, 0  ;;  %v434_v35 = vadd.f32 %v6751_v30, %v431_v29  ;;  %v672_v39 = vrot.slane %v387_v32, 4 }
 0x120   :  { %s8055_s1 = smov (!%p5327_p2, %s8053_s1), 1  ;;  %v412_v37 = vadd.f32 %v411_v33, %v409_v28  ;;  %p5333_p4 = scmp.lt.s32.totalorder %s7170_s3, 99 }
 0x121   :  { %s450_s24 = sadd.s32 %s449_s10, %s7151_s18  ;;  %s460_s7 = scalar_lea.vmem %s7923_s5, %s8055_s1  ;;  %v437_v41 = vadd.f32 %v436_v38, %v434_v35  ;;  %v711_v44 = vsel %vm710_vm3, %v709_v40, %v672_v39 }
 0x122   :  { %s451_s8 = smul.u32 %s450_s24, %s449_s10  ;;  %v675_v42 = vrot.slane %v412_v37, 3  ;;  %s455_s6 = scalar_lea.vmem [#allocation8], %s8051_s25  ;;  %v461_v46 = vld [vmem:[%s460_s7] sm:$0x1] }
 0x123   :  { %s465_s12 = scalar_select %p464_p3, %s7170_s3, 0  ;;  %v456_v43 = vld [vmem:[%s455_s6] sm:$0x1]  ;;  %v678_v47 = vrot.slane %v437_v41, 2 }
 0x124   :  { %s5338_s19 = sld [smem:[#allocation6 + $0x80]]  ;;  %s6752_s15 = scalar_lea.vmem [#allocation9], %s451_s8  ;;  %v713_v49 = vsel %vm712_vm4, %v711_v44, %v675_v42  ;;  %v6131_v44 = vld [vmem:[#allocation14 + $0xac] ss:$12 sps:$4 sm:$0xff]  }
 0x125   :  { %v6754_v45 = vld [vmem:[%s6752_s15 + $0x1] sm:$0x1]  ;;  %p473_p5 = scmp.ne.s32.totalorder %s7170_s3, 1  ;;  %s8057_s12 = smov (!%p5333_p4, %s465_s12), 99  ;;  %v715_v51 = vsel %vm714_vm5, %v713_v49, %v678_v47  ;;  %v6134_v47 = vld [vmem:[#allocation14 + $0xb0] ss:$12 sps:$4 sm:$0xff]   ;;  %948 = vmatprep.subr.bf16.mxu0 %v6131_v44 }
 0x126   :  { %v459_v48 = vadd.f32 %v6754_v45, %v456_v43  ;;  %s5344_s1 = sld [smem:[#allocation2 + $0x81]]  ;;  %v6133_v45 = vld [vmem:[#allocation14 + $0xa8] ss:$12 sps:$4 sm:$0xff]  }
 0x127   :  { %s7219_s18 = scalar_select %p473_p5, 1, 0  ;;  %949 = vmatpush1.bf16.msra.mxu0 %v6133_v45 }
 0x128   :  { %v462_v50 = vadd.f32 %v461_v46, %v459_v48  ;;  %s5350_s21 = sld [smem:[#allocation6 + $0x81]]  ;;  %v6806_v46 = vmov 0.0  }
 0x129   :  { %s5356_s26 = sld [smem:[#allocation2 + $0x82]]  ;;  %5829 = vmatprep.subr.bf16.mxu1 %v6806_v46  ;;  %5845 = vmatprep.mubr.msk.bf16.mxu1 %vm6808_vm7, %v6806_v46 }
 0x12a   :  { %v681_v52 = vrot.slane %v462_v50, 1  ;;  %p469_p6 = scmp.gt.s32.totalorder %s5338_s19, 0  ;;  %p5339_p7 = scmp.lt.s32.totalorder %s5338_s19, 1  ;;  %5830 = vmatpush3.bf16.msra.mxu1 %v6134_v47 }
 0x12b   :  { %s5362_s25 = sld [smem:[#allocation6 + $0x82]]  ;;  %5831 = vmatprep.subr.bf16.mxu1 %v6806_v46 }
 0x12c   :  { %v7225_v53 = vsel %vm716_vm6, %v715_v51, %v681_v52  ;;  %s8059_s19 = smov (!%p469_p6, %s5338_s19), 0  ;;  %p488_p8 = scmp.gt.s32.totalorder %s5344_s1, 0  ;;  %v6135_v52 = vld [vmem:[#allocation14 + $0x94] ss:$12 sps:$4 sm:$0xff]  }
 0x12d   :  { %727 = vadd.xlane.f32.xlu0 %v7225_v53  ;;  %s8061_s19 = smov (!%p5339_p7, %s8059_s19), 1  ;;  %p5345_p9 = scmp.lt.s32.totalorder %s5344_s1, 99  ;;  %950 = vmatprep.subr.bf16.mxu0 %v6135_v52 }
 0x12e   :  { %s489_s3 = scalar_select %p488_p8, %s5344_s1, 0 }
 0x12f   :  { %p493_p10 = scmp.gt.s32.totalorder %s5350_s21, 0  ;;  %p5351_p11 = scmp.lt.s32.totalorder %s5350_s21, 1 }
 0x130   :  { %s8063_s3 = smov (!%p5345_p9, %s489_s3), 99  ;;  %p497_p12 = scmp.ne.s32.totalorder %s5344_s1, 1 }
 0x131   :  { %s8065_s21 = smov (!%p493_p10, %s5350_s21), 0  ;;  %p513_p13 = scmp.gt.s32.totalorder %s5356_s26, 0 }
 0x132   :  { %s8067_s21 = smov (!%p5351_p11, %s8065_s21), 1  ;;  %p5357_p0 = scmp.lt.s32.totalorder %s5356_s26, 99 }
 0x133   :  { %s7234_s11 = scalar_select %p497_p12, 1, 0 }
 0x134   :  { %p518_p1 = scmp.gt.s32.totalorder %s5362_s25, 0  ;;  %p5363_p2 = scmp.lt.s32.totalorder %s5362_s25, 1 }
 0x135   :  { %s7238_s29 = sadd.s32 %s7234_s11, %s7219_s18  ;;  %p522_p3 = scmp.ne.s32.totalorder %s5356_s26, 1 }
 0x136   :  { %s500_s0 = smul.u32 %s7238_s29, %s7234_s11  ;;  %s8071_s25 = smov (!%p518_p1, %s5362_s25), 0 }
 0x137   :  { %s514_s20 = scalar_select %p513_p13, %s5356_s26, 0 }
 0x138   :  { %s7244_s28 = scalar_select %p522_p3, 1, 0 }
 0x139   :  { %s8069_s20 = smov (!%p5357_p0, %s514_s20), 99  ;;  %s8073_s25 = smov (!%p5363_p2, %s8071_s25), 1 }
 0x13a   :  { %s7250_s27 = sadd.s32 %s7244_s28, %s7238_s29  ;;  %s5368_s30 = sld [smem:[#allocation2 + $0x83]] }
 0x13b   :  { %s5374_s10 = sld [smem:[#allocation6 + $0x83]]  ;;  %s504_s23 = scalar_lea.vmem [#allocation8], %s8063_s3 }
 0x13c   :  { %s5380_s8 = sld [smem:[#allocation2 + $0x84]]  ;;  %v505_v54 = vld [vmem:[%s504_s23] sm:$0x1]  ;;  %s6755_s13 = scalar_lea.vmem [#allocation9], %s500_s0 }
 0x13d   :  { %s5386_s6 = sld [smem:[#allocation6 + $0x84]]  ;;  %v6757_v55 = vld [vmem:[%s6755_s13 + $0x1] sm:$0x1]  ;;  %s529_s3 = scalar_lea.vmem [#allocation8], %s8069_s20 }
 0x13e   :  { %s5392_s1 = sld [smem:[#allocation2 + $0x85]]  ;;  %v508_v57 = vadd.f32 %v6757_v55, %v505_v54  ;;  %v530_v58 = vld [vmem:[%s529_s3] sm:$0x1]  ;;  %s7991_s11 = smul.u32 %s7219_s18, %s7219_s18  ;;  %v6137_v54 = vld [vmem:[#allocation14 + $0x90] ss:$12 sps:$4 sm:$0xff]  }
 0x13f   :  { %s7300_s24 = sld [smem:[#allocation2 + $0x86]]  ;;  %s7992_s0 = scalar_lea.vmem %s7923_s5, %s8067_s21  ;;  %v6138_v55 = vld [vmem:[#allocation14 + $0x98] ss:$12 sps:$4 sm:$0xff]   ;;  %951 = vmatpush1.bf16.msra.mxu0 %v6137_v54 }
 0x140   :  { %p538_p4 = scmp.gt.s32.totalorder %s5368_s30, 0  ;;  %p5369_p5 = scmp.lt.s32.totalorder %s5368_s30, 99  ;;  %v510_v61 = vld [vmem:[%s7992_s0] sm:$0x1]  ;;  %5832 = vmatpush3.bf16.msra.mxu1 %v6138_v55 }
 0x141   :  { %p543_p6 = scmp.gt.s32.totalorder %s5374_s10, 0  ;;  %p5375_p7 = scmp.lt.s32.totalorder %s5374_s10, 1  ;;  %v511_v2 = vadd.f32 %v510_v61, %v508_v57  ;;  %5833 = vmatprep.subr.bf16.mxu1 %v6806_v46  ;;  %v6142_v61 = vld [vmem:[#allocation14 + $0x80] ss:$12 sps:$4 sm:$0xff]  }
 0x142   :  { %s539_s15 = scalar_select %p538_p4, %s5368_s30, 0 }
 0x143   :  { %s8075_s10 = smov (!%p543_p6, %s5374_s10), 0  ;;  %p547_p8 = scmp.ne.s32.totalorder %s5368_s30, 1  ;;  %v684_v11 = vrot.slane %v511_v2, 7  ;;  %v6149_v2 = vld [vmem:[#allocation14 + $0x48] ss:$12 sps:$4 sm:$0xff]  }
 0x144   :  { %s8077_s15 = smov (!%p5369_p5, %s539_s15), 99  ;;  %s8079_s10 = smov (!%p5375_p7, %s8075_s10), 1  ;;  %5834 = vmatpush3.bf16.msra.mxu1 %v6142_v61 }
 0x145   :  { %p563_p9 = scmp.gt.s32.totalorder %s5380_s8, 0  ;;  %p5381_p10 = scmp.lt.s32.totalorder %s5380_s8, 99  ;;  %5835 = vmatprep.subr.bf16.mxu1 %v6806_v46 }
 0x146   :  { %s7270_s26 = scalar_select %p547_p8, 1, 0 }
 0x147   :  { %s564_s4 = scalar_select %p563_p9, %s5380_s8, 0 }
 0x148   :  { %s7274_s9 = sadd.s32 %s7270_s26, %s7250_s27  ;;  %p568_p11 = scmp.gt.s32.totalorder %s5386_s6, 0 }
 0x149   :  { %s8081_s4 = smov (!%p5381_p10, %s564_s4), 99  ;;  %p5387_p12 = scmp.lt.s32.totalorder %s5386_s6, 1 }
 0x14a   :  { %s8083_s6 = smov (!%p568_p11, %s5386_s6), 0  ;;  %p572_p13 = scmp.ne.s32.totalorder %s5380_s8, 1 }
 0x14b   :  { %s8085_s6 = smov (!%p5387_p12, %s8083_s6), 1  ;;  %p588_p0 = scmp.gt.s32.totalorder %s5392_s1, 0 }
 0x14c   :  { %s7284_s22 = scalar_select %p572_p13, 1, 0 }
 0x14d   :  { %7987 = sst [smem:[#allocation40_spill]] %s8085_s6  ;;  %p5393_p1 = scmp.lt.s32.totalorder %s5392_s1, 99 }
 0x14e   :  { %s7290_s2 = sadd.s32 %s7284_s22, %s7274_s9  ;;  %s5398_s8 = sld [smem:[#allocation6 + $0x85]] }
 0x14f   :  { %s589_s16 = scalar_select %p588_p0, %s5392_s1, 0 }
 0x150   :  { %p597_p2 = scmp.ne.s32.totalorder %s5392_s1, 1  ;;  %s7308_s1 = sld [smem:[#allocation6 + $0x86]] }
 0x151   :  { %s8087_s16 = smov (!%p5393_p1, %s589_s16), 99  ;;  %p613_p5 = scmp.gt.s32.totalorder %s7300_s24, 0 }
 0x152   :  { %7988 = sst [smem:[#allocation38_spill]] %s8087_s16  ;;  %p5405_p6 = scmp.lt.s32.totalorder %s7300_s24, 99 }
 0x153   :  { %s7302_s17 = scalar_select %p597_p2, 1, 0 }
 0x154   :  { %p593_p3 = scmp.gt.s32.totalorder %s5398_s8, 0  ;;  %p5399_p4 = scmp.lt.s32.totalorder %s5398_s8, 1 }
 0x155   :  { %7989 = sst [smem:[#allocation41_spill]] %s7302_s17  ;;  %s7306_s7 = sadd.s32 %s7302_s17, %s7290_s2 }
 0x156   :  { %s8089_s8 = smov (!%p593_p3, %s5398_s8), 0  ;;  %p618_p7 = scmp.gt.s32.totalorder %s7308_s1, 0 }
 0x157   :  { %s8091_s8 = smov (!%p5399_p4, %s8089_s8), 1  ;;  %s7317_s14 = sld [smem:[#allocation2 + $0x87]] }
 0x158   :  { %s614_s30 = scalar_select %p613_p5, %s7300_s24, 0 }
 0x159   :  { %s619_s6 = scalar_select %p618_p7, %s7308_s1, 0 }
 0x15a   :  { %s479_s17 = scalar_lea.vmem [#allocation8], %s8057_s12  ;;  %s8093_s30 = smov (!%p5405_p6, %s614_s30), 99 }
 0x15b   :  { %v480_v56 = vld [vmem:[%s479_s17] sm:$0x1]  ;;  %s7990_s16 = smul.u32 %s7250_s27, %s7244_s28  ;;  %p5411_p8 = scmp.lt.s32.totalorder %s7308_s1, 1 }
 0x15c   :  { %p622_p9 = scmp.ne.s32.totalorder %s7300_s24, 1  ;;  %s6761_s29 = scalar_lea.vmem [#allocation9], %s7991_s11 }
 0x15d   :  { %s6758_s23 = scalar_lea.vmem [#allocation9], %s7990_s16  ;;  %v6763_v60 = vld [vmem:[%s6761_s29 + $0x1] sm:$0x1]  ;;  %s609_s28 = scalar_lea.vmem %s7923_s5, %s8091_s8 }
 0x15e   :  { %v6760_v59 = vld [vmem:[%s6758_s23 + $0x1] sm:$0x1]  ;;  %p638_p10 = scmp.gt.s32.totalorder %s7317_s14, 0  ;;  %s554_s27 = scalar_lea.vmem [#allocation8], %s8077_s15  ;;  %v483_v1 = vadd.f32 %v6763_v60, %v480_v56  ;;  %v610_v23 = vld [vmem:[%s609_s28] sm:$0x1] }
 0x15f   :  { %v533_v62 = vadd.f32 %v6760_v59, %v530_v58  ;;  %v555_v63 = vld [vmem:[%s554_s27] sm:$0x1]  ;;  %s7993_s18 = smul.u32 %s7274_s9, %s7270_s26  ;;  %s7994_s23 = scalar_lea.vmem %s7923_s5, %s8073_s25  ;;  %v6139_v60 = vld [vmem:[#allocation14 + $0x7c] ss:$12 sps:$4 sm:$0xff]  }
 0x160   :  { %s7351_s16 = scalar_select %p622_p9, 1, 0  ;;  %v535_v3 = vld [vmem:[%s7994_s23] sm:$0x1]  ;;  %952 = vmatprep.subr.bf16.mxu0 %v6139_v60 }
 0x161   :  { %s6764_s24 = scalar_lea.vmem [#allocation9], %s7993_s18  ;;  %s8095_s6 = smov (!%p5411_p8, %s619_s6), 1  ;;  %v536_v8 = vadd.f32 %v535_v3, %v533_v62  ;;  %v6143_v62 = vld [vmem:[#allocation14 + $0x64] ss:$12 sps:$4 sm:$0xff]  }
 0x162   :  { %v6766_v0 = vld [vmem:[%s6764_s24 + $0x1] sm:$0x1]  ;;  %s7995_s9 = scalar_lea.vmem %s7923_s5, %s8061_s19  ;;  %s7369_s11 = sadd.s32 %s7351_s16, %s7306_s7  ;;  %v6150_v3 = vld [vmem:[#allocation14 + $0x50] ss:$12 sps:$4 sm:$0xff]  }
 0x163   :  { %v485_v4 = vld [vmem:[%s7995_s9] sm:$0x1]  ;;  %s7996_s29 = sld [smem:[#allocation38_spill]]  ;;  %v558_v5 = vadd.f32 %v6766_v0, %v555_v63  ;;  %s579_s25 = scalar_lea.vmem [#allocation8], %s8081_s4  ;;  %v687_v17 = vrot.slane %v536_v8, 6 }
 0x164   :  { %s7371_s12 = sld [smem:[#allocation6 + $0x87]]  ;;  %v580_v6 = vld [vmem:[%s579_s25] sm:$0x1]  ;;  %s7998_s1 = smul.u32 %s7290_s2, %s7284_s22  ;;  %v486_v10 = vadd.f32 %v485_v4, %v483_v1  ;;  %v6145_v63 = vld [vmem:[#allocation14 + $0x60] ss:$12 sps:$4 sm:$0xff]  }
 0x165   :  { %s7997_s17 = sld [smem:[#allocation41_spill]]  ;;  %s625_s20 = smul.u32 %s7369_s11, %s7351_s16  ;;  %v6146_v0 = vld [vmem:[#allocation14 + $0x68] ss:$12 sps:$4 sm:$0xff]   ;;  %v6147_v1 = vld [vmem:[#allocation14 + $0x4c] ss:$12 sps:$4 sm:$0xff]  }
 0x166   :  { %s6767_s0 = scalar_lea.vmem [#allocation9], %s7998_s1  ;;  %s7999_s13 = sld [smem:[#allocation40_spill]]  ;;  %v718_v21 = vsel %vm704_vm0, %v486_v10, %v684_v11  ;;  %5836 = vmatpush3.bf16.msra.mxu1 %v6146_v0  ;;  %v6151_v4 = vld [vmem:[#allocation14 + $0x34] ss:$12 sps:$4 sm:$0xff]   ;;  %v6155_v8 = vld [vmem:[#allocation14 + $0x1c] ss:$12 sps:$4 sm:$0xff]  }
 0x167   :  { %v6769_v7 = vld [vmem:[%s6767_s0 + $0x1] sm:$0x1]  ;;  %p5417_p11 = scmp.lt.s32.totalorder %s7317_s14, 99  ;;  %s8000_s18 = scalar_lea.vmem %s7923_s5, %s8079_s10  ;;  %v719_v26 = vsel %vm706_vm1, %v718_v21, %v687_v17  ;;  %5837 = vmatprep.subr.bf16.mxu1 %v6806_v46  ;;  %v6158_v10 = vld [vmem:[#allocation14 + $0x20] ss:$12 sps:$4 sm:$0xff]  }
 0x168   :  { %v560_v9 = vld [vmem:[%s8000_s18] sm:$0x1]  ;;  %s639_s24 = scalar_select %p638_p10, %s7317_s14, 0  ;;  %v583_v12 = vadd.f32 %v6769_v7, %v580_v6  ;;  %v6153_v6 = vld [vmem:[#allocation14 + $0x30] ss:$12 sps:$4 sm:$0xff]  }
 0x169   :  { %p647_p12 = scmp.ne.s32.totalorder %s7317_s14, 1  ;;  %s604_s2 = scalar_lea.vmem [#allocation8], %s7996_s29  ;;  %v561_v15 = vadd.f32 %v560_v9, %v558_v5  ;;  %v6807_v5 = vmov 0   ;;  %v6154_v7 = vld [vmem:[#allocation14 + $0x38] ss:$12 sps:$4 sm:$0xff]  }
 0x16a   :  { %v605_v13 = vld [vmem:[%s604_s2] sm:$0x1]  ;;  %s8097_s24 = smov (!%p5417_p11, %s639_s24), 99  ;;  %p643_p13 = scmp.gt.s32.totalorder %s7371_s12, 0  ;;  %980 = vmatprep.mubr.bf16.mxu0 %v6807_v5  ;;  %5838 = vmatpush3.bf16.msra.mxu1 %v6150_v3  ;;  %v6157_v9 = vld [vmem:[#allocation14 + $0x18] ss:$12 sps:$4 sm:$0xff]  }
 0x16b   :  { %s8001_s4 = smul.u32 %s7306_s7, %s7997_s17  ;;  %s629_s3 = scalar_lea.vmem [#allocation8], %s8093_s30  ;;  %v690_v24 = vrot.slane %v561_v15, 5  ;;  %5839 = vmatprep.subr.bf16.mxu1 %v6806_v46  ;;  %v6159_v11 = vld [vmem:[#allocation14 + $0x4] ss:$12 sps:$4 sm:$0xff]  }
 0x16c   :  { %s8002_s21 = scalar_lea.vmem %s7923_s5, %s7999_s13  ;;  %v630_v19 = vld [vmem:[%s629_s3] sm:$0x1]  ;;  %s6773_s7 = scalar_lea.vmem [#allocation9], %s625_s20 }
 0x16d   :  { %s6770_s22 = scalar_lea.vmem [#allocation9], %s8001_s4  ;;  %v585_v16 = vld [vmem:[%s8002_s21] sm:$0x1]  ;;  %v6775_v20 = vld [vmem:[%s6773_s7 + $0x1] sm:$0x1]  ;;  %s634_s26 = scalar_lea.vmem %s7923_s5, %s8095_s6  ;;  %v720_v30 = vsel %vm708_vm2, %v719_v26, %v690_v24 }
 0x16e   :  { %v6772_v14 = vld [vmem:[%s6770_s22 + $0x1] sm:$0x1]  ;;  %p5423_p0 = scmp.lt.s32.totalorder %s7371_s12, 1  ;;  %v586_v22 = vadd.f32 %v585_v16, %v583_v12  ;;  %s8099_s12 = smov (!%p643_p13, %s7371_s12), 0  ;;  %v633_v25 = vadd.f32 %v6775_v20, %v630_v19  ;;  %v635_v28 = vld [vmem:[%s634_s26] sm:$0x1]  ;;  %5840 = vmatpush3.bf16.msra.mxu1 %v6154_v7 }
 0x16f   :  { %v608_v18 = vadd.f32 %v6772_v14, %v605_v13  ;;  %s648_s30 = scalar_select %p647_p12, 1, 0  ;;  %5841 = vmatprep.subr.bf16.mxu1 %v6806_v46  ;;  %v6161_v12 = vld [vmem:[#allocation14] ss:$12 sps:$4 sm:$0xff]   ;;  %v6162_v13 = vld [vmem:[#allocation14 + $0x8] ss:$12 sps:$4 sm:$0xff]  }
 0x170   :  { %s8101_s12 = smov (!%p5423_p0, %s8099_s12), 1  ;;  %v693_v29 = vrot.slane %v586_v22, 4  ;;  %v636_v31 = vadd.f32 %v635_v28, %v633_v25  ;;  %s654_s14 = scalar_lea.vmem [#allocation8], %s8097_s24  ;;  %v5428_v22 = vld [vmem:[#allocation11] ss:$0 sm:$0xff] }
 0x171   :  { %v611_v27 = vadd.f32 %v610_v23, %v608_v18  ;;  %s649_s6 = sadd.s32 %s648_s30, %s7369_s11  ;;  %s659_s28 = scalar_lea.vmem %s7923_s5, %s8101_s12  ;;  %v655_v33 = vld [vmem:[%s654_s14] sm:$0x1]  ;;  %v5429_v26 = vld [vmem:[#allocation12] ss:$0 sm:$0xff] }
 0x172   :  { %s650_s17 = smul.u32 %s649_s6, %s648_s30  ;;  %v721_v34 = vsel %vm710_vm3, %v720_v30, %v693_v29  ;;  %v660_v36 = vld [vmem:[%s659_s28] sm:$0x1]  ;;  %v699_v37 = vrot.slane %v636_v31, 2  ;;  %5842 = vmatpush3.bf16.msra.mxu1 %v6158_v10  ;;  %v805_v31 = vlaneseq  ;;  %s8003_s12 = sld [smem:[#allocation45_spill]] }
 0x173   :  { %v696_v32 = vrot.slane %v611_v27, 3  ;;  %5843 = vmatprep.subr.bf16.mxu1 %v6806_v46  ;;  %s6809_s0 = smov 96   ;;  %s8004_s13 = smov 64  }
 0x174   :  { %s6776_s1 = scalar_lea.vmem [#allocation9], %s650_s17  ;;  %s8005_s20 = smov 32  }
 0x175   :  { %v6778_v35 = vld [vmem:[%s6776_s1 + $0x1] sm:$0x1]  ;;  %v722_v39 = vsel %vm712_vm4, %v721_v34, %v696_v32  ;;  %v7458_v32 = vshrl.u32 %v805_v31, 7  ;;  %v803_v34 = vld [vmem:[#allocation15] sm:$0x7]  ;;  %s8006_s18 = sld [smem:[#allocation48_spill]] }
 0x176   :  { %v658_v38 = vadd.f32 %v6778_v35, %v655_v33  ;;  %v723_v41 = vsel %vm714_vm5, %v722_v39, %v699_v37  ;;  %5844 = vmatpush3.bf16.msra.mxu1 %v6162_v13  ;;  %s8007_s4 = sld [smem:[#allocation49_spill]]  ;;  %s6810_s9 = smov [#allocation27]  }
 0x177   :  { %5849 = vmatprep.subr.mxu1 %v6806_v46  ;;  %v7461_v33 = vsub.s32 1, %v7458_v32  ;;  %v7464_v35 = vsub.s32 0, %v7458_v32  ;;  %s8008_s10 = sld [smem:[#allocation50_spill]]  ;;  %s5173_s29 = sshll.u32 %s6810_s9, 4  ;;  %s5174_s29 = int_to_ptr.vmem [resolvable:$true] %s5173_s29 }
 0x178   :  { %v661_v40 = vadd.f32 %v660_v36, %v658_v38  ;;  %v815_v36 = vsub.s32 2, %v7458_v32  ;;  %s6691_s30 = scalar_lea.vmem %s5174_s29, 32  ;;  %p6696_p2 = scmp.lt.s32.totalorder %s5174_s29, %s5174_s29 }
 0x179   :  { %v812_v37 = vrot.slane %v803_v34, %v7461_v33  ;;  %p6692_p1 = scmp.ne.s32.totalorder %s5174_s29, %s6691_s30  ;;  %p6697_p3 = scmp.lt.s32.totalorder %s6691_s30, %s6691_s30 }
 0x17a   :  { %v702_v42 = vrot.slane %v661_v40, 1  ;;  %v808_v40 = vrot.slane %v803_v34, %v7464_v35 }
 0x17b   :  { %p6698_p4 = por %p6697_p3, %p6696_p2 }
 0x17c   :  { %v724_v43 = vsel %vm716_vm6, %v723_v41, %v702_v42 }
 0x17d   :  { %729 = vadd.xlane.f32.xlu0 %v724_v43  ;;  %p6699_p5 = pnand %p6698_p4, %p6692_p1 }
 0x1b6   :  { %v728_v48 = vpop.xlane.xlu0 %727 }
 0x1b7   :  { %v732_v49 = vmul.f32 0.0078125, %v728_v48 }
 0x1b9   :  { %v7432_v50 = vsub.f32 %v7225_v53, %v732_v49  ;;  %v6141_v53 = vld [vmem:[#allocation14 + $0x78] ss:$12 sps:$4 sm:$0xff]  }
 0x1ba   :  { %953 = vmatpush1.bf16.msra.mxu0 %v6141_v53 }
 0x1bb   :  { %v736_v51 = vmul.f32 %v7432_v50, %v7432_v50  ;;  %954 = vmatprep.subr.bf16.mxu0 %v6143_v62 }
 0x1bd   :  { %738 = vadd.xlane.f32.xlu1 %v736_v51 }
 0x1be   :  { %955 = vmatpush1.bf16.msra.mxu0 %v6145_v63 }
 0x1bf   :  { %956 = vmatprep.subr.bf16.mxu0 %v6147_v1 }
 0x1c2   :  { %957 = vmatpush1.bf16.msra.mxu0 %v6149_v2 }
 0x1c3   :  { %958 = vmatprep.subr.bf16.mxu0 %v6151_v4 }
 0x1c6   :  { %959 = vmatpush1.bf16.msra.mxu0 %v6153_v6 }
 0x1c7   :  { %960 = vmatprep.subr.bf16.mxu0 %v6155_v8 }
 0x1ca   :  { %961 = vmatpush1.bf16.msra.mxu0 %v6157_v9 }
 0x1cb   :  { %962 = vmatprep.subr.bf16.mxu0 %v6159_v11 }
 0x1ce   :  { %963 = vmatpush1.bf16.msra.mxu0 %v6161_v12 }
 0x1cf   :  { %5889 = vmatprep.subr.mxu0 %v6806_v46 }
 0x206   :  { %v730_v56 = vpop.xlane.xlu0 %729 }
 0x207   :  { %v733_v57 = vmul.f32 0.0078125, %v730_v56  ;;  %v766_v56 = vld [vmem:[%s8003_s12] sm:$0x3] }
 0x209   :  { %v735_v58 = vsub.f32 %v724_v43, %v733_v57  ;;  %v816_v43 = vrot.slane %v803_v34, %v815_v36  ;;  %v767_v57 = vcvt.s32.f32 %v766_v56 }
 0x20b   :  { %v737_v59 = vmul.f32 %v735_v58, %v735_v58 }
 0x20d   :  { %740 = vadd.xlane.f32.xlu1 %v737_v59 }
 0x246   :  { %v739_v14 = vpop.xlane.xlu1 %738 }
 0x247   :  { %v742_v15 = vmul.f32 0.0078125, %v739_v14 }
 0x249   :  { %v744_v16 = vadd.f32 1e-05, %v742_v15 }
 0x24b   :  { %6291 = vrsqrt.f32 %v744_v16 }
 0x258   :  { %v6292_v20 = vpop.eup %6291 }
 0x259   :  { %v748_v21 = vmul.f32 %v6292_v20, %v7432_v50 }
 0x25b   :  { %v756_v25 = vmul.f32 %v5428_v22, %v748_v21 }
 0x25d   :  { %v7448_v28 = vadd.f32 %v5429_v26, %v756_v25 }
 0x296   :  { %v741_v17 = vpop.xlane.xlu1 %740 }
 0x297   :  { %v743_v18 = vmul.f32 0.0078125, %v741_v17 }
 0x299   :  { %v745_v19 = vadd.f32 1e-05, %v743_v18 }
 0x29b   :  { %6293 = vrsqrt.f32 %v745_v19 }
 0x2a8   :  { %v6294_v23 = vpop.eup %6293 }
 0x2a9   :  { %v749_v24 = vmul.f32 %v6294_v23, %v735_v58  ;;  %v768_v58 = vsub.f32 1.0, %v767_v57 }
 0x2ab   :  { %v757_v27 = vmul.f32 %v5428_v22, %v749_v24  ;;  %v7502_v59 = vmul.f32 -1e+09, %v768_v58 }
 0x2ad   :  { %v7450_v29 = vadd.f32 %v5429_v26, %v757_v27  ;;  %v7506_v60 = vrot.slane %v7502_v59, %v7464_v35 }
 0x2af   :  { %v770_v30 = vpack.c.bf16 %v7450_v29, %v7448_v28 }
 0x2b1   :  { %981 = vmatmul.mubr.bf16.vlgmr.msra.gmra.mxu0 %v770_v30  ;;  %5846 = vmatmul.mubr.bf16.vlgmr.msra.gmra.mxu1 %v770_v30 }
 0x2b2   :  { %5851 = vmatprep.mubr.msk.f32.mxu1 %vm6808_vm7, %v6806_v46  ;;  %5891 = vmatprep.mubr.msk.f32.mxu0 %vm6808_vm7, %v6806_v46 }
 0x371   :  { %v982_v38 = vpop.f32.mrf.mxu0  ;;  %v1025_v39 = vpop.f32.mrf.mxu1 }
 0x372   :  { %v7477_v49 = vadd.f32 %v982_v38, %v808_v40  ;;  %v7480_v52 = vadd.f32 %v1025_v39, %v816_v43 }
 0x373   :  { %v984_v41 = vpop.f32.mrf.mxu0  ;;  %v5847_v42 = vpop.f32.mrf.mxu1 }
 0x374   :  { %v7471_v44 = vadd.f32 %v984_v41, %v812_v37 }
 0x375   :  { %v986_v45 = vpop.f32.mrf.mxu0  ;;  %v1028_v47 = vpop.f32.mrf.mxu1 }
 0x376   :  { %v7473_v48 = vadd.f32 %v1028_v47, %v816_v43  ;;  %5850 = vmatpush3.xpose.msk.msra.mxu1 %vm1032_vm8, %v7471_v44  ;;  %v7489_v55 = vadd.f32 %v986_v45, %v808_v40  ;;  %v7561_v47 = vrot.slane %v7502_v59, %v7461_v33 }
 0x377   :  { %v988_v50 = vpop.f32.mrf.mxu0  ;;  %v5848_v51 = vpop.f32.mrf.mxu1  ;;  %5854 = vmatprep.subr.mxu1 %v6806_v46 }
 0x378   :  { %v7482_v54 = vadd.f32 %v988_v50, %v812_v37 }
 0x379   :  { %5852 = vmatmul.mubr.msk.f32.vlgmr.msra.gmra.mxu1 %vm1032_vm8, %v7477_v49 }
 0x37a   :  { %5855 = vmatpush3.msra.mxu1 %v7480_v52  ;;  %5890 = vmatpush3.xpose.msk.msra.mxu0 %vm1032_vm8, %v7482_v54 }
 0x37b   :  { %5856 = vmatprep.mubr.msk.f32.mxu1 %vm6808_vm7, %v6806_v46  ;;  %5859 = vmatprep.subr.mxu1 %v6806_v46 }
 0x37c   :  { %5899 = vmatprep.subr.mxu0 %v6806_v46 }
 0x37d   :  { %5892 = vmatmul.mubr.msk.f32.vlgmr.msra.gmra.mxu0 %vm1032_vm8, %v7489_v55 }
 0x37e   :  { %5901 = vmatprep.mubr.msk.f32.mxu0 %vm6808_vm7, %v6806_v46 }
 0x439   :  { %v1105_v53 = vpop.f32.mrf.mxu1 }
 0x43a   :  { %v1109_v61 = vmul.f32 0.17677669, %v1105_v53 }
 0x43b   :  { %v5853_v62 = vpop.f32.mrf.mxu1 }
 0x43c   :  { %v1114_v63 = vadd.f32 %v7506_v60, %v1109_v61 }
 0x43d   :  { %v7509_v0 = vpop.f32.mrf.mxu0 }
 0x43e   :  { %v1116_v1 = vsel %vm1115_vm9, %v1114_v63, -inf  ;;  %v1795_v50 = vmul.f32 0.17677669, %v7509_v0 }
 0x43f   :  { %v5893_v2 = vpop.f32.mrf.mxu0  ;;  %1117 = vmax.xlane.f32.xlu0 %v1116_v1 }
 0x455   :  { %1202 = vrot.lane.b32.xlu0 %v7471_v44, %s6809_s0 }
 0x4c8   :  { %v1118_v3 = vpop.xlane.xlu0 %1117 }
 0x4c9   :  { %v1119_v4 = vsub.f32 %v1114_v63, %v1118_v3 }
 0x4cb   :  { %v1120_v6 = vmul.f32 1.442695, %v1119_v4 }
 0x4cc   :  { %v1203_v12 = vpop.permute.xlu0 %1202 }
 0x4cd   :  { %6295 = vpow2.f32 %v1120_v6 }
 0x4da   :  { %v6296_v7 = vpop.eup %6295 }
 0x4db   :  { %v1122_v8 = vsel %vm1115_vm9, %v6296_v7, 0.0 }
 0x4dc   :  { %1123 = vadd.xlane.f32.xlu1 %v1122_v8 }
 0x4ed   :  { %1200 = vrot.lane.b32.xlu1 %v7477_v49, %s6809_s0 }
 0x565   :  { %v1124_v9 = vpop.xlane.xlu1 %1123 }
 0x566   :  { %6297 = vrcp.f32 %v1124_v9 }
 0x569   :  { %v1201_v13 = vpop.permute.xlu1 %1200 }
 0x573   :  { %v6298_v10 = vpop.eup %6297 }
 0x574   :  { %v1126_v11 = vmul.f32 %v6298_v10, %v6296_v7 }
 0x576   :  { %5857 = vmatmul.mubr.msk.f32.vlgmr.msra.gmra.mxu1 %vm1115_vm9, %v1126_v11 }
 0x577   :  { %5860 = vmatpush3.xpose.msk.msra.mxu1 %vm1032_vm8, %v1203_v12  ;;  %5861 = vmatprep.mubr.msk.f32.mxu1 %vm6808_vm7, %v6806_v46 }
 0x578   :  { %5864 = vmatprep.subr.mxu1 %v6806_v46 }
 0x57a   :  { %5862 = vmatmul.mubr.msk.f32.vlgmr.msra.gmra.mxu1 %vm1032_vm8, %v1201_v13 }
 0x57b   :  { %5866 = vmatprep.mubr.msk.f32.mxu1 %vm6808_vm7, %v6806_v46 }
 0x636   :  { %v7525_v14 = vpop.f32.mrf.mxu1 }
 0x638   :  { %v5858_v15 = vpop.f32.mrf.mxu1 }
 0x63a   :  { %v1274_v16 = vpop.f32.mrf.mxu1 }
 0x63b   :  { %v1278_v17 = vmul.f32 0.17677669, %v1274_v16 }
 0x63c   :  { %v5863_v18 = vpop.f32.mrf.mxu1 }
 0x63d   :  { %v1279_v19 = vadd.f32 %v1278_v17, %v7506_v60 }
 0x63f   :  { %v1280_v20 = vsel %vm1115_vm9, %v1279_v19, -inf }
 0x640   :  { %1281 = vmax.xlane.f32.xlu1 %v1280_v20 }
 0x651   :  { %1370 = vrot.lane.b32.xlu1 %v7471_v44, %s8004_s13 }
 0x655   :  { %1368 = vrot.lane.b32.xlu1 %v7477_v49, %s8004_s13 }
 0x6c9   :  { %v1282_v21 = vpop.xlane.xlu1 %1281 }
 0x6ca   :  { %v1283_v22 = vsub.f32 %v1279_v19, %v1282_v21 }
 0x6cc   :  { %v1284_v23 = vmul.f32 1.442695, %v1283_v22 }
 0x6cd   :  { %v1371_v31 = vpop.permute.xlu1 %1370 }
 0x6ce   :  { %6299 = vpow2.f32 %v1284_v23 }
 0x6d1   :  { %v1369_v37 = vpop.permute.xlu1 %1368 }
 0x6db   :  { %v6300_v24 = vpop.eup %6299 }
 0x6dc   :  { %v1286_v25 = vsel %vm1115_vm9, %v6300_v24, 0.0 }
 0x6dd   :  { %1287 = vadd.xlane.f32.xlu0 %v1286_v25 }
 0x6f3   :  { %1292 = vrot.lane.b32.xlu0 %v7480_v52, %s6809_s0 }
 0x766   :  { %v1288_v26 = vpop.xlane.xlu0 %1287 }
 0x767   :  { %6301 = vrcp.f32 %v1288_v26 }
 0x76a   :  { %v1293_v27 = vpop.permute.xlu0 %1292 }
 0x76b   :  { %5865 = vmatpush3.msra.mxu1 %v1293_v27 }
 0x76c   :  { %5869 = vmatprep.subr.mxu1 %v6806_v46 }
 0x774   :  { %v6302_v30 = vpop.eup %6301 }
 0x775   :  { %v1290_v34 = vmul.f32 %v6302_v30, %v6300_v24 }
 0x777   :  { %5867 = vmatmul.mubr.msk.f32.vlgmr.msra.gmra.mxu1 %vm1115_vm9, %v1290_v34 }
 0x778   :  { %5870 = vmatpush3.xpose.msk.msra.mxu1 %vm1032_vm8, %v1371_v31  ;;  %5871 = vmatprep.mubr.msk.f32.mxu1 %vm6808_vm7, %v6806_v46 }
 0x779   :  { %5874 = vmatprep.subr.mxu1 %v6806_v46 }
 0x77b   :  { %5872 = vmatmul.mubr.msk.f32.vlgmr.msra.gmra.mxu1 %vm1032_vm8, %v1369_v37 }
 0x77c   :  { %5876 = vmatprep.mubr.msk.f32.mxu1 %vm6808_vm7, %v6806_v46 }
 0x837   :  { %v7545_v38 = vpop.f32.mrf.mxu1 }
 0x839   :  { %v5868_v39 = vpop.f32.mrf.mxu1 }
 0x83b   :  { %v1442_v40 = vpop.f32.mrf.mxu1 }
 0x83c   :  { %v1446_v41 = vmul.f32 0.17677669, %v1442_v40 }
 0x83d   :  { %v5873_v42 = vpop.f32.mrf.mxu1 }
 0x83e   :  { %v1447_v43 = vadd.f32 %v1446_v41, %v7506_v60 }
 0x840   :  { %v1448_v45 = vsel %vm1115_vm9, %v1447_v43, -inf }
 0x841   :  { %1449 = vmax.xlane.f32.xlu1 %v1448_v45 }
 0x852   :  { %1537 = vrot.lane.b32.xlu1 %v7471_v44, %s8005_s20  ;;  %v1800_v44 = vadd.f32 %v7561_v47, %v1795_v50 }
 0x854   :  { %v1801_v51 = vsel %vm1115_vm9, %v1800_v44, -inf }
 0x856   :  { %1535 = vrot.lane.b32.xlu1 %v7477_v49, %s8005_s20 }
 0x85a   :  { %1885 = vrot.lane.b32.xlu1 %v7489_v55, %s6809_s0 }
 0x85e   :  { %2053 = vrot.lane.b32.xlu1 %v7489_v55, %s8004_s13 }
 0x862   :  { %2220 = vrot.lane.b32.xlu1 %v7489_v55, %s8005_s20 }
 0x886   :  { %1802 = vmax.xlane.f32.xlu1 %v1801_v51 }
 0x8ca   :  { %v1450_v49 = vpop.xlane.xlu1 %1449 }
 0x8cb   :  { %v1451_v56 = vsub.f32 %v1447_v43, %v1450_v49 }
 0x8cd   :  { %v1452_v57 = vmul.f32 1.442695, %v1451_v56 }
 0x8ce   :  { %v1538_v55 = vpop.permute.xlu1 %1537 }
 0x8cf   :  { %6303 = vpow2.f32 %v1452_v57 }
 0x8d2   :  { %v1536_v61 = vpop.permute.xlu1 %1535 }
 0x8d6   :  { %v1886_v63 = vpop.permute.xlu1 %1885 }
 0x8da   :  { %v2054_v2 = vpop.permute.xlu1 %2053 }
 0x8dc   :  { %v6304_v58 = vpop.eup %6303 }
 0x8dd   :  { %v1454_v53 = vsel %vm1115_vm9, %v6304_v58, 0.0 }
 0x8de   :  { %1455 = vadd.xlane.f32.xlu0 %v1454_v53  ;;  %v2221_v6 = vpop.permute.xlu1 %2220 }
 0x8f4   :  { %1459 = vrot.lane.b32.xlu0 %v7480_v52, %s8004_s13 }
 0x8f8   :  { %1887 = vrot.lane.b32.xlu0 %v7482_v54, %s6809_s0 }
 0x8fc   :  { %2055 = vrot.lane.b32.xlu0 %v7482_v54, %s8004_s13 }
 0x900   :  { %2222 = vrot.lane.b32.xlu0 %v7482_v54, %s8005_s20 }
 0x90f   :  { %v1803_v9 = vpop.xlane.xlu1 %1802 }
 0x910   :  { %v1804_v12 = vsub.f32 %v1800_v44, %v1803_v9 }
 0x912   :  { %v1805_v18 = vmul.f32 1.442695, %v1804_v12 }
 0x967   :  { %v1456_v59 = vpop.xlane.xlu0 %1455 }
 0x968   :  { %6305 = vrcp.f32 %v1456_v59 }
 0x969   :  { %6307 = vpow2.f32 %v1805_v18 }
 0x96b   :  { %v1460_v62 = vpop.permute.xlu0 %1459 }
 0x96c   :  { %5875 = vmatpush3.msra.mxu1 %v1460_v62 }
 0x96d   :  { %5879 = vmatprep.subr.mxu1 %v6806_v46 }
 0x96f   :  { %v1888_v0 = vpop.permute.xlu0 %1887 }
 0x970   :  { %5900 = vmatpush3.xpose.msk.msra.mxu0 %vm1032_vm8, %v1888_v0 }
 0x971   :  { %5909 = vmatprep.subr.mxu0 %v6806_v46 }
 0x973   :  { %v2056_v1 = vpop.permute.xlu0 %2055  ;;  %5902 = vmatmul.mubr.msk.f32.vlgmr.msra.gmra.mxu0 %vm1032_vm8, %v1886_v63 }
 0x974   :  { %5910 = vmatpush3.xpose.msk.msra.mxu0 %vm1032_vm8, %v2056_v1  ;;  %5911 = vmatprep.mubr.msk.f32.mxu0 %vm6808_vm7, %v6806_v46 }
 0x975   :  { %v6306_v54 = vpop.eup %6305  ;;  %5919 = vmatprep.subr.mxu0 %v6806_v46 }
 0x976   :  { %v1458_v3 = vmul.f32 %v6306_v54, %v6304_v58  ;;  %v6308_v40 = vpop.eup %6307 }
 0x977   :  { %v2223_v4 = vpop.permute.xlu0 %2222  ;;  %5912 = vmatmul.mubr.msk.f32.vlgmr.msra.gmra.mxu0 %vm1032_vm8, %v2054_v2  ;;  %v1807_v41 = vsel %vm1115_vm9, %v6308_v40, 0.0 }
 0x978   :  { %5877 = vmatmul.mubr.msk.f32.vlgmr.msra.gmra.mxu1 %vm1115_vm9, %v1458_v3  ;;  %5920 = vmatpush3.xpose.msk.msra.mxu0 %vm1032_vm8, %v2223_v4 }
 0x979   :  { %5880 = vmatpush3.xpose.msk.msra.mxu1 %vm1032_vm8, %v1538_v55  ;;  %5921 = vmatprep.mubr.msk.f32.mxu0 %vm6808_vm7, %v6806_v46 }
 0x97a   :  { %5881 = vmatprep.mubr.msk.f32.mxu1 %vm6808_vm7, %v6806_v46  ;;  %5884 = vmatprep.subr.mxu1 %v6806_v46 }
 0x97b   :  { %5922 = vmatmul.mubr.msk.f32.vlgmr.msra.gmra.mxu0 %vm1032_vm8, %v2221_v6  ;;  %5929 = vmatprep.subr.bf16.mxu0 %v6806_v46 }
 0x97c   :  { %5882 = vmatmul.mubr.msk.f32.vlgmr.msra.gmra.mxu1 %vm1032_vm8, %v1536_v61  ;;  %5945 = vmatprep.mubr.msk.bf16.mxu0 %vm6808_vm7, %v6806_v46 }
 0x97d   :  { %5886 = vmatprep.mubr.msk.f32.mxu1 %vm6808_vm7, %v6806_v46 }
 0xa33   :  { %v1959_v7 = vpop.f32.mrf.mxu0 }
 0xa34   :  { %v1963_v19 = vmul.f32 0.17677669, %v1959_v7 }
 0xa35   :  { %v5903_v8 = vpop.f32.mrf.mxu0 }
 0xa36   :  { %v1964_v26 = vadd.f32 %v1963_v19, %v7561_v47 }
 0xa37   :  { %v2127_v10 = vpop.f32.mrf.mxu0 }
 0xa38   :  { %v7599_v11 = vpop.f32.mrf.mxu1  ;;  %v2131_v24 = vmul.f32 0.17677669, %v2127_v10  ;;  %v1965_v30 = vsel %vm1115_vm9, %v1964_v26, -inf }
 0xa39   :  { %v5913_v13 = vpop.f32.mrf.mxu0 }
 0xa3a   :  { %v5878_v15 = vpop.f32.mrf.mxu1  ;;  %v2132_v31 = vadd.f32 %v2131_v24, %v7561_v47  ;;  %v6164_v24 = vld [vmem:[#allocation17 + $0x30] sm:$0xff]  }
 0xa3b   :  { %v2294_v16 = vpop.f32.mrf.mxu0 }
 0xa3c   :  { %v1609_v17 = vpop.f32.mrf.mxu1  ;;  %v2298_v27 = vmul.f32 0.17677669, %v2294_v16  ;;  %v2133_v34 = vsel %vm1115_vm9, %v2132_v31, -inf }
 0xa3d   :  { %v1613_v20 = vmul.f32 0.17677669, %v1609_v17  ;;  %v5923_v21 = vpop.f32.mrf.mxu0 }
 0xa3e   :  { %v5883_v22 = vpop.f32.mrf.mxu1  ;;  %v2299_v37 = vadd.f32 %v2298_v27, %v7561_v47  ;;  %v6167_v27 = vld [vmem:[#allocation17 + $0x18] sm:$0xff]  }
 0xa3f   :  { %v1614_v23 = vadd.f32 %v1613_v20, %v7506_v60 }
 0xa40   :  { %v2300_v39 = vsel %vm1115_vm9, %v2299_v37, -inf }
 0xa41   :  { %v1615_v25 = vsel %vm1115_vm9, %v1614_v23, -inf }
 0xa42   :  { %1616 = vmax.xlane.f32.xlu0 %v1615_v25  ;;  %v6165_v25 = vld [vmem:[#allocation17 + $0x28] sm:$0xff]  }
 0xa46   :  { %1966 = vmax.xlane.f32.xlu0 %v1965_v30  ;;  %v6168_v30 = vld [vmem:[#allocation17 + $0x10] sm:$0xff]  }
 0xa4a   :  { %2134 = vmax.xlane.f32.xlu0 %v2133_v34 }
 0xa4e   :  { %2301 = vmax.xlane.f32.xlu0 %v2300_v39 }
 0xa52   :  { %1808 = vadd.xlane.f32.xlu0 %v1807_v41  ;;  %v6170_v41 = vld [vmem:[#allocation17] sm:$0xff]  }
 0xacb   :  { %v1617_v42 = vpop.xlane.xlu0 %1616 }
 0xacc   :  { %v1618_v49 = vsub.f32 %v1614_v23, %v1617_v42  ;;  %v6163_v23 = vld [vmem:[#allocation17 + $0x38] sm:$0xff]  }
 0xacd   :  { %5930 = vmatpush3.bf16.msra.mxu0 %v6163_v23 }
 0xace   :  { %v1619_v53 = vmul.f32 1.442695, %v1618_v49  ;;  %5931 = vmatprep.subr.bf16.mxu0 %v6806_v46 }
 0xacf   :  { %v1967_v43 = vpop.xlane.xlu0 %1966 }
 0xad0   :  { %v1968_v45 = vsub.f32 %v1964_v26, %v1967_v43  ;;  %v6166_v26 = vld [vmem:[#allocation17 + $0x20] sm:$0xff]  }
 0xad1   :  { %5932 = vmatpush3.bf16.msra.mxu0 %v6164_v24  ;;  %v6176_v24 = vld [vmem:[#allocation21 + $0x64] ss:$8 sps:$4 sm:$0xff]  }
 0xad2   :  { %v1969_v50 = vmul.f32 1.442695, %v1968_v45  ;;  %5933 = vmatprep.subr.bf16.mxu0 %v6806_v46 }
 0xad3   :  { %v2135_v44 = vpop.xlane.xlu0 %2134 }
 0xad4   :  { %6309 = vpow2.f32 %v1969_v50  ;;  %v2136_v51 = vsub.f32 %v2132_v31, %v2135_v44 }
 0xad5   :  { %5934 = vmatpush3.bf16.msra.mxu0 %v6165_v25  ;;  %v6174_v25 = vld [vmem:[#allocation21 + $0x60] ss:$8 sps:$4 sm:$0xff]  }
 0xad6   :  { %v2137_v56 = vmul.f32 1.442695, %v2136_v51  ;;  %5935 = vmatprep.subr.bf16.mxu0 %v6806_v46 }
 0xad7   :  { %v2302_v57 = vpop.xlane.xlu0 %2301 }
 0xad8   :  { %6311 = vpow2.f32 %v2137_v56  ;;  %v2303_v58 = vsub.f32 %v2299_v37, %v2302_v57  ;;  %v6169_v37 = vld [vmem:[#allocation17 + $0x8] sm:$0xff]  }
 0xad9   :  { %5936 = vmatpush3.bf16.msra.mxu0 %v6166_v26  ;;  %v6177_v26 = vld [vmem:[#allocation21 + $0x50] ss:$8 sps:$4 sm:$0xff]  }
 0xada   :  { %v2304_v55 = vmul.f32 1.442695, %v2303_v58  ;;  %5937 = vmatprep.subr.bf16.mxu0 %v6806_v46 }
 0xadb   :  { %v1809_v3 = vpop.xlane.xlu0 %1808 }
 0xadc   :  { %6313 = vpow2.f32 %v2304_v55 }
 0xadd   :  { %6315 = vpow2.f32 %v1619_v53  ;;  %5938 = vmatpush3.bf16.msra.mxu0 %v6167_v27  ;;  %v6180_v27 = vld [vmem:[#allocation21 + $0x40] ss:$8 sps:$4 sm:$0xff]  }
 0xade   :  { %5939 = vmatprep.subr.bf16.mxu0 %v6806_v46 }
 0xae1   :  { %v6310_v59 = vpop.eup %6309  ;;  %5940 = vmatpush3.bf16.msra.mxu0 %v6168_v30  ;;  %v6182_v30 = vld [vmem:[#allocation21 + $0x44] ss:$8 sps:$4 sm:$0xff]  }
 0xae2   :  { %v1971_v61 = vsel %vm1115_vm9, %v6310_v59, 0.0  ;;  %5941 = vmatprep.subr.bf16.mxu0 %v6806_v46 }
 0xae3   :  { %1972 = vadd.xlane.f32.xlu1 %v1971_v61 }
 0xae5   :  { %v6312_v62 = vpop.eup %6311  ;;  %5942 = vmatpush3.bf16.msra.mxu0 %v6169_v37  ;;  %v6188_v37 = vld [vmem:[#allocation21 + $0x24] ss:$8 sps:$4 sm:$0xff]  }
 0xae6   :  { %v2139_v63 = vsel %vm1115_vm9, %v6312_v62, 0.0  ;;  %5943 = vmatprep.subr.bf16.mxu0 %v6806_v46 }
 0xae7   :  { %2140 = vadd.xlane.f32.xlu0 %v2139_v63 }
 0xae9   :  { %v6314_v0 = vpop.eup %6313  ;;  %5944 = vmatpush3.bf16.msra.mxu0 %v6170_v41  ;;  %v6189_v41 = vld [vmem:[#allocation21 + $0x10] ss:$8 sps:$4 sm:$0xff]  }
 0xaea   :  { %v2306_v1 = vsel %vm1115_vm9, %v6314_v0, 0.0  ;;  %v6316_v2 = vpop.eup %6315 }
 0xaeb   :  { %2307 = vadd.xlane.f32.xlu1 %v2306_v1  ;;  %v1621_v54 = vsel %vm1115_vm9, %v6316_v2, 0.0 }
 0xaef   :  { %1622 = vadd.xlane.f32.xlu1 %v1621_v54 }
 0xafd   :  { %1626 = vrot.lane.b32.xlu0 %v7480_v52, %s8005_s20 }
 0xb00   :  { %1977 = vrot.lane.b32.xlu1 %v7473_v48, %s6809_s0 }
 0xb04   :  { %2144 = vrot.lane.b32.xlu1 %v7473_v48, %s8004_s13 }
 0xb08   :  { %2311 = vrot.lane.b32.xlu1 %v7473_v48, %s8005_s20 }
 0xb6c   :  { %v1973_v4 = vpop.xlane.xlu1 %1972 }
 0xb70   :  { %v2141_v6 = vpop.xlane.xlu0 %2140 }
 0xb74   :  { %v2308_v7 = vpop.xlane.xlu1 %2307  ;;  %v1627_v8 = vpop.permute.xlu0 %1626 }
 0xb75   :  { %5885 = vmatpush3.msra.mxu1 %v1627_v8 }
 0xb76   :  { %5894 = vmatprep.subr.mxu1 %v6806_v46 }
 0xb78   :  { %v1623_v9 = vpop.xlane.xlu1 %1622 }
 0xb79   :  { %6317 = vrcp.f32 %v1623_v9 }
 0xb7a   :  { %6319 = vrcp.f32 %v1809_v3 }
 0xb7b   :  { %6321 = vrcp.f32 %v1973_v4 }
 0xb7c   :  { %6323 = vrcp.f32 %v2141_v6  ;;  %v1978_v13 = vpop.permute.xlu1 %1977 }
 0xb7d   :  { %6325 = vrcp.f32 %v2308_v7  ;;  %v5478_v7 = vld [vmem:[#allocation18] ss:$0 sm:$0xff] }
 0xb80   :  { %v2145_v17 = vpop.permute.xlu1 %2144 }
 0xb84   :  { %v2312_v21 = vpop.permute.xlu1 %2311 }
 0xb86   :  { %v6318_v52 = vpop.eup %6317 }
 0xb87   :  { %v1625_v10 = vmul.f32 %v6318_v52, %v6316_v2  ;;  %v6320_v12 = vpop.eup %6319 }
 0xb88   :  { %v1811_v15 = vmul.f32 %v6320_v12, %v6308_v40  ;;  %v6322_v16 = vpop.eup %6321 }
 0xb89   :  { %5887 = vmatmul.mubr.msk.f32.vlgmr.msra.gmra.mxu1 %vm1115_vm9, %v1625_v10  ;;  %v1975_v18 = vmul.f32 %v6322_v16, %v6310_v59  ;;  %v6324_v19 = vpop.eup %6323  ;;  %v6171_v16 = vld [vmem:[#allocation21 + $0x70] ss:$8 sps:$4 sm:$0xff]  }
 0xb8a   :  { %5895 = vmatpush3.msra.mxu1 %v7473_v48  ;;  %5896 = vmatprep.mubr.msk.f32.mxu1 %vm6808_vm7, %v6806_v46  ;;  %v2143_v48 = vmul.f32 %v6324_v19, %v6312_v62  ;;  %v6326_v20 = vpop.eup %6325 }
 0xb8b   :  { %5904 = vmatprep.subr.mxu1 %v6806_v46  ;;  %v2310_v22 = vmul.f32 %v6326_v20, %v6314_v0 }
 0xb8d   :  { %5897 = vmatmul.mubr.msk.f32.vlgmr.msra.gmra.mxu1 %vm1115_vm9, %v1811_v15 }
 0xb8e   :  { %5905 = vmatpush3.msra.mxu1 %v1978_v13  ;;  %5906 = vmatprep.mubr.msk.f32.mxu1 %vm6808_vm7, %v6806_v46 }
 0xb8f   :  { %5914 = vmatprep.subr.mxu1 %v6806_v46 }
 0xb91   :  { %5907 = vmatmul.mubr.msk.f32.vlgmr.msra.gmra.mxu1 %vm1115_vm9, %v1975_v18 }
 0xb92   :  { %5915 = vmatpush3.msra.mxu1 %v2145_v17  ;;  %5916 = vmatprep.mubr.msk.f32.mxu1 %vm6808_vm7, %v6806_v46  ;;  %v6173_v17 = vld [vmem:[#allocation21 + $0x74] ss:$8 sps:$4 sm:$0xff]  }
 0xb93   :  { %5924 = vmatprep.subr.mxu1 %v6806_v46 }
 0xb95   :  { %5917 = vmatmul.mubr.msk.f32.vlgmr.msra.gmra.mxu1 %vm1115_vm9, %v2143_v48 }
 0xb96   :  { %5925 = vmatpush3.msra.mxu1 %v2312_v21  ;;  %5926 = vmatprep.mubr.msk.f32.mxu1 %vm6808_vm7, %v6806_v46 }
 0xb97   :  { %2666 = vmatprep.subr.bf16.mxu1 %v6173_v17  ;;  %v2574_v17 = vld [vmem:[#allocation23] sm:$0x3] }
 0xb99   :  { %5927 = vmatmul.mubr.msk.f32.vlgmr.msra.gmra.mxu1 %vm1115_vm9, %v2310_v22 }
 0xb9a   :  { %2698 = vmatprep.mubr.bf16.mxu1 %v6807_v5  ;;  %2667 = vmatpush1.bf16.msra.mxu1 %v6171_v16  ;;  %v6210_v16 = vld [vmem:[#allocation24] sm:$0xff]  }
 0xb9b   :  { %2668 = vmatprep.subr.bf16.mxu1 %v6176_v24 }
 0xb9e   :  { %2669 = vmatpush1.bf16.msra.mxu1 %v6174_v25 }
 0xc49   :  { %v1698_v31 = vpop.f32.mrf.mxu1 }
 0xc4b   :  { %v5888_v34 = vpop.f32.mrf.mxu1 }
 0xc4c   :  { %v6183_v34 = vld [vmem:[#allocation21 + $0x30] ss:$8 sps:$4 sm:$0xff]  }
 0xc4d   :  { %v1881_v39 = vpop.f32.mrf.mxu1 }
 0xc4f   :  { %v5898_v40 = vpop.f32.mrf.mxu1 }
 0xc50   :  { %v6191_v40 = vld [vmem:[#allocation21 + $0x14] ss:$8 sps:$4 sm:$0xff]  }
 0xc51   :  { %v2049_v42 = vpop.f32.mrf.mxu1 }
 0xc52   :  { %v6101_v43 = vpack.i.bf16 %v2049_v42, %v7545_v38  ;;  %v6194_v42 = vld [vmem:[#allocation21 + $0x4] ss:$8 sps:$4 sm:$0xff]  }
 0xc53   :  { %v5908_v45 = vpop.f32.mrf.mxu1 }
 0xc54   :  { %6102 = vrot.lane.b32.xlu0 %v6101_v43, %s8005_s20  ;;  %v6192_v43 = vld [vmem:[#allocation21] ss:$8 sps:$4 sm:$0xff]  }
 0xc55   :  { %v2216_v50 = vpop.f32.mrf.mxu1 }
 0xc56   :  { %v6106_v44 = vpack.i.bf16 %v2216_v50, %v7599_v11 }
 0xc57   :  { %v5918_v51 = vpop.f32.mrf.mxu1 }
 0xc58   :  { %6107 = vrot.lane.b32.xlu1 %v6106_v44, %s8004_s13 }
 0xc59   :  { %v2383_v49 = vpop.f32.mrf.mxu1 }
 0xc5a   :  { %v6111_v56 = vpack.i.bf16 %v2383_v49, %v1698_v31  ;;  %v6185_v31 = vld [vmem:[#allocation21 + $0x34] ss:$8 sps:$4 sm:$0xff]  }
 0xc5b   :  { %v5928_v57 = vpop.f32.mrf.mxu1 }
 0xc5c   :  { %6112 = vrot.lane.b32.xlu0 %v6111_v56, %s6809_s0 }
 0xcc6   :  { %v6103_v58 = vpop.permute.xlu0 %6102 }
 0xcc7   :  { %v6105_v55 = vunpack.i.h.bf16 %v6103_v58  ;;  %v6104_v59 = vunpack.i.l.bf16 %v6103_v58 }
 0xcc9   :  { %v2399_v63 = vsel %vm1032_vm8, %v1881_v39, %v6105_v55  ;;  %v1714_v11 = vsel %vm1032_vm8, %v7525_v14, %v6104_v59  ;;  %v6186_v39 = vld [vmem:[#allocation21 + $0x20] ss:$8 sps:$4 sm:$0xff]  }
 0xcca   :  { %v6108_v53 = vpop.permute.xlu1 %6107 }
 0xccb   :  { %v6110_v38 = vunpack.i.h.bf16 %v6108_v53  ;;  %v6109_v61 = vunpack.i.l.bf16 %v6108_v53  ;;  %v5487_v53 = vld [vmem:[%s8006_s18] ss:$0 sm:$0xff] }
 0xccd   :  { %v2400_v2 = vsel %vm1715_vm10, %v2399_v63, %v6110_v38  ;;  %v1716_v54 = vsel %vm1715_vm10, %v1714_v11, %v6109_v61  ;;  %v5488_v61 = vld [vmem:[#allocation20] ss:$0 sm:$0xff] }
 0xcce   :  { %v6113_v62 = vpop.permute.xlu0 %6112 }
 0xccf   :  { %v6115_v0 = vunpack.i.h.bf16 %v6113_v62  ;;  %v6114_v1 = vunpack.i.l.bf16 %v6113_v62 }
 0xcd1   :  { %v2401_v3 = vsel %vm1717_vm11, %v2400_v2, %v6115_v0  ;;  %v1718_v4 = vsel %vm1717_vm11, %v1716_v54, %v6114_v1  ;;  %v6195_v1 = vld [vmem:[#allocation24 + $0x78] sm:$0xff]   ;;  %v6197_v54 = vld [vmem:[#allocation24 + $0x70] sm:$0xff]  }
 0xcd2   :  { %v2402_v6 = vpack.c.bf16 %v2401_v3, %v1718_v4  ;;  %v6196_v2 = vld [vmem:[#allocation24 + $0x38] sm:$0xff]   ;;  %5735 = vmatprep.subr.bf16.mxu0 %v6195_v1  ;;  %v6198_v3 = vld [vmem:[#allocation24 + $0x30] sm:$0xff]   ;;  %v6199_v4 = vld [vmem:[#allocation24 + $0x68] sm:$0xff]  }
 0xcd4   :  { %5946 = vmatmul.mubr.bf16.vlgmr.msra.gmra.mxu0 %v2402_v6  ;;  %v6200_v6 = vld [vmem:[#allocation24 + $0x28] sm:$0xff]  }
 0xcd5   :  { %5736 = vmatpush3.bf16.msra.mxu0 %v6196_v2 }
 0xcd6   :  { %5737 = vmatprep.subr.bf16.mxu0 %v6197_v54 }
 0xcd9   :  { %5738 = vmatpush3.bf16.msra.mxu0 %v6198_v3 }
 0xcda   :  { %5739 = vmatprep.subr.bf16.mxu0 %v6199_v4 }
 0xcdd   :  { %5740 = vmatpush3.bf16.msra.mxu0 %v6200_v6 }
 0xd94   :  { %v2508_v8 = vpop.f32.mrf.mxu0 }
 0xd95   :  { %v2509_v9 = vadd.f32 %v5478_v7, %v2508_v8  ;;  %v6202_v8 = vld [vmem:[#allocation24 + $0x20] sm:$0xff]  }
 0xd96   :  { %v5947_v52 = vpop.f32.mrf.mxu0 }
 0xd97   :  { %v2515_v10 = vadd.f32 %v2509_v9, %v7448_v28  ;;  %v6203_v9 = vld [vmem:[#allocation24 + $0x58] sm:$0xff]  }
 0xd98   :  { %v2511_v12 = vpop.f32.mrf.mxu0  ;;  %v6204_v52 = vld [vmem:[#allocation24 + $0x18] sm:$0xff]  }
 0xd99   :  { %v2512_v14 = vadd.f32 %v5478_v7, %v2511_v12  ;;  %2519 = vadd.xlane.f32.xlu1 %v2515_v10  ;;  %v6201_v7 = vld [vmem:[#allocation24 + $0x60] sm:$0xff]   ;;  %v6206_v12 = vld [vmem:[#allocation24 + $0x10] sm:$0xff]  }
 0xd9a   :  { %v5948_v13 = vpop.f32.mrf.mxu0  ;;  %5741 = vmatprep.subr.bf16.mxu0 %v6201_v7 }
 0xd9b   :  { %v2516_v15 = vadd.f32 %v2512_v14, %v7450_v29  ;;  %v6179_v29 = vld [vmem:[#allocation21 + $0x54] ss:$8 sps:$4 sm:$0xff]   ;;  %5742 = vmatpush3.bf16.msra.mxu0 %v6202_v8  ;;  %v6207_v14 = vld [vmem:[#allocation24 + $0x48] sm:$0xff]  }
 0xd9c   :  { %2670 = vmatprep.subr.bf16.mxu1 %v6179_v29  ;;  %5743 = vmatprep.subr.bf16.mxu0 %v6203_v9  ;;  %v6208_v13 = vld [vmem:[#allocation24 + $0x8] sm:$0xff]  }
 0xd9d   :  { %2521 = vadd.xlane.f32.xlu0 %v2516_v15  ;;  %2671 = vmatpush1.bf16.msra.mxu1 %v6177_v26 }
 0xd9e   :  { %2672 = vmatprep.subr.bf16.mxu1 %v6182_v30 }
 0xd9f   :  { %5744 = vmatpush3.bf16.msra.mxu0 %v6204_v52 }
 0xda1   :  { %2673 = vmatpush1.bf16.msra.mxu1 %v6180_v27 }
 0xda2   :  { %2674 = vmatprep.subr.bf16.mxu1 %v6185_v31 }
 0xda5   :  { %2675 = vmatpush1.bf16.msra.mxu1 %v6183_v34 }
 0xda6   :  { %2676 = vmatprep.subr.bf16.mxu1 %v6188_v37 }
 0xda9   :  { %2677 = vmatpush1.bf16.msra.mxu1 %v6186_v39 }
 0xdaa   :  { %2678 = vmatprep.subr.bf16.mxu1 %v6191_v40 }
 0xdad   :  { %2679 = vmatpush1.bf16.msra.mxu1 %v6189_v41 }
 0xdae   :  { %2680 = vmatprep.subr.bf16.mxu1 %v6194_v42 }
 0xdb1   :  { %2681 = vmatpush1.bf16.msra.mxu1 %v6192_v43 }
 0xe22   :  { %v2520_v18 = vpop.xlane.xlu1 %2519 }
 0xe23   :  { %v2523_v19 = vmul.f32 0.0078125, %v2520_v18  ;;  %v2579_v18 = vrot.slane %v2574_v17, %v7464_v35 }
 0xe25   :  { %v2525_v48 = vsub.f32 %v2515_v10, %v2523_v19  ;;  %v6205_v10 = vld [vmem:[#allocation24 + $0x50] sm:$0xff]   ;;  %v2583_v19 = vrot.slane %v2574_v17, %v7461_v33 }
 0xe26   :  { %v2522_v20 = vpop.xlane.xlu0 %2521  ;;  %5745 = vmatprep.subr.bf16.mxu0 %v6205_v10 }
 0xe27   :  { %v2524_v21 = vmul.f32 0.0078125, %v2522_v20  ;;  %v2527_v22 = vmul.f32 %v2525_v48, %v2525_v48  ;;  %5746 = vmatpush3.bf16.msra.mxu0 %v6206_v12 }
 0xe28   :  { %5747 = vmatprep.subr.bf16.mxu0 %v6207_v14  ;;  %v5505_v14 = vld [vmem:[#allocation26] ss:$0 sm:$0xff] }
 0xe29   :  { %v2526_v23 = vsub.f32 %v2516_v15, %v2524_v21  ;;  %2529 = vadd.xlane.f32.xlu0 %v2527_v22  ;;  %v6209_v15 = vld [vmem:[#allocation24 + $0x40] sm:$0xff]  }
 0xe2b   :  { %v2528_v28 = vmul.f32 %v2526_v23, %v2526_v23  ;;  %5748 = vmatpush3.bf16.msra.mxu0 %v6208_v13 }
 0xe2c   :  { %5749 = vmatprep.subr.bf16.mxu0 %v6209_v15 }
 0xe2d   :  { %2531 = vadd.xlane.f32.xlu0 %v2528_v28 }
 0xe2f   :  { %5750 = vmatpush3.bf16.msra.mxu0 %v6210_v16 }
 0xe30   :  { %5949 = vmatprep.subr.bf16.mxu0 %v6806_v46 }
 0xeb2   :  { %v2530_v45 = vpop.xlane.xlu0 %2529 }
 0xeb3   :  { %v2533_v50 = vmul.f32 0.0078125, %v2530_v45 }
 0xeb5   :  { %v2535_v44 = vadd.f32 1e-05, %v2533_v50 }
 0xeb6   :  { %v2532_v51 = vpop.xlane.xlu0 %2531 }
 0xeb7   :  { %6327 = vrsqrt.f32 %v2535_v44  ;;  %v2534_v49 = vmul.f32 0.0078125, %v2532_v51 }
 0xeb9   :  { %v2536_v56 = vadd.f32 1e-05, %v2534_v49 }
 0xebb   :  { %6329 = vrsqrt.f32 %v2536_v56 }
 0xec4   :  { %v6328_v57 = vpop.eup %6327 }
 0xec5   :  { %v2539_v58 = vmul.f32 %v6328_v57, %v2525_v48 }
 0xec7   :  { %v2547_v38 = vmul.f32 %v5487_v53, %v2539_v58 }
 0xec8   :  { %v6330_v55 = vpop.eup %6329 }
 0xec9   :  { %v2540_v59 = vmul.f32 %v6330_v55, %v2526_v23  ;;  %v7665_v63 = vadd.f32 %v5488_v61, %v2547_v38 }
 0xecb   :  { %v2548_v62 = vmul.f32 %v5487_v53, %v2540_v59 }
 0xecd   :  { %v7667_v11 = vadd.f32 %v5488_v61, %v2548_v62 }
 0xecf   :  { %v2557_v0 = vpack.c.bf16 %v7667_v11, %v7665_v63 }
 0xed1   :  { %2699 = vmatmul.mubr.bf16.vlgmr.msra.gmra.mxu1 %v2557_v0 }
 0xed2   :  { %3177 = vmatprep.mubr.bf16.mxu1 %v6807_v5 }
 0xf91   :  { %v2700_v48 = vpop.f32.mrf.mxu1 }
 0xf92   :  { %v2701_v20 = vadd.f32 %v2700_v48, %v2579_v18 }
 0xf93   :  { %v2702_v21 = vpop.f32.mrf.mxu1 }
 0xf94   :  { %v2709_v22 = vmul.f32 %v2701_v20, %v2701_v20  ;;  %v2703_v23 = vadd.f32 %v2702_v21, %v2583_v19 }
 0xf95   :  { %v2704_v28 = vpop.f32.mrf.mxu1 }
 0xf96   :  { %v2713_v24 = vmul.f32 %v2709_v22, %v2701_v20  ;;  %v2710_v25 = vmul.f32 %v2703_v23, %v2703_v23  ;;  %v2705_v29 = vadd.f32 %v2704_v28, %v2579_v18  ;;  %v6211_v22 = vld [vmem:[#allocation14 + $0x168] ss:$12 sps:$4 sm:$0xff]   ;;  %v6214_v28 = vld [vmem:[#allocation14 + $0x170] ss:$12 sps:$4 sm:$0xff]  }
 0xf97   :  { %v2706_v26 = vpop.f32.mrf.mxu1 }
 0xf98   :  { %v2717_v27 = vmul.f32 0.044715, %v2713_v24  ;;  %v2714_v30 = vmul.f32 %v2710_v25, %v2703_v23  ;;  %v2711_v31 = vmul.f32 %v2705_v29, %v2705_v29  ;;  %v2707_v34 = vadd.f32 %v2706_v26, %v2583_v19 }
 0xf9a   :  { %v2721_v37 = vadd.f32 %v2717_v27, %v2701_v20  ;;  %v2718_v39 = vmul.f32 0.044715, %v2714_v30  ;;  %v2715_v40 = vmul.f32 %v2711_v31, %v2705_v29  ;;  %v2712_v41 = vmul.f32 %v2707_v34, %v2707_v34  ;;  %v6217_v31 = vld [vmem:[#allocation14 + $0x154] ss:$12 sps:$4 sm:$0xff]  }
 0xf9c   :  { %v2725_v42 = vmul.f32 0.7978846, %v2721_v37  ;;  %v2722_v43 = vadd.f32 %v2718_v39, %v2703_v23  ;;  %v2719_v45 = vmul.f32 0.044715, %v2715_v40  ;;  %v2716_v50 = vmul.f32 %v2712_v41, %v2707_v34  ;;  %v6218_v37 = vld [vmem:[#allocation14 + $0x158] ss:$12 sps:$4 sm:$0xff]  }
 0xf9d   :  { %v6221_v39 = vld [vmem:[#allocation14 + $0x13c] ss:$12 sps:$4 sm:$0xff]   ;;  %v6219_v40 = vld [vmem:[#allocation14 + $0x138] ss:$12 sps:$4 sm:$0xff]   ;;  %v6222_v41 = vld [vmem:[#allocation14 + $0x140] ss:$12 sps:$4 sm:$0xff]  }
 0xf9e   :  { %v2726_v44 = vmul.f32 0.7978846, %v2722_v43  ;;  %v2723_v51 = vadd.f32 %v2719_v45, %v2705_v29  ;;  %v2720_v49 = vmul.f32 0.044715, %v2716_v50  ;;  %6331 = vtanh.f32 %v2725_v42  ;;  %v6223_v42 = vld [vmem:[#allocation14 + $0x120] ss:$12 sps:$4 sm:$0xff]  }
 0xf9f   :  { %v6225_v43 = vld [vmem:[#allocation14 + $0x124] ss:$12 sps:$4 sm:$0xff]   ;;  %v6226_v45 = vld [vmem:[#allocation14 + $0x128] ss:$12 sps:$4 sm:$0xff]   ;;  %v6229_v50 = vld [vmem:[#allocation14 + $0x10c] ss:$12 sps:$4 sm:$0xff]  }
 0xfa0   :  { %6333 = vtanh.f32 %v2726_v44  ;;  %v2727_v56 = vmul.f32 0.7978846, %v2723_v51  ;;  %v2724_v57 = vadd.f32 %v2720_v49, %v2707_v34  ;;  %v6227_v44 = vld [vmem:[#allocation14 + $0x108] ss:$12 sps:$4 sm:$0xff]   ;;  %v6230_v51 = vld [vmem:[#allocation14 + $0x110] ss:$12 sps:$4 sm:$0xff]  }
 0xfa1   :  { %v6233_v49 = vld [vmem:[#allocation14 + $0xf4] ss:$12 sps:$4 sm:$0xff]  }
 0xfa2   :  { %6335 = vtanh.f32 %v2727_v56  ;;  %v2728_v58 = vmul.f32 0.7978846, %v2724_v57  ;;  %v6231_v56 = vld [vmem:[#allocation14 + $0xf0] ss:$12 sps:$4 sm:$0xff]   ;;  %v6234_v57 = vld [vmem:[#allocation14 + $0xf8] ss:$12 sps:$4 sm:$0xff]  }
 0xfa4   :  { %6337 = vtanh.f32 %v2728_v58  ;;  %v6237_v58 = vld [vmem:[#allocation14 + $0xdc] ss:$12 sps:$4 sm:$0xff]  }
 0xfab   :  { %v6332_v53 = vpop.eup %6331 }
 0xfac   :  { %v2733_v61 = vadd.f32 1.0, %v6332_v53  ;;  %v6235_v53 = vld [vmem:[#allocation14 + $0xd8] ss:$12 sps:$4 sm:$0xff]  }
 0xfad   :  { %v6334_v55 = vpop.eup %6333 }
 0xfae   :  { %v2734_v59 = vadd.f32 1.0, %v6334_v55  ;;  %v2737_v3 = vmul.f32 0.5, %v2733_v61  ;;  %v6238_v55 = vld [vmem:[#allocation14 + $0xe0] ss:$12 sps:$4 sm:$0xff]   ;;  %v6242_v61 = vld [vmem:[#allocation14 + $0xc8] ss:$12 sps:$4 sm:$0xff]  }
 0xfaf   :  { %v6336_v38 = vpop.eup %6335 }
 0xfb0   :  { %v2735_v62 = vadd.f32 1.0, %v6336_v38  ;;  %v2738_v54 = vmul.f32 0.5, %v2734_v59  ;;  %v2741_v9 = vmul.f32 %v2737_v3, %v2701_v20  ;;  %v6241_v59 = vld [vmem:[#allocation14 + $0xc4] ss:$12 sps:$4 sm:$0xff]   ;;  %v6239_v38 = vld [vmem:[#allocation14 + $0xc0] ss:$12 sps:$4 sm:$0xff]  }
 0xfb1   :  { %v6338_v0 = vpop.eup %6337 }
 0xfb2   :  { %v2739_v1 = vmul.f32 0.5, %v2735_v62  ;;  %v2736_v2 = vadd.f32 1.0, %v6338_v0  ;;  %v2742_v7 = vmul.f32 %v2738_v54, %v2703_v23  ;;  %v6213_v23 = vld [vmem:[#allocation14 + $0x16c] ss:$12 sps:$4 sm:$0xff]  }
 0xfb3   :  { %3145 = vmatprep.subr.bf16.mxu1 %v6213_v23 }
 0xfb4   :  { %v2740_v4 = vmul.f32 0.5, %v2736_v2  ;;  %v2743_v6 = vmul.f32 %v2739_v1, %v2705_v29  ;;  %3146 = vmatpush1.bf16.msra.mxu1 %v6211_v22 }
 0xfb5   :  { %3147 = vmatprep.subr.bf16.mxu1 %v6217_v31 }
 0xfb6   :  { %v2744_v8 = vmul.f32 %v2740_v4, %v2707_v34  ;;  %v2745_v10 = vpack.c.bf16 %v2743_v6, %v2741_v9  ;;  %v6215_v34 = vld [vmem:[#allocation14 + $0x150] ss:$12 sps:$4 sm:$0xff]  }
 0xfb8   :  { %v2746_v52 = vpack.c.bf16 %v2744_v8, %v2742_v7  ;;  %3148 = vmatpush1.bf16.msra.mxu1 %v6215_v34  ;;  %v5522_v7 = vld [vmem:[%s8007_s4] ss:$0 sm:$0xff] }
 0xfb9   :  { %3149 = vmatprep.subr.bf16.mxu1 %v6221_v39 }
 0xfba   :  { %2914 = vmatprep.mubr.bf16.mxu0 %v2746_v52 }
 0xfbb   :  { %2915 = vmatmul.mubr.bf16.vlgmr.msra.gmra.mxu0 %v2745_v10  ;;  %v5523_v10 = vld [vmem:[%s8008_s10] ss:$0 sm:$0xff] }
 0xfbc   :  { %5965 = vmatprep.mubr.msk.bf16.mxu0 %vm6808_vm7, %v6806_v46  ;;  %5950 = vmatpush3.bf16.msra.mxu0 %v6214_v28 }
 0xfbd   :  { %5951 = vmatprep.subr.bf16.mxu0 %v6806_v46  ;;  %3150 = vmatpush1.bf16.msra.mxu1 %v6219_v40 }
 0xfbe   :  { %3151 = vmatprep.subr.bf16.mxu1 %v6225_v43 }
 0xfc0   :  { %5952 = vmatpush3.bf16.msra.mxu0 %v6218_v37 }
 0xfc1   :  { %5953 = vmatprep.subr.bf16.mxu0 %v6806_v46  ;;  %3152 = vmatpush1.bf16.msra.mxu1 %v6223_v42 }
 0xfc2   :  { %3153 = vmatprep.subr.bf16.mxu1 %v6229_v50 }
 0xfc4   :  { %5954 = vmatpush3.bf16.msra.mxu0 %v6222_v41 }
 0xfc5   :  { %5955 = vmatprep.subr.bf16.mxu0 %v6806_v46  ;;  %3154 = vmatpush1.bf16.msra.mxu1 %v6227_v44 }
 0xfc6   :  { %3155 = vmatprep.subr.bf16.mxu1 %v6233_v49 }
 0xfc8   :  { %5956 = vmatpush3.bf16.msra.mxu0 %v6226_v45 }
 0xfc9   :  { %5957 = vmatprep.subr.bf16.mxu0 %v6806_v46  ;;  %3156 = vmatpush1.bf16.msra.mxu1 %v6231_v56 }
 0xfca   :  { %3157 = vmatprep.subr.bf16.mxu1 %v6237_v58 }
 0xfcc   :  { %5958 = vmatpush3.bf16.msra.mxu0 %v6230_v51 }
 0xfcd   :  { %5959 = vmatprep.subr.bf16.mxu0 %v6806_v46  ;;  %3158 = vmatpush1.bf16.msra.mxu1 %v6235_v53 }
 0xfce   :  { %3159 = vmatprep.subr.bf16.mxu1 %v6241_v59 }
 0xfd0   :  { %5960 = vmatpush3.bf16.msra.mxu0 %v6234_v57 }
 0xfd1   :  { %5961 = vmatprep.subr.bf16.mxu0 %v6806_v46  ;;  %3160 = vmatpush1.bf16.msra.mxu1 %v6239_v38 }
 0xfd2   :  { %5969 = vmatprep.subr.mxu1 %v6806_v46 }
 0xfd4   :  { %5962 = vmatpush3.bf16.msra.mxu0 %v6238_v55 }
 0xfd5   :  { %5963 = vmatprep.subr.bf16.mxu0 %v6806_v46 }
 0xfd8   :  { %5964 = vmatpush3.bf16.msra.mxu0 %v6242_v61 }
 0xfd9   :  { %6009 = vmatprep.subr.mxu0 %v6806_v46 }
0x107b   :  { %v5751_v12 = vpop.f32.mrf.mxu0 }
0x107d   :  { %v5752_v13 = vpop.f32.mrf.mxu0 }
0x107e   :  { %v5753_v15 = vadd.f32 %v5752_v13, %v5751_v12 }
0x107f   :  { %v5754_v16 = vpop.f32.mrf.mxu0 }
0x1080   :  { %v2917_v17 = vadd.f32 %v5753_v15, %v5505_v14 }
0x1081   :  { %v5755_v18 = vpop.f32.mrf.mxu0 }
0x1082   :  { %v5756_v19 = vadd.f32 %v5755_v18, %v5754_v16  ;;  %v2923_v48 = vadd.f32 %v2917_v17, %v7665_v63  ;;  %v3000_v16 = vld [vmem:[#allocation15 + $0x3] sm:$0x7] }
0x1083   :  { %v3009_v17 = vrot.slane %v3000_v16, %v7461_v33  ;;  %v3013_v22 = vrot.slane %v3000_v16, %v815_v36 }
0x1084   :  { %v2920_v21 = vadd.f32 %v5756_v19, %v5505_v14  ;;  %2927 = vadd.xlane.f32.xlu1 %v2923_v48 }
0x1086   :  { %v2924_v20 = vadd.f32 %v2920_v21, %v7667_v11 }
0x1088   :  { %2929 = vadd.xlane.f32.xlu0 %v2924_v20 }
0x110d   :  { %v2928_v24 = vpop.xlane.xlu1 %2927 }
0x110e   :  { %v2931_v25 = vmul.f32 0.0078125, %v2928_v24 }
0x1110   :  { %v7680_v29 = vsub.f32 %v2923_v48, %v2931_v25  ;;  %v3005_v48 = vrot.slane %v3000_v16, %v7464_v35 }
0x1111   :  { %v2930_v26 = vpop.xlane.xlu0 %2929 }
0x1112   :  { %v2932_v27 = vmul.f32 0.0078125, %v2930_v26  ;;  %v2935_v63 = vmul.f32 %v7680_v29, %v7680_v29 }
0x1114   :  { %v7684_v30 = vsub.f32 %v2924_v20, %v2932_v27  ;;  %2937 = vadd.xlane.f32.xlu1 %v2935_v63 }
0x1116   :  { %v2936_v11 = vmul.f32 %v7684_v30, %v7684_v30 }
0x1118   :  { %2939 = vadd.xlane.f32.xlu0 %v2936_v11 }
0x119d   :  { %v2938_v62 = vpop.xlane.xlu1 %2937 }
0x119e   :  { %v2941_v0 = vmul.f32 0.0078125, %v2938_v62 }
0x11a0   :  { %v2943_v1 = vadd.f32 1e-05, %v2941_v0 }
0x11a1   :  { %v2940_v2 = vpop.xlane.xlu0 %2939 }
0x11a2   :  { %6339 = vrsqrt.f32 %v2943_v1  ;;  %v2942_v54 = vmul.f32 0.0078125, %v2940_v2 }
0x11a4   :  { %v2944_v3 = vadd.f32 1e-05, %v2942_v54 }
0x11a6   :  { %6341 = vrsqrt.f32 %v2944_v3 }
0x11af   :  { %v6340_v4 = vpop.eup %6339 }
0x11b0   :  { %v2947_v6 = vmul.f32 %v6340_v4, %v7680_v29 }
0x11b2   :  { %v2955_v52 = vmul.f32 %v5522_v7, %v2947_v6 }
0x11b3   :  { %v6342_v8 = vpop.eup %6341 }
0x11b4   :  { %v2948_v9 = vmul.f32 %v6342_v8, %v7684_v30  ;;  %v7704_v14 = vadd.f32 %v5523_v10, %v2955_v52 }
0x11b6   :  { %v2956_v12 = vmul.f32 %v5522_v7, %v2948_v9 }
0x11b8   :  { %v7706_v13 = vadd.f32 %v5523_v10, %v2956_v12 }
0x11ba   :  { %v2965_v15 = vpack.c.bf16 %v7706_v13, %v7704_v14 }
0x11bc   :  { %3178 = vmatmul.mubr.bf16.vlgmr.msra.gmra.mxu1 %v2965_v15  ;;  %5966 = vmatmul.mubr.bf16.vlgmr.msra.gmra.mxu0 %v2965_v15 }
0x11bd   :  { %5971 = vmatprep.mubr.msk.f32.mxu1 %vm6808_vm7, %v6806_v46  ;;  %6011 = vmatprep.mubr.msk.f32.mxu0 %vm6808_vm7, %v6806_v46 }
0x127c   :  { %v3179_v18 = vpop.f32.mrf.mxu1  ;;  %v3222_v19 = vpop.f32.mrf.mxu0 }
0x127d   :  { %v7724_v29 = vadd.f32 %v3179_v18, %v3005_v48  ;;  %v7727_v63 = vadd.f32 %v3222_v19, %v3013_v22 }
0x127e   :  { %v3181_v21 = vpop.f32.mrf.mxu1  ;;  %v5967_v20 = vpop.f32.mrf.mxu0 }
0x127f   :  { %v7718_v23 = vadd.f32 %v3181_v21, %v3009_v17 }
0x1280   :  { %v3183_v28 = vpop.f32.mrf.mxu1  ;;  %v3225_v24 = vpop.f32.mrf.mxu0 }
0x1281   :  { %v7720_v25 = vadd.f32 %v3225_v24, %v3013_v22  ;;  %5970 = vmatpush3.xpose.msk.msra.mxu1 %vm1032_vm8, %v7718_v23  ;;  %v7736_v32 = vadd.f32 %v3183_v28, %v3005_v48 }
0x1282   :  { %v3185_v26 = vpop.f32.mrf.mxu1  ;;  %v5968_v27 = vpop.f32.mrf.mxu0  ;;  %5974 = vmatprep.subr.mxu1 %v6806_v46 }
0x1283   :  { %v7729_v30 = vadd.f32 %v3185_v26, %v3009_v17 }
0x1284   :  { %5972 = vmatmul.mubr.msk.f32.vlgmr.msra.gmra.mxu1 %vm1032_vm8, %v7724_v29 }
0x1285   :  { %5975 = vmatpush3.msra.mxu1 %v7727_v63  ;;  %6010 = vmatpush3.xpose.msk.msra.mxu0 %vm1032_vm8, %v7729_v30 }
0x1286   :  { %5976 = vmatprep.mubr.msk.f32.mxu1 %vm6808_vm7, %v6806_v46  ;;  %5979 = vmatprep.subr.mxu1 %v6806_v46 }
0x1287   :  { %6019 = vmatprep.subr.mxu0 %v6806_v46 }
0x1288   :  { %6012 = vmatmul.mubr.msk.f32.vlgmr.msra.gmra.mxu0 %vm1032_vm8, %v7736_v32 }
0x1289   :  { %6021 = vmatprep.mubr.msk.f32.mxu0 %vm6808_vm7, %v6806_v46 }
0x1344   :  { %v3301_v36 = vpop.f32.mrf.mxu1 }
0x1345   :  { %v3305_v11 = vmul.f32 0.17677669, %v3301_v36 }
0x1346   :  { %v5973_v31 = vpop.f32.mrf.mxu1 }
0x1347   :  { %v3306_v34 = vadd.f32 %v3305_v11, %v7506_v60 }
0x1348   :  { %v7747_v37 = vpop.f32.mrf.mxu0 }
0x1349   :  { %v3307_v39 = vsel %vm1115_vm9, %v3306_v34, -inf  ;;  %v3984_v26 = vmul.f32 0.17677669, %v7747_v37 }
0x134a   :  { %v6013_v40 = vpop.f32.mrf.mxu0  ;;  %3308 = vmax.xlane.f32.xlu1 %v3307_v39 }
0x134b   :  { %v3985_v27 = vadd.f32 %v3984_v26, %v7561_v47 }
0x135b   :  { %3393 = vrot.lane.b32.xlu1 %v7718_v23, %s6809_s0 }
0x13d3   :  { %v3309_v41 = vpop.xlane.xlu1 %3308 }
0x13d4   :  { %v3310_v42 = vsub.f32 %v3306_v34, %v3309_v41 }
0x13d6   :  { %v3311_v43 = vmul.f32 1.442695, %v3310_v42 }
0x13d7   :  { %v3394_v56 = vpop.permute.xlu1 %3393 }
0x13d8   :  { %6343 = vpow2.f32 %v3311_v43 }
0x13e5   :  { %v6344_v45 = vpop.eup %6343 }
0x13e6   :  { %v3313_v50 = vsel %vm1115_vm9, %v6344_v45, 0.0 }
0x13e7   :  { %3314 = vadd.xlane.f32.xlu0 %v3313_v50 }
0x13fd   :  { %3391 = vrot.lane.b32.xlu0 %v7724_v29, %s6809_s0 }
0x1470   :  { %v3315_v44 = vpop.xlane.xlu0 %3314 }
0x1471   :  { %6345 = vrcp.f32 %v3315_v44 }
0x1474   :  { %v3392_v57 = vpop.permute.xlu0 %3391 }
0x147e   :  { %v6346_v51 = vpop.eup %6345 }
0x147f   :  { %v3317_v49 = vmul.f32 %v6346_v51, %v6344_v45 }
0x1481   :  { %5977 = vmatmul.mubr.msk.f32.vlgmr.msra.gmra.mxu1 %vm1115_vm9, %v3317_v49 }
0x1482   :  { %5980 = vmatpush3.xpose.msk.msra.mxu1 %vm1032_vm8, %v3394_v56  ;;  %5981 = vmatprep.mubr.msk.f32.mxu1 %vm6808_vm7, %v6806_v46 }
0x1483   :  { %5984 = vmatprep.subr.mxu1 %v6806_v46 }
0x1485   :  { %5982 = vmatmul.mubr.msk.f32.vlgmr.msra.gmra.mxu1 %vm1032_vm8, %v3392_v57 }
0x1486   :  { %5986 = vmatprep.mubr.msk.f32.mxu1 %vm6808_vm7, %v6806_v46 }
0x1541   :  { %v7763_v58 = vpop.f32.mrf.mxu1 }
0x1543   :  { %v5978_v53 = vpop.f32.mrf.mxu1 }
0x1545   :  { %v3465_v55 = vpop.f32.mrf.mxu1 }
0x1546   :  { %v3469_v59 = vmul.f32 0.17677669, %v3465_v55 }
0x1547   :  { %v5983_v38 = vpop.f32.mrf.mxu1 }
0x1548   :  { %v3470_v61 = vadd.f32 %v3469_v59, %v7506_v60 }
0x154a   :  { %v3471_v62 = vsel %vm1115_vm9, %v3470_v61, -inf }
0x154b   :  { %3472 = vmax.xlane.f32.xlu1 %v3471_v62 }
0x155c   :  { %3483 = vrot.lane.b32.xlu1 %v7727_v63, %s6809_s0 }
0x1560   :  { %3559 = vrot.lane.b32.xlu1 %v7724_v29, %s8004_s13 }
0x15d4   :  { %v3473_v0 = vpop.xlane.xlu1 %3472 }
0x15d5   :  { %v3474_v1 = vsub.f32 %v3470_v61, %v3473_v0 }
0x15d7   :  { %v3475_v2 = vmul.f32 1.442695, %v3474_v1 }
0x15d8   :  { %v3484_v54 = vpop.permute.xlu1 %3483 }
0x15d9   :  { %6347 = vpow2.f32 %v3475_v2  ;;  %5985 = vmatpush3.msra.mxu1 %v3484_v54 }
0x15da   :  { %5989 = vmatprep.subr.mxu1 %v6806_v46 }
0x15dc   :  { %v3560_v52 = vpop.permute.xlu1 %3559 }
0x15e6   :  { %v6348_v3 = vpop.eup %6347 }
0x15e7   :  { %v3477_v4 = vsel %vm1115_vm9, %v6348_v3, 0.0 }
0x15e8   :  { %3478 = vadd.xlane.f32.xlu0 %v3477_v4 }
0x15fe   :  { %3561 = vrot.lane.b32.xlu0 %v7718_v23, %s8004_s13 }
0x1671   :  { %v3479_v6 = vpop.xlane.xlu0 %3478 }
0x1672   :  { %6349 = vrcp.f32 %v3479_v6 }
0x1675   :  { %v3562_v9 = vpop.permute.xlu0 %3561 }
0x167f   :  { %v6350_v7 = vpop.eup %6349 }
0x1680   :  { %v3481_v8 = vmul.f32 %v6350_v7, %v6348_v3 }
0x1682   :  { %5987 = vmatmul.mubr.msk.f32.vlgmr.msra.gmra.mxu1 %vm1115_vm9, %v3481_v8 }
0x1683   :  { %5990 = vmatpush3.xpose.msk.msra.mxu1 %vm1032_vm8, %v3562_v9  ;;  %5991 = vmatprep.mubr.msk.f32.mxu1 %vm6808_vm7, %v6806_v46 }
0x1684   :  { %5994 = vmatprep.subr.mxu1 %v6806_v46 }
0x1686   :  { %5992 = vmatmul.mubr.msk.f32.vlgmr.msra.gmra.mxu1 %vm1032_vm8, %v3560_v52 }
0x1687   :  { %5996 = vmatprep.mubr.msk.f32.mxu1 %vm6808_vm7, %v6806_v46 }
0x1742   :  { %v7783_v10 = vpop.f32.mrf.mxu1 }
0x1744   :  { %v5988_v12 = vpop.f32.mrf.mxu1 }
0x1746   :  { %v3633_v15 = vpop.f32.mrf.mxu1 }
0x1747   :  { %v3637_v16 = vmul.f32 0.17677669, %v3633_v15 }
0x1748   :  { %v5993_v17 = vpop.f32.mrf.mxu1 }
0x1749   :  { %v3638_v18 = vadd.f32 %v3637_v16, %v7506_v60 }
0x174b   :  { %v3639_v19 = vsel %vm1115_vm9, %v3638_v18, -inf }
0x174c   :  { %3640 = vmax.xlane.f32.xlu1 %v3639_v19 }
0x175d   :  { %3728 = vrot.lane.b32.xlu1 %v7718_v23, %s8005_s20 }
0x1761   :  { %3726 = vrot.lane.b32.xlu1 %v7724_v29, %s8005_s20 }
0x1765   :  { %4072 = vrot.lane.b32.xlu1 %v7729_v30, %s6809_s0 }
0x1769   :  { %4240 = vrot.lane.b32.xlu1 %v7729_v30, %s8004_s13 }
0x176d   :  { %4407 = vrot.lane.b32.xlu1 %v7729_v30, %s8005_s20  ;;  %v3986_v30 = vsel %vm1115_vm9, %v3985_v27, -inf }
0x17d5   :  { %v3641_v48 = vpop.xlane.xlu1 %3640 }
0x17d6   :  { %v3642_v21 = vsub.f32 %v3638_v18, %v3641_v48 }
0x17d8   :  { %v3643_v20 = vmul.f32 1.442695, %v3642_v21 }
0x17d9   :  { %v3729_v22 = vpop.permute.xlu1 %3728 }
0x17da   :  { %6351 = vpow2.f32 %v3643_v20 }
0x17dd   :  { %v3727_v28 = vpop.permute.xlu1 %3726 }
0x17e1   :  { %v4073_v24 = vpop.permute.xlu1 %4072 }
0x17e2   :  { %6020 = vmatpush3.xpose.msk.msra.mxu0 %vm1032_vm8, %v4073_v24 }
0x17e3   :  { %6029 = vmatprep.subr.mxu0 %v6806_v46 }
0x17e5   :  { %v4241_v31 = vpop.permute.xlu1 %4240 }
0x17e7   :  { %v6352_v23 = vpop.eup %6351 }
0x17e8   :  { %v3645_v29 = vsel %vm1115_vm9, %v6352_v23, 0.0 }
0x17e9   :  { %3646 = vadd.xlane.f32.xlu0 %v3645_v29  ;;  %v4408_v37 = vpop.permute.xlu1 %4407 }
0x17ff   :  { %3650 = vrot.lane.b32.xlu0 %v7727_v63, %s8004_s13 }
0x1803   :  { %4070 = vrot.lane.b32.xlu0 %v7736_v32, %s6809_s0 }
0x1807   :  { %4238 = vrot.lane.b32.xlu0 %v7736_v32, %s8004_s13 }
0x180b   :  { %4405 = vrot.lane.b32.xlu0 %v7736_v32, %s8005_s20 }
0x182a   :  { %3987 = vmax.xlane.f32.xlu0 %v3986_v30 }
0x1872   :  { %v3647_v36 = vpop.xlane.xlu0 %3646 }
0x1873   :  { %6353 = vrcp.f32 %v3647_v36 }
0x1876   :  { %v3651_v11 = vpop.permute.xlu0 %3650 }
0x1877   :  { %5995 = vmatpush3.msra.mxu1 %v3651_v11 }
0x1878   :  { %5999 = vmatprep.subr.mxu1 %v6806_v46 }
0x187a   :  { %v4071_v34 = vpop.permute.xlu0 %4070 }
0x187b   :  { %6022 = vmatmul.mubr.msk.f32.vlgmr.msra.gmra.mxu0 %vm1032_vm8, %v4071_v34 }
0x187c   :  { %6030 = vmatpush3.xpose.msk.msra.mxu0 %vm1032_vm8, %v4241_v31  ;;  %6031 = vmatprep.mubr.msk.f32.mxu0 %vm6808_vm7, %v6806_v46 }
0x187d   :  { %6039 = vmatprep.subr.mxu0 %v6806_v46 }
0x187e   :  { %v4239_v32 = vpop.permute.xlu0 %4238 }
0x187f   :  { %6032 = vmatmul.mubr.msk.f32.vlgmr.msra.gmra.mxu0 %vm1032_vm8, %v4239_v32 }
0x1880   :  { %v6354_v39 = vpop.eup %6353  ;;  %6040 = vmatpush3.xpose.msk.msra.mxu0 %vm1032_vm8, %v4408_v37  ;;  %6041 = vmatprep.mubr.msk.f32.mxu0 %vm6808_vm7, %v6806_v46 }
0x1881   :  { %v3649_v40 = vmul.f32 %v6354_v39, %v6352_v23  ;;  %6049 = vmatprep.subr.bf16.mxu0 %v6806_v46 }
0x1882   :  { %v4406_v41 = vpop.permute.xlu0 %4405 }
0x1883   :  { %5997 = vmatmul.mubr.msk.f32.vlgmr.msra.gmra.mxu1 %vm1115_vm9, %v3649_v40  ;;  %6042 = vmatmul.mubr.msk.f32.vlgmr.msra.gmra.mxu0 %vm1032_vm8, %v4406_v41 }
0x1884   :  { %6000 = vmatpush3.xpose.msk.msra.mxu1 %vm1032_vm8, %v3729_v22  ;;  %6001 = vmatprep.mubr.msk.f32.mxu1 %vm6808_vm7, %v6806_v46 }
0x1885   :  { %6004 = vmatprep.subr.mxu1 %v6806_v46  ;;  %6065 = vmatprep.mubr.msk.bf16.mxu0 %vm6808_vm7, %v6806_v46 }
0x1887   :  { %6002 = vmatmul.mubr.msk.f32.vlgmr.msra.gmra.mxu1 %vm1032_vm8, %v3727_v28 }
0x1888   :  { %6006 = vmatprep.mubr.msk.f32.mxu1 %vm6808_vm7, %v6806_v46 }
0x18b3   :  { %v3988_v42 = vpop.xlane.xlu0 %3987 }
0x18b4   :  { %v3989_v45 = vsub.f32 %v3985_v27, %v3988_v42 }
0x18b6   :  { %v3990_v56 = vmul.f32 1.442695, %v3989_v45 }
0x18b8   :  { %6355 = vpow2.f32 %v3990_v56 }
0x18c5   :  { %v6356_v52 = vpop.eup %6355 }
0x18c6   :  { %v3992_v12 = vsel %vm1115_vm9, %v6356_v52, 0.0 }
0x193b   :  { %v4144_v43 = vpop.f32.mrf.mxu0 }
0x193c   :  { %v4148_v50 = vmul.f32 0.17677669, %v4144_v43 }
0x193d   :  { %v6023_v44 = vpop.f32.mrf.mxu0 }
0x193e   :  { %v4149_v51 = vadd.f32 %v4148_v50, %v7561_v47 }
0x193f   :  { %v4312_v49 = vpop.f32.mrf.mxu0 }
0x1940   :  { %v4316_v57 = vmul.f32 0.17677669, %v4312_v49  ;;  %v4150_v53 = vsel %vm1115_vm9, %v4149_v51, -inf }
0x1941   :  { %4151 = vmax.xlane.f32.xlu0 %v4150_v53  ;;  %v6033_v55 = vpop.f32.mrf.mxu0 }
0x1942   :  { %v4317_v59 = vadd.f32 %v4316_v57, %v7561_v47  ;;  %v6243_v55 = vld [vmem:[#allocation17 + $0x78] sm:$0xff]  }
0x1943   :  { %v7836_v38 = vpop.f32.mrf.mxu1  ;;  %v4479_v61 = vpop.f32.mrf.mxu0  ;;  %6050 = vmatpush3.bf16.msra.mxu0 %v6243_v55  ;;  %v6265_v55 = vld [vmem:[#allocation21 + $0xb4] ss:$8 sps:$4 sm:$0xff]  }
0x1944   :  { %v4318_v62 = vsel %vm1115_vm9, %v4317_v59, -inf  ;;  %v4483_v54 = vmul.f32 0.17677669, %v4479_v61  ;;  %6051 = vmatprep.subr.bf16.mxu0 %v6806_v46  ;;  %v6245_v61 = vld [vmem:[#allocation17 + $0x68] sm:$0xff]  }
0x1945   :  { %4319 = vmax.xlane.f32.xlu0 %v4318_v62  ;;  %v5998_v0 = vpop.f32.mrf.mxu1  ;;  %v6043_v1 = vpop.f32.mrf.mxu0  ;;  %v6246_v62 = vld [vmem:[#allocation17 + $0x60] sm:$0xff]  }
0x1946   :  { %v4484_v8 = vadd.f32 %v4483_v54, %v7561_v47  ;;  %v6247_v0 = vld [vmem:[#allocation17 + $0x58] sm:$0xff]   ;;  %v6249_v54 = vld [vmem:[#allocation17 + $0x48] sm:$0xff]  }
0x1947   :  { %v3800_v2 = vpop.f32.mrf.mxu1 }
0x1948   :  { %v3804_v3 = vmul.f32 0.17677669, %v3800_v2  ;;  %v4485_v9 = vsel %vm1115_vm9, %v4484_v8, -inf }
0x1949   :  { %v6003_v4 = vpop.f32.mrf.mxu1 }
0x194a   :  { %v3805_v6 = vadd.f32 %v3804_v3, %v7506_v60 }
0x194c   :  { %v3806_v7 = vsel %vm1115_vm9, %v3805_v6, -inf }
0x194d   :  { %3807 = vmax.xlane.f32.xlu1 %v3806_v7 }
0x1951   :  { %4486 = vmax.xlane.f32.xlu1 %v4485_v9 }
0x1955   :  { %3993 = vadd.xlane.f32.xlu1 %v3992_v12 }
0x19ca   :  { %v4152_v15 = vpop.xlane.xlu0 %4151 }
0x19cb   :  { %v4153_v16 = vsub.f32 %v4149_v51, %v4152_v15 }
0x19cd   :  { %v4154_v17 = vmul.f32 1.442695, %v4153_v16 }
0x19ce   :  { %v4320_v18 = vpop.xlane.xlu0 %4319 }
0x19cf   :  { %6357 = vpow2.f32 %v4154_v17  ;;  %v4321_v19 = vsub.f32 %v4317_v59, %v4320_v18  ;;  %v6244_v59 = vld [vmem:[#allocation17 + $0x70] sm:$0xff]  }
0x19d0   :  { %6052 = vmatpush3.bf16.msra.mxu0 %v6244_v59  ;;  %v6263_v59 = vld [vmem:[#allocation21 + $0xb0] ss:$8 sps:$4 sm:$0xff]  }
0x19d1   :  { %v4322_v48 = vmul.f32 1.442695, %v4321_v19  ;;  %6053 = vmatprep.subr.bf16.mxu0 %v6806_v46 }
0x19d3   :  { %6359 = vpow2.f32 %v4322_v48 }
0x19d4   :  { %6054 = vmatpush3.bf16.msra.mxu0 %v6245_v61  ;;  %v6268_v61 = vld [vmem:[#allocation21 + $0xa4] ss:$8 sps:$4 sm:$0xff]  }
0x19d5   :  { %6055 = vmatprep.subr.bf16.mxu0 %v6806_v46 }
0x19d6   :  { %v3808_v60 = vpop.xlane.xlu1 %3807 }
0x19d7   :  { %v3809_v21 = vsub.f32 %v3805_v6, %v3808_v60  ;;  %v6250_v6 = vld [vmem:[#allocation17 + $0x40] sm:$0xff]  }
0x19d8   :  { %6056 = vmatpush3.bf16.msra.mxu0 %v6246_v62  ;;  %v6266_v62 = vld [vmem:[#allocation21 + $0xa0] ss:$8 sps:$4 sm:$0xff]  }
0x19d9   :  { %v3810_v20 = vmul.f32 1.442695, %v3809_v21  ;;  %6057 = vmatprep.subr.bf16.mxu0 %v6806_v46 }
0x19da   :  { %v4487_v47 = vpop.xlane.xlu1 %4486 }
0x19db   :  { %6361 = vpow2.f32 %v3810_v20  ;;  %v4488_v22 = vsub.f32 %v4484_v8, %v4487_v47 }
0x19dc   :  { %v6358_v28 = vpop.eup %6357  ;;  %6058 = vmatpush3.bf16.msra.mxu0 %v6247_v0  ;;  %v6271_v0 = vld [vmem:[#allocation21 + $0x94] ss:$8 sps:$4 sm:$0xff]  }
0x19dd   :  { %v4489_v24 = vmul.f32 1.442695, %v4488_v22  ;;  %v4156_v23 = vsel %vm1115_vm9, %v6358_v28, 0.0  ;;  %6059 = vmatprep.subr.bf16.mxu0 %v6806_v46 }
0x19de   :  { %4157 = vadd.xlane.f32.xlu0 %v4156_v23  ;;  %v3994_v31 = vpop.xlane.xlu1 %3993 }
0x19df   :  { %6363 = vpow2.f32 %v4489_v24 }
0x19e0   :  { %v6360_v29 = vpop.eup %6359 }
0x19e1   :  { %v4324_v26 = vsel %vm1115_vm9, %v6360_v29, 0.0 }
0x19e2   :  { %4325 = vadd.xlane.f32.xlu1 %v4324_v26 }
0x19e8   :  { %v6362_v27 = vpop.eup %6361 }
0x19e9   :  { %v3812_v30 = vsel %vm1115_vm9, %v6362_v27, 0.0 }
0x19ea   :  { %3813 = vadd.xlane.f32.xlu0 %v3812_v30  ;;  %v5572_v30 = vld [vmem:[#allocation18 + $0x1] ss:$0 sm:$0xff] }
0x19ec   :  { %v6364_v36 = vpop.eup %6363 }
0x19ed   :  { %v4491_v11 = vsel %vm1115_vm9, %v6364_v36, 0.0 }
0x19ee   :  { %4492 = vadd.xlane.f32.xlu0 %v4491_v11 }
0x19f3   :  { %3817 = vrot.lane.b32.xlu1 %v7727_v63, %s8005_s20 }
0x19f7   :  { %4329 = vrot.lane.b32.xlu1 %v7720_v25, %s8004_s13 }
0x19fb   :  { %4496 = vrot.lane.b32.xlu1 %v7720_v25, %s8005_s20 }
0x1a04   :  { %4162 = vrot.lane.b32.xlu0 %v7720_v25, %s6809_s0 }
0x1a67   :  { %v4158_v32 = vpop.xlane.xlu0 %4157 }
0x1a6b   :  { %v4326_v34 = vpop.xlane.xlu1 %4325 }
0x1a6f   :  { %v3818_v37 = vpop.permute.xlu1 %3817 }
0x1a70   :  { %6005 = vmatpush3.msra.mxu1 %v3818_v37 }
0x1a71   :  { %6014 = vmatprep.subr.mxu1 %v6806_v46 }
0x1a73   :  { %v3814_v39 = vpop.xlane.xlu0 %3813  ;;  %v4330_v44 = vpop.permute.xlu1 %4329 }
0x1a74   :  { %6365 = vrcp.f32 %v3814_v39 }
0x1a75   :  { %6367 = vrcp.f32 %v3994_v31 }
0x1a76   :  { %6369 = vrcp.f32 %v4158_v32 }
0x1a77   :  { %6371 = vrcp.f32 %v4326_v34  ;;  %v4493_v63 = vpop.xlane.xlu0 %4492  ;;  %v4497_v57 = vpop.permute.xlu1 %4496 }
0x1a78   :  { %6373 = vrcp.f32 %v4493_v63  ;;  %v6251_v63 = vld [vmem:[#allocation21 + $0xf0] ss:$8 sps:$4 sm:$0xff]  }
0x1a7b   :  { %v4163_v50 = vpop.permute.xlu0 %4162 }
0x1a81   :  { %v6366_v40 = vpop.eup %6365 }
0x1a82   :  { %v3816_v41 = vmul.f32 %v6366_v40, %v6362_v27  ;;  %v6368_v42 = vpop.eup %6367  ;;  %v6253_v40 = vld [vmem:[#allocation21 + $0xf4] ss:$8 sps:$4 sm:$0xff]  }
0x1a83   :  { %v3996_v43 = vmul.f32 %v6368_v42, %v6356_v52  ;;  %v6370_v45 = vpop.eup %6369 }
0x1a84   :  { %6007 = vmatmul.mubr.msk.f32.vlgmr.msra.gmra.mxu1 %vm1115_vm9, %v3816_v41  ;;  %v4160_v51 = vmul.f32 %v6370_v45, %v6358_v28  ;;  %v6372_v49 = vpop.eup %6371 }
0x1a85   :  { %6015 = vmatpush3.msra.mxu1 %v7720_v25  ;;  %6016 = vmatprep.mubr.msk.f32.mxu1 %vm6808_vm7, %v6806_v46  ;;  %v4328_v25 = vmul.f32 %v6372_v49, %v6360_v29  ;;  %v6374_v56 = vpop.eup %6373  ;;  %v6256_v49 = vld [vmem:[#allocation21 + $0xe4] ss:$8 sps:$4 sm:$0xff]  }
0x1a86   :  { %6024 = vmatprep.subr.mxu1 %v6806_v46  ;;  %v4495_v53 = vmul.f32 %v6374_v56, %v6364_v36  ;;  %v6257_v56 = vld [vmem:[#allocation21 + $0xd0] ss:$8 sps:$4 sm:$0xff]  }
0x1a88   :  { %6017 = vmatmul.mubr.msk.f32.vlgmr.msra.gmra.mxu1 %vm1115_vm9, %v3996_v43 }
0x1a89   :  { %6025 = vmatpush3.msra.mxu1 %v4163_v50  ;;  %6026 = vmatprep.mubr.msk.f32.mxu1 %vm6808_vm7, %v6806_v46 }
0x1a8a   :  { %6034 = vmatprep.subr.mxu1 %v6806_v46 }
0x1a8c   :  { %6027 = vmatmul.mubr.msk.f32.vlgmr.msra.gmra.mxu1 %vm1115_vm9, %v4160_v51 }
0x1a8d   :  { %6035 = vmatpush3.msra.mxu1 %v4330_v44  ;;  %6036 = vmatprep.mubr.msk.f32.mxu1 %vm6808_vm7, %v6806_v46 }
0x1a8e   :  { %6044 = vmatprep.subr.mxu1 %v6806_v46 }
0x1a90   :  { %6037 = vmatmul.mubr.msk.f32.vlgmr.msra.gmra.mxu1 %vm1115_vm9, %v4328_v25  ;;  %v6254_v25 = vld [vmem:[#allocation21 + $0xe0] ss:$8 sps:$4 sm:$0xff]  }
0x1a91   :  { %6045 = vmatpush3.msra.mxu1 %v4497_v57  ;;  %6046 = vmatprep.mubr.msk.f32.mxu1 %vm6808_vm7, %v6806_v46  ;;  %v6260_v57 = vld [vmem:[#allocation21 + $0xc0] ss:$8 sps:$4 sm:$0xff]  }
0x1a92   :  { %4857 = vmatprep.subr.bf16.mxu1 %v6253_v40 }
0x1a94   :  { %6047 = vmatmul.mubr.msk.f32.vlgmr.msra.gmra.mxu1 %vm1115_vm9, %v4495_v53  ;;  %v6262_v53 = vld [vmem:[#allocation21 + $0xc4] ss:$8 sps:$4 sm:$0xff]  }
0x1a95   :  { %4889 = vmatprep.mubr.bf16.mxu1 %v6807_v5  ;;  %v6248_v5 = vld [vmem:[#allocation17 + $0x50] sm:$0xff]   ;;  %4858 = vmatpush1.bf16.msra.mxu1 %v6251_v63 }
0x1a96   :  { %6060 = vmatpush3.bf16.msra.mxu0 %v6248_v5  ;;  %4859 = vmatprep.subr.bf16.mxu1 %v6256_v49  ;;  %v6269_v5 = vld [vmem:[#allocation21 + $0x90] ss:$8 sps:$4 sm:$0xff]  }
0x1a97   :  { %6061 = vmatprep.subr.bf16.mxu0 %v6806_v46 }
0x1a99   :  { %4860 = vmatpush1.bf16.msra.mxu1 %v6254_v25 }
0x1a9a   :  { %6062 = vmatpush3.bf16.msra.mxu0 %v6249_v54 }
0x1a9b   :  { %6063 = vmatprep.subr.bf16.mxu0 %v6806_v46 }
0x1a9e   :  { %6064 = vmatpush3.bf16.msra.mxu0 %v6250_v6 }
0x1b44   :  { %v3889_v1 = vpop.f32.mrf.mxu1 }
0x1b46   :  { %v6008_v2 = vpop.f32.mrf.mxu1 }
0x1b47   :  { %v6272_v2 = vld [vmem:[#allocation21 + $0x80] ss:$8 sps:$4 sm:$0xff]  }
0x1b48   :  { %v4066_v3 = vpop.f32.mrf.mxu1 }
0x1b4a   :  { %v6018_v4 = vpop.f32.mrf.mxu1 }
0x1b4c   :  { %v4234_v7 = vpop.f32.mrf.mxu1 }
0x1b4d   :  { %v6116_v8 = vpack.i.bf16 %v4234_v7, %v7783_v10 }
0x1b4e   :  { %v6028_v9 = vpop.f32.mrf.mxu1 }
0x1b4f   :  { %6117 = vrot.lane.b32.xlu1 %v6116_v8, %s8005_s20 }
0x1b50   :  { %v4401_v52 = vpop.f32.mrf.mxu1 }
0x1b51   :  { %v6121_v12 = vpack.i.bf16 %v4401_v52, %v7836_v38 }
0x1b52   :  { %v6038_v15 = vpop.f32.mrf.mxu1 }
0x1b53   :  { %6122 = vrot.lane.b32.xlu0 %v6121_v12, %s8004_s13  ;;  %v5582_v12 = vld [vmem:[%s8006_s18 + $0x1] ss:$0 sm:$0xff] }
0x1b54   :  { %v4568_v16 = vpop.f32.mrf.mxu1 }
0x1b55   :  { %v6126_v17 = vpack.i.bf16 %v4568_v16, %v3889_v1  ;;  %v6274_v1 = vld [vmem:[#allocation21 + $0x84] ss:$8 sps:$4 sm:$0xff]  }
0x1b56   :  { %v6048_v18 = vpop.f32.mrf.mxu1 }
0x1b57   :  { %6127 = vrot.lane.b32.xlu1 %v6126_v17, %s6809_s0  ;;  %v5583_v18 = vld [vmem:[#allocation20 + $0x1] ss:$0 sm:$0xff] }
0x1bc1   :  { %v6118_v46 = vpop.permute.xlu1 %6117 }
0x1bc2   :  { %v6120_v48 = vunpack.i.h.bf16 %v6118_v46  ;;  %v6119_v60 = vunpack.i.l.bf16 %v6118_v46 }
0x1bc4   :  { %v4584_v47 = vsel %vm1032_vm8, %v4066_v3, %v6120_v48  ;;  %v3905_v38 = vsel %vm1032_vm8, %v7763_v58, %v6119_v60 }
0x1bc5   :  { %v6123_v19 = vpop.permute.xlu0 %6122 }
0x1bc6   :  { %v6125_v10 = vunpack.i.h.bf16 %v6123_v19  ;;  %v6124_v21 = vunpack.i.l.bf16 %v6123_v19 }
0x1bc8   :  { %v4585_v24 = vsel %vm1715_vm10, %v4584_v47, %v6125_v10  ;;  %v3906_v23 = vsel %vm1715_vm10, %v3905_v38, %v6124_v21  ;;  %v6275_v10 = vld [vmem:[#allocation24 + $0xf8] sm:$0xff]   ;;  %v6278_v47 = vld [vmem:[#allocation24 + $0xb0] sm:$0xff]   ;;  %v6279_v38 = vld [vmem:[#allocation24 + $0xe8] sm:$0xff]  }
0x1bc9   :  { %v6128_v20 = vpop.permute.xlu1 %6127  ;;  %v6276_v21 = vld [vmem:[#allocation24 + $0xb8] sm:$0xff]   ;;  %5807 = vmatprep.subr.bf16.mxu0 %v6275_v10 }
0x1bca   :  { %v6130_v22 = vunpack.i.h.bf16 %v6128_v20  ;;  %v6129_v28 = vunpack.i.l.bf16 %v6128_v20  ;;  %v6277_v20 = vld [vmem:[#allocation24 + $0xf0] sm:$0xff]  }
0x1bcc   :  { %v4586_v29 = vsel %vm1717_vm11, %v4585_v24, %v6130_v22  ;;  %v3907_v26 = vsel %vm1717_vm11, %v3906_v23, %v6129_v28  ;;  %v6280_v22 = vld [vmem:[#allocation24 + $0xa8] sm:$0xff]   ;;  %v6281_v28 = vld [vmem:[#allocation24 + $0xe0] sm:$0xff]   ;;  %v6283_v23 = vld [vmem:[#allocation24 + $0xd8] sm:$0xff]  }
0x1bcd   :  { %v4587_v27 = vpack.c.bf16 %v4586_v29, %v3907_v26  ;;  %v6282_v24 = vld [vmem:[#allocation24 + $0xa0] sm:$0xff]   ;;  %v6284_v29 = vld [vmem:[#allocation24 + $0x98] sm:$0xff]   ;;  %v6285_v26 = vld [vmem:[#allocation24 + $0xd0] sm:$0xff]  }
0x1bcf   :  { %6066 = vmatmul.mubr.bf16.vlgmr.msra.gmra.mxu0 %v4587_v27  ;;  %v6286_v27 = vld [vmem:[#allocation24 + $0x90] sm:$0xff]  }
0x1bd0   :  { %5808 = vmatpush3.bf16.msra.mxu0 %v6276_v21 }
0x1bd1   :  { %5809 = vmatprep.subr.bf16.mxu0 %v6277_v20 }
0x1bd4   :  { %5810 = vmatpush3.bf16.msra.mxu0 %v6278_v47 }
0x1bd5   :  { %5811 = vmatprep.subr.bf16.mxu0 %v6279_v38  ;;  %v5600_v38 = vld [vmem:[#allocation26 + $0x1] ss:$0 sm:$0xff] }
0x1bd8   :  { %5812 = vmatpush3.bf16.msra.mxu0 %v6280_v22 }
0x1bd9   :  { %5813 = vmatprep.subr.bf16.mxu0 %v6281_v28 }
0x1bdc   :  { %5814 = vmatpush3.bf16.msra.mxu0 %v6282_v24 }
0x1bdd   :  { %5815 = vmatprep.subr.bf16.mxu0 %v6283_v23 }
0x1be0   :  { %5816 = vmatpush3.bf16.msra.mxu0 %v6284_v29 }
0x1be1   :  { %5817 = vmatprep.subr.bf16.mxu0 %v6285_v26 }
0x1be4   :  { %5818 = vmatpush3.bf16.msra.mxu0 %v6286_v27 }
0x1c8f   :  { %v4695_v36 = vpop.f32.mrf.mxu0 }
0x1c90   :  { %v4696_v11 = vadd.f32 %v5572_v30, %v4695_v36  ;;  %v6288_v36 = vld [vmem:[#allocation24 + $0x88] sm:$0xff]  }
0x1c91   :  { %v6067_v31 = vpop.f32.mrf.mxu0 }
0x1c92   :  { %v4702_v34 = vadd.f32 %v4696_v11, %v7704_v14  ;;  %v6289_v11 = vld [vmem:[#allocation24 + $0xc0] sm:$0xff]  }
0x1c93   :  { %v4698_v32 = vpop.f32.mrf.mxu0  ;;  %v6290_v31 = vld [vmem:[#allocation24 + $0x80] sm:$0xff]  }
0x1c94   :  { %v4699_v58 = vadd.f32 %v5572_v30, %v4698_v32  ;;  %4708 = vadd.xlane.f32.xlu0 %v4702_v34  ;;  %v6287_v30 = vld [vmem:[#allocation24 + $0xc8] sm:$0xff]  }
0x1c95   :  { %v6068_v37 = vpop.f32.mrf.mxu0  ;;  %5819 = vmatprep.subr.bf16.mxu0 %v6287_v30 }
0x1c96   :  { %v4703_v39 = vadd.f32 %v4699_v58, %v7706_v13  ;;  %v6259_v13 = vld [vmem:[#allocation21 + $0xd4] ss:$8 sps:$4 sm:$0xff]   ;;  %5820 = vmatpush3.bf16.msra.mxu0 %v6288_v36 }
0x1c97   :  { %4861 = vmatprep.subr.bf16.mxu1 %v6259_v13  ;;  %5821 = vmatprep.subr.bf16.mxu0 %v6289_v11 }
0x1c98   :  { %4710 = vadd.xlane.f32.xlu1 %v4703_v39  ;;  %4862 = vmatpush1.bf16.msra.mxu1 %v6257_v56 }
0x1c99   :  { %4863 = vmatprep.subr.bf16.mxu1 %v6262_v53 }
0x1c9a   :  { %5822 = vmatpush3.bf16.msra.mxu0 %v6290_v31 }
0x1c9c   :  { %4864 = vmatpush1.bf16.msra.mxu1 %v6260_v57 }
0x1c9d   :  { %4865 = vmatprep.subr.bf16.mxu1 %v6265_v55 }
0x1ca0   :  { %4866 = vmatpush1.bf16.msra.mxu1 %v6263_v59 }
0x1ca1   :  { %4867 = vmatprep.subr.bf16.mxu1 %v6268_v61 }
0x1ca4   :  { %4868 = vmatpush1.bf16.msra.mxu1 %v6266_v62 }
0x1ca5   :  { %4869 = vmatprep.subr.bf16.mxu1 %v6271_v0 }
0x1ca8   :  { %4870 = vmatpush1.bf16.msra.mxu1 %v6269_v5 }
0x1ca9   :  { %4871 = vmatprep.subr.bf16.mxu1 %v6274_v1 }
0x1cac   :  { %4872 = vmatpush1.bf16.msra.mxu1 %v6272_v2 }
0x1d1d   :  { %v4709_v41 = vpop.xlane.xlu0 %4708 }
0x1d1e   :  { %v4712_v42 = vmul.f32 0.0078125, %v4709_v41 }
0x1d20   :  { %v4714_v43 = vsub.f32 %v4702_v34, %v4712_v42  ;;  %v4765_v34 = vld [vmem:[#allocation23 + $0x2] sm:$0x3] }
0x1d21   :  { %v4711_v45 = vpop.xlane.xlu1 %4710  ;;  %v4770_v32 = vrot.slane %v4765_v34, %v7464_v35  ;;  %v4774_v58 = vrot.slane %v4765_v34, %v7461_v33 }
0x1d22   :  { %v4713_v50 = vmul.f32 0.0078125, %v4711_v45  ;;  %v4716_v44 = vmul.f32 %v4714_v43, %v4714_v43 }
0x1d24   :  { %v4715_v51 = vsub.f32 %v4703_v39, %v4713_v50  ;;  %4718 = vadd.xlane.f32.xlu0 %v4716_v44 }
0x1d26   :  { %v4717_v14 = vmul.f32 %v4715_v51, %v4715_v51 }
0x1d28   :  { %4720 = vadd.xlane.f32.xlu0 %v4717_v14 }
0x1dad   :  { %v4719_v54 = vpop.xlane.xlu0 %4718 }
0x1dae   :  { %v4722_v3 = vmul.f32 0.0078125, %v4719_v54 }
0x1db0   :  { %v4724_v4 = vadd.f32 1e-05, %v4722_v3 }
0x1db1   :  { %v4721_v6 = vpop.xlane.xlu0 %4720 }
0x1db2   :  { %6375 = vrsqrt.f32 %v4724_v4  ;;  %v4723_v7 = vmul.f32 0.0078125, %v4721_v6 }
0x1db4   :  { %v4725_v8 = vadd.f32 1e-05, %v4723_v7 }
0x1db6   :  { %6377 = vrsqrt.f32 %v4725_v8 }
0x1dbf   :  { %v6376_v9 = vpop.eup %6375 }
0x1dc0   :  { %v4728_v52 = vmul.f32 %v6376_v9, %v4714_v43 }
0x1dc2   :  { %v4736_v17 = vmul.f32 %v5582_v12, %v4728_v52 }
0x1dc3   :  { %v6378_v15 = vpop.eup %6377 }
0x1dc4   :  { %v4729_v16 = vmul.f32 %v6378_v15, %v4715_v51  ;;  %v7899_v19 = vadd.f32 %v5583_v18, %v4736_v17 }
0x1dc6   :  { %v4737_v46 = vmul.f32 %v5582_v12, %v4729_v16 }
0x1dc8   :  { %v7901_v48 = vadd.f32 %v5583_v18, %v4737_v46 }
0x1dca   :  { %v4746_v60 = vpack.c.bf16 %v7901_v48, %v7899_v19 }
0x1dcc   :  { %4890 = vmatmul.mubr.bf16.vlgmr.msra.gmra.mxu1 %v4746_v60 }
0x1e8c   :  { %v4891_v37 = vpop.f32.mrf.mxu1 }
0x1e8d   :  { %v4892_v39 = vadd.f32 %v4891_v37, %v4770_v32 }
0x1e8e   :  { %v4893_v63 = vpop.f32.mrf.mxu1 }
0x1e8f   :  { %v4900_v40 = vmul.f32 %v4892_v39, %v4892_v39  ;;  %v4894_v41 = vadd.f32 %v4893_v63, %v4774_v58 }
0x1e90   :  { %v4895_v42 = vpop.f32.mrf.mxu1 }
0x1e91   :  { %v4904_v43 = vmul.f32 %v4900_v40, %v4892_v39  ;;  %v4901_v45 = vmul.f32 %v4894_v41, %v4894_v41  ;;  %v4896_v50 = vadd.f32 %v4895_v42, %v4770_v32 }
0x1e92   :  { %v4897_v44 = vpop.f32.mrf.mxu1 }
0x1e93   :  { %v4908_v51 = vmul.f32 0.044715, %v4904_v43  ;;  %v4905_v14 = vmul.f32 %v4901_v45, %v4894_v41  ;;  %v4902_v49 = vmul.f32 %v4896_v50, %v4896_v50  ;;  %v4898_v25 = vadd.f32 %v4897_v44, %v4774_v58 }
0x1e95   :  { %v4912_v13 = vadd.f32 %v4908_v51, %v4892_v39  ;;  %v4909_v56 = vmul.f32 0.044715, %v4905_v14  ;;  %v4906_v57 = vmul.f32 %v4902_v49, %v4896_v50  ;;  %v4903_v35 = vmul.f32 %v4898_v25, %v4898_v25  ;;  %v5619_v51 = vld [vmem:[%s8007_s4 + $0x1] ss:$0 sm:$0xff] }
0x1e97   :  { %v4916_v53 = vmul.f32 0.7978846, %v4912_v13  ;;  %v4913_v33 = vadd.f32 %v4909_v56, %v4894_v41  ;;  %v4910_v55 = vmul.f32 0.044715, %v4906_v57  ;;  %v4907_v59 = vmul.f32 %v4903_v35, %v4898_v25  ;;  %v5620_v13 = vld [vmem:[%s8008_s10 + $0x1] ss:$0 sm:$0xff] }
0x1e99   :  { %v4917_v61 = vmul.f32 0.7978846, %v4913_v33  ;;  %v4914_v62 = vadd.f32 %v4910_v55, %v4896_v50  ;;  %v4911_v0 = vmul.f32 0.044715, %v4907_v59  ;;  %6379 = vtanh.f32 %v4916_v53 }
0x1e9b   :  { %6381 = vtanh.f32 %v4917_v61  ;;  %v4918_v5 = vmul.f32 0.7978846, %v4914_v62  ;;  %v4915_v1 = vadd.f32 %v4911_v0, %v4898_v25 }
0x1e9d   :  { %6383 = vtanh.f32 %v4918_v5  ;;  %v4919_v2 = vmul.f32 0.7978846, %v4915_v1 }
0x1e9f   :  { %6385 = vtanh.f32 %v4919_v2 }
0x1ea6   :  { %v6380_v54 = vpop.eup %6379 }
0x1ea7   :  { %v4924_v7 = vadd.f32 1.0, %v6380_v54 }
0x1ea8   :  { %v6382_v3 = vpop.eup %6381 }
0x1ea9   :  { %v4925_v4 = vadd.f32 1.0, %v6382_v3  ;;  %v4928_v16 = vmul.f32 0.5, %v4924_v7 }
0x1eaa   :  { %v6384_v6 = vpop.eup %6383 }
0x1eab   :  { %v4926_v8 = vadd.f32 1.0, %v6384_v6  ;;  %v4929_v15 = vmul.f32 0.5, %v4925_v4  ;;  %v4932_v10 = vmul.f32 %v4928_v16, %v4892_v39 }
0x1eac   :  { %v6386_v9 = vpop.eup %6385 }
0x1ead   :  { %v4930_v52 = vmul.f32 0.5, %v4926_v8  ;;  %v4927_v12 = vadd.f32 1.0, %v6386_v9  ;;  %v4933_v46 = vmul.f32 %v4929_v15, %v4894_v41 }
0x1eaf   :  { %v4931_v17 = vmul.f32 0.5, %v4927_v12  ;;  %v4934_v18 = vmul.f32 %v4930_v52, %v4896_v50 }
0x1eb1   :  { %v4935_v60 = vmul.f32 %v4931_v17, %v4898_v25  ;;  %v4936_v20 = vpack.c.bf16 %v4934_v18, %v4932_v10 }
0x1eb3   :  { %v4937_v21 = vpack.c.bf16 %v4935_v60, %v4933_v46 }
0x1eb5   :  { %5107 = vmatprep.mubr.bf16.mxu0 %v4937_v21 }
0x1eb6   :  { %5108 = vmatmul.mubr.bf16.vlgmr.msra.gmra.mxu0 %v4936_v20 }
0x1f76   :  { %v5823_v47 = vpop.f32.mrf.mxu0 }
0x1f78   :  { %v5824_v22 = vpop.f32.mrf.mxu0 }
0x1f79   :  { %v5825_v28 = vadd.f32 %v5824_v22, %v5823_v47 }
0x1f7a   :  { %v5826_v24 = vpop.f32.mrf.mxu0 }
0x1f7b   :  { %v5110_v23 = vadd.f32 %v5825_v28, %v5600_v38 }
0x1f7c   :  { %v5827_v29 = vpop.f32.mrf.mxu0 }
0x1f7d   :  { %v5828_v26 = vadd.f32 %v5827_v29, %v5826_v24  ;;  %v5116_v27 = vadd.f32 %v5110_v23, %v7899_v19 }
0x1f7f   :  { %v5113_v30 = vadd.f32 %v5828_v26, %v5600_v38  ;;  %5122 = vadd.xlane.f32.xlu0 %v5116_v27 }
0x1f81   :  { %v5117_v36 = vadd.f32 %v5113_v30, %v7901_v48 }
0x1f83   :  { %5124 = vadd.xlane.f32.xlu1 %v5117_v36 }
0x2008   :  { %v5123_v11 = vpop.xlane.xlu0 %5122 }
0x2009   :  { %v5126_v31 = vmul.f32 0.0078125, %v5123_v11 }
0x200b   :  { %v5128_v34 = vsub.f32 %v5116_v27, %v5126_v31 }
0x200c   :  { %v5125_v32 = vpop.xlane.xlu1 %5124 }
0x200d   :  { %v5127_v58 = vmul.f32 0.0078125, %v5125_v32  ;;  %v5130_v37 = vmul.f32 %v5128_v34, %v5128_v34 }
0x200f   :  { %v5129_v39 = vsub.f32 %v5117_v36, %v5127_v58  ;;  %5132 = vadd.xlane.f32.xlu0 %v5130_v37 }
0x2011   :  { %v5131_v63 = vmul.f32 %v5129_v39, %v5129_v39 }
0x2013   :  { %5134 = vadd.xlane.f32.xlu1 %v5131_v63 }
0x2098   :  { %v5133_v40 = vpop.xlane.xlu0 %5132 }
0x2099   :  { %v5136_v41 = vmul.f32 0.0078125, %v5133_v40 }
0x209b   :  { %v5138_v42 = vadd.f32 1e-05, %v5136_v41 }
0x209c   :  { %v5135_v43 = vpop.xlane.xlu1 %5134 }
0x209d   :  { %6387 = vrsqrt.f32 %v5138_v42  ;;  %v5137_v19 = vmul.f32 0.0078125, %v5135_v43 }
0x209f   :  { %v5139_v45 = vadd.f32 1e-05, %v5137_v19 }
0x20a1   :  { %6389 = vrsqrt.f32 %v5139_v45 }
0x20aa   :  { %v6388_v48 = vpop.eup %6387 }
0x20ab   :  { %v5142_v50 = vmul.f32 %v6388_v48, %v5128_v34 }
0x20ad   :  { %v5150_v49 = vmul.f32 %v5619_v51, %v5142_v50 }
0x20ae   :  { %v6390_v44 = vpop.eup %6389 }
0x20af   :  { %v5143_v14 = vmul.f32 %v6390_v44, %v5129_v39  ;;  %v5158_v57 = vadd.f32 %v5620_v13, %v5150_v49 }
0x20b1   :  { %v5151_v25 = vmul.f32 %v5619_v51, %v5143_v14 }
0x20b3   :  { %v5159_v56 = vadd.f32 %v5620_v13, %v5151_v25 }
0x20b5   :  { %v5162_v35 = vrot.slane %v5159_v56, 7 }
0x20b7   :  { %v5164_v53 = vsel %vm5163_vm12, %v5162_v35, %v5158_v57 }
0x20b8   :  { %5166 = vst [vmem:[#allocation27] sm:$0x3] %v5164_v53 }
0x20b9   :  { %6702 = shalt.err (!%p6699_p5)
}
0x20ba   :  { %s8009_s25 = sld [smem:[#allocation51_spill]] }
0x20c0   :  { %5176 = dma.vmem_to_hbm [thread:$0]  %s5174_s29, 32, %s8009_s25, [#allocation4]  }
0x20c1   :  { %6729 = dma.done.wait [#allocation4], 32  }
0x20c2   :  { %6730 = vsyncadd [#allocation4], 4294967264 }
0x20c3   :  { %5180 = vsyncpa [#allocation3], 1 }
0x20c4   :  { %5181 = vsyncpa [#allocation10], 1 }
0x20c5   :  { %5182 = vsyncpa [#allocation13], 1 }
0x20c6   :  { %5183 = vsyncpa [#allocation16], 1 }
0x20c7   :  { %5184 = vsyncpa [#allocation19], 1 }
0x20c8   :  { %5185 = vsyncpa [#allocation22], 1 }
0x20c9   :  { %5186 = vsyncpa [#allocation25], 1 }
0x20ca   :  { %5187 = vsyncpa [#allocation4], 1 }
0x20cb   :  { %5188 = vsyncpa [#allocation5], 1 }
0x20cc   :  { %5189 = vsyncpa [#allocation7], 1 }

</bundles_post_ra>
